<compile_context>
chip_gen: v6e
topology: v6e:2x2x1
jax: 0.10.0
libtpu: 0.0.40
codegen_flags: <defaults>
</compile_context>

<pallas_src>
import functools

import jax
import jax.numpy as jnp
from jax.experimental import pallas as pl
from jax.experimental.pallas import tpu as pltpu

IN_F = 784 * 2   # 1568
HID = 400
OUT_F = 1
TAU = 2.0
THR = 1.0


def _round_up(x, m):
    return (x + m - 1) // m * m


def _disc_kernel(x_ref, w1_ref, b1_ref, w2_ref, b2_ref, out_ref, h_ref,
                 *, n_steps, b_tile):
    """One batch tile, all time steps.

    x_ref : (T, b_tile, IN_F)  int8 spikes (or float)
    w1_ref: (IN_F, HID)        bf16
    b1_ref: (1, HID)           f32
    w2_ref: (1, HID)           f32   (row form of the (HID, 1) weight)
    b2_ref: (1,)               f32   (SMEM scalar)
    out_ref: (b_tile, 1)       f32
    h_ref : (T, b_tile, HID)   f32   VMEM scratch
    """
    # --- Batched Linear(1568 -> 400) over all T steps: one MXU matmul. ---
    # Cast int8 -> f32 first so the leading-dim merge is a trivial
    # (8,128)-tile-preserving reshape (b_tile is a multiple of 8), then bf16.
    x2d = (x_ref[...]
           .astype(jnp.float32)
           .reshape(n_steps * b_tile, IN_F)
           .astype(jnp.bfloat16))
    h2d = (jnp.dot(x2d, w1_ref[...], preferred_element_type=jnp.float32)
           + b1_ref[...])
    h_ref[...] = h2d.reshape(n_steps, b_tile, HID)

    # --- LIF recurrence over time (VPU only). ---
    inv_tau = 1.0 / TAU

    def lif_step(v_lif, spike_sum, ht):
        v = v_lif + (ht - v_lif) * inv_tau
        fired = v >= THR
        spike_sum = spike_sum + jnp.where(fired, 1.0, 0.0)
        v_lif = jnp.where(fired, 0.0, v)          # hard reset
        return v_lif, spike_sum

    v0 = jnp.zeros((b_tile, HID), jnp.float32)
    s0 = jnp.zeros((b_tile, HID), jnp.float32)
    if n_steps <= 16:
        # Short T: static unroll (LLO scheduler sees the whole loop).
        v_lif, spike_sum = v0, s0
        for t in range(n_steps):
            v_lif, spike_sum = lif_step(v_lif, spike_sum, h_ref[t])
    else:
        # Long T: bound code size / vreg live ranges.
        def body(t, carry):
            v, s = carry
            return lif_step(v, s, h_ref[t])
        v_lif, spike_sum = jax.lax.fori_loop(0, n_steps, body, (v0, s0))

    # --- Hoisted Linear(400 -> 1) + MPNode (exact: MPNode sums o_t, Linear2 is
    #     linear): v_mp = (sum_t spike_t) @ W2 + T*b2.  Lane reduction, not a
    #     degenerate N=1 MXU matmul. ---
    v_mp = (jnp.sum(spike_sum * w2_ref[...], axis=-1, keepdims=True)
            + float(n_steps) * b2_ref[0])

    # NOTE: (b_tile, 1) output -> masked store; negligible at these sizes.
    out_ref[...] = jax.nn.sigmoid(v_mp * (1.0 / n_steps))


def prepare_params(w1, b1, w2, b2):
    """One-time (outside jit) weight prep: bf16 W1, row-form b1/w2, scalar b2."""
    return (jnp.asarray(w1, jnp.bfloat16),                     # (IN_F, HID) bf16
            jnp.asarray(b1, jnp.float32).reshape(1, HID),
            jnp.asarray(w2, jnp.float32).reshape(1, HID),      # row form of (HID,1)
            jnp.asarray(b2, jnp.float32).reshape(1))


@jax.jit
def discriminator_mp_dvs_28(inputs, w1_bf16, b1_row, w2_row, b2_vec):
    """inputs: (T, B, 1568) spikes (int8/bool/float). Returns sigmoid(v_mp/T): (B, 1)."""
    T, B, F = inputs.shape
    assert F == IN_F

    # Batch tiling: one sublane-aligned tile if small, else 128-row tiles.
    if B <= 128:
        b_tile = _round_up(B, 8)
    else:
        b_tile = 128
    b_pad = _round_up(B, b_tile)
    num_tiles = b_pad // b_tile

    x = inputs
    if b_pad != B:
        # Cheap (1 B/elem for int8 spikes) and only when B % b_tile != 0.
        x = jnp.pad(inputs, ((0, 0), (0, b_pad - B), (0, 0)))

    # Explicit scoped-VMEM budget: x tile + resident W1 + H scratch (+ headroom).
    itemsize = jnp.dtype(x.dtype).itemsize
    lane = lambda n: _round_up(n, 128)
    x_tile_b = T * b_tile * lane(IN_F) * itemsize
    w1_b = IN_F * lane(HID) * 2
    h_b = T * b_tile * lane(HID) * 4
    vmem_limit = int(min(max(1.5 * (2 * x_tile_b + 2 * w1_b + h_b) + (4 << 20),
                             16 << 20), 96 << 20))

    out = pl.pallas_call(
        functools.partial(_disc_kernel, n_steps=T, b_tile=b_tile),
        out_shape=jax.ShapeDtypeStruct((b_pad, OUT_F), jnp.float32),
        grid=(num_tiles,),
        in_specs=[
            pl.BlockSpec((T, b_tile, IN_F), lambda i: (0, i, 0)),      # x tile
            pl.BlockSpec((IN_F, HID), lambda i: (0, 0)),               # W1 (resident)
            pl.BlockSpec((1, HID), lambda i: (0, 0)),                  # b1
            pl.BlockSpec((1, HID), lambda i: (0, 0)),                  # W2 row
            pl.BlockSpec(memory_space=pltpu.MemorySpace.SMEM),         # b2 scalar
        ],
        out_specs=pl.BlockSpec((b_tile, OUT_F), lambda i: (i, 0)),
        scratch_shapes=[pltpu.VMEM((T, b_tile, HID), jnp.float32)],    # H
        compiler_params=pltpu.CompilerParams(
            dimension_semantics=("parallel",),
            vmem_limit_bytes=vmem_limit),
    )(x, w1_bf16, b1_row, w2_row, b2_vec)

    return out[:B]


def _reference(inputs, w1, b1, w2, b2):
    """Pure-JAX reference of the same forward pass (per-step, un-hoisted)."""
    T, B, _ = inputs.shape
    xb = inputs.astype(jnp.bfloat16)
    w1b = w1.astype(jnp.bfloat16)
    v_lif = jnp.zeros((B, HID), jnp.float32)
    v_mp = jnp.zeros((B, OUT_F), jnp.float32)
    for t in range(T):
        h = jnp.dot(xb[t], w1b, preferred_element_type=jnp.float32) + b1
        v = v_lif + (h - v_lif) / TAU
        spike = (v >= THR).astype(jnp.float32)
        v_lif = v * (1.0 - spike)
        o = jnp.dot(spike, w2, preferred_element_type=jnp.float32) + b2
        v_mp = v_mp + o
    return jax.nn.sigmoid(v_mp / float(T))


def _init_params(key):
    """Deterministic init, PyTorch-Linear-style uniform(+-1/sqrt(fan_in))."""
    k1, k2, k3, k4 = jax.random.split(key, 4)
    lim1 = 1.0 / jnp.sqrt(IN_F)
    lim2 = 1.0 / jnp.sqrt(HID)
    w1 = jax.random.uniform(k1, (IN_F, HID), jnp.float32, -lim1, lim1)
    b1 = jax.random.uniform(k2, (HID,), jnp.float32, -lim1, lim1)
    w2 = jax.random.uniform(k3, (HID, OUT_F), jnp.float32, -lim2, lim2)
    b2 = jax.random.uniform(k4, (OUT_F,), jnp.float32, -lim2, lim2)
    return w1, b1, w2, b2


if __name__ == "__main__":
    key = jax.random.PRNGKey(0)
    k_in, k_par = jax.random.split(key)

    n_steps = 8   # glv.network_config['n_steps']
    batch = 2
    # DVS-style binary spike inputs over time, kept as int8 in HBM: (T, B, 1568)
    inputs = jax.random.bernoulli(k_in, 0.3, (n_steps, batch, IN_F)).astype(jnp.int8)

    w1, b1, w2, b2 = _init_params(k_par)
    params = prepare_params(w1, b1, w2, b2)   # one-time weight cast, outside jit

    out = discriminator_mp_dvs_28(inputs, *params)
    out = jax.block_until_ready(out)

    ref = _reference(inputs, w1, b1, w2, b2)
    assert out.shape == (batch, 1)
    # Tolerance leaves headroom for (rare) spike flips from differing f32
    # accumulation order between the Pallas and XLA bf16 matmuls near threshold.
    assert jnp.allclose(out, ref, rtol=5e-3, atol=5e-3), (out, ref)

    print("KERNEL_OK")
</pallas_src>

<mosaic_0001>
module attributes {stable_mosaic.version = 11 : i64} {
  func.func @_disc_kernel(%arg0: i32, %arg1: memref<8x8x1568xi8, #tpu.memory_space<vmem>>, %arg2: memref<1568x400xbf16, #tpu.memory_space<vmem>>, %arg3: memref<1x400xf32, #tpu.memory_space<vmem>>, %arg4: memref<1x400xf32, #tpu.memory_space<vmem>>, %arg5: memref<1xf32, #tpu.memory_space<smem>>, %arg6: memref<8x1xf32, #tpu.memory_space<vmem>>, %arg7: memref<8x8x400xf32, #tpu.memory_space<vmem>>) attributes {dimension_semantics = [#tpu.dimension_semantics<parallel>], iteration_bounds = array<i64: 1>, scalar_prefetch = 0 : i64, scratch_operands = 1 : i64, tpu.core_type = #tpu.core_type<tc>, window_params = [{transform_indices = @transform_0, window_bounds = array<i64: 8, 8, 1568>}, {pipeline_mode = #tpu.pipeline_mode<synchronous>, transform_indices = @transform_1, window_bounds = array<i64: 1568, 400>}, {pipeline_mode = #tpu.pipeline_mode<synchronous>, transform_indices = @transform_2, window_bounds = array<i64: 1, 400>}, {pipeline_mode = #tpu.pipeline_mode<synchronous>, transform_indices = @transform_3, window_bounds = array<i64: 1, 400>}, {transform_indices = @transform_4, window_bounds = array<i64: 1>}, {transform_indices = @transform_5, window_bounds = array<i64: 8, 1>}]} {
    %c0 = arith.constant 0 : index
    %c0_0 = arith.constant 0 : index
    %c0_1 = arith.constant 0 : index
    %0 = vector.load %arg1[%c0, %c0_0, %c0_1] : memref<8x8x1568xi8, #tpu.memory_space<vmem>>, vector<8x8x1568xi8>
    %1 = arith.sitofp %0 : vector<8x8x1568xi8> to vector<8x8x1568xf32>
    %2 = vector.shape_cast %1 : vector<8x8x1568xf32> to vector<64x1568xf32>
    %3 = arith.truncf %2 : vector<64x1568xf32> to vector<64x1568xbf16>
    %c0_2 = arith.constant 0 : index
    %c0_3 = arith.constant 0 : index
    %4 = vector.load %arg2[%c0_2, %c0_3] : memref<1568x400xbf16, #tpu.memory_space<vmem>>, vector<1568x400xbf16>
    %cst = arith.constant dense<0.000000e+00> : vector<64x400xf32>
    %5 = tpu.matmul %3, %4, %cst {dimension_numbers = #tpu.dot_dimension_numbers<[1], [0], [0], [1], [0, 0, 1, 1], [], []>} : vector<64x1568xbf16>, vector<1568x400xbf16>, vector<64x400xf32> -> vector<64x400xf32>
    %c0_4 = arith.constant 0 : index
    %c0_5 = arith.constant 0 : index
    %6 = vector.load %arg3[%c0_4, %c0_5] : memref<1x400xf32, #tpu.memory_space<vmem>>, vector<1x400xf32>
    %7 = vector.broadcast %6 : vector<1x400xf32> to vector<64x400xf32>
    %8 = arith.addf %5, %7 : vector<64x400xf32>
    %9 = vector.shape_cast %8 : vector<64x400xf32> to vector<8x8x400xf32>
    %c0_6 = arith.constant 0 : index
    %c0_7 = arith.constant 0 : index
    %c0_8 = arith.constant 0 : index
    %10 = vector.load %arg7[%c0_6, %c0_7, %c0_8] : memref<8x8x400xf32, #tpu.memory_space<vmem>>, vector<8x8x400xf32>
    tpu.vector_store %arg7[%c0_6, %c0_7, %c0_8], %9 {strides = array<i32>} : memref<8x8x400xf32, #tpu.memory_space<vmem>>, vector<8x8x400xf32>,
    %cst_9 = arith.constant 0.000000e+00 : f32
    %11 = vector.broadcast %cst_9 : f32 to vector<8x400xf32>
    %cst_10 = arith.constant 0.000000e+00 : f32
    %12 = vector.broadcast %cst_10 : f32 to vector<8x400xf32>
    %c0_11 = arith.constant 0 : index
    %c0_12 = arith.constant 0 : index
    %c0_13 = arith.constant 0 : index
    %13 = vector.load %arg7[%c0_11, %c0_12, %c0_13] : memref<8x8x400xf32, #tpu.memory_space<vmem>>, vector<1x8x400xf32>
    %14 = vector.shape_cast %13 : vector<1x8x400xf32> to vector<8x400xf32>
    %15 = arith.subf %14, %11 : vector<8x400xf32>
    %cst_14 = arith.constant 5.000000e-01 : f32
    %16 = vector.broadcast %cst_14 : f32 to vector<8x400xf32>
    %17 = arith.mulf %15, %16 : vector<8x400xf32>
    %18 = arith.addf %11, %17 : vector<8x400xf32>
    %cst_15 = arith.constant 1.000000e+00 : f32
    %19 = vector.broadcast %cst_15 : f32 to vector<8x400xf32>
    %20 = arith.cmpf oge, %18, %19 : vector<8x400xf32>
    %cst_16 = arith.constant 1.000000e+00 : f32
    %cst_17 = arith.constant 0.000000e+00 : f32
    %21 = vector.broadcast %cst_16 : f32 to vector<8x400xf32>
    %22 = vector.broadcast %cst_17 : f32 to vector<8x400xf32>
    %23 = arith.select %20, %21, %22 : vector<8x400xi1>, vector<8x400xf32>
    %24 = arith.addf %12, %23 : vector<8x400xf32>
    %cst_18 = arith.constant 0.000000e+00 : f32
    %25 = vector.broadcast %cst_18 : f32 to vector<8x400xf32>
    %26 = arith.select %20, %25, %18 : vector<8x400xi1>, vector<8x400xf32>
    %c1 = arith.constant 1 : index
    %c0_19 = arith.constant 0 : index
    %c0_20 = arith.constant 0 : index
    %27 = vector.load %arg7[%c1, %c0_19, %c0_20] : memref<8x8x400xf32, #tpu.memory_space<vmem>>, vector<1x8x400xf32>
    %28 = vector.shape_cast %27 : vector<1x8x400xf32> to vector<8x400xf32>
    %29 = arith.subf %28, %26 : vector<8x400xf32>
    %cst_21 = arith.constant 5.000000e-01 : f32
    %30 = vector.broadcast %cst_21 : f32 to vector<8x400xf32>
    %31 = arith.mulf %29, %30 : vector<8x400xf32>
    %32 = arith.addf %26, %31 : vector<8x400xf32>
    %cst_22 = arith.constant 1.000000e+00 : f32
    %33 = vector.broadcast %cst_22 : f32 to vector<8x400xf32>
    %34 = arith.cmpf oge, %32, %33 : vector<8x400xf32>
    %cst_23 = arith.constant 1.000000e+00 : f32
    %cst_24 = arith.constant 0.000000e+00 : f32
    %35 = vector.broadcast %cst_23 : f32 to vector<8x400xf32>
    %36 = vector.broadcast %cst_24 : f32 to vector<8x400xf32>
    %37 = arith.select %34, %35, %36 : vector<8x400xi1>, vector<8x400xf32>
    %38 = arith.addf %24, %37 : vector<8x400xf32>
    %cst_25 = arith.constant 0.000000e+00 : f32
    %39 = vector.broadcast %cst_25 : f32 to vector<8x400xf32>
    %40 = arith.select %34, %39, %32 : vector<8x400xi1>, vector<8x400xf32>
    %c2 = arith.constant 2 : index
    %c0_26 = arith.constant 0 : index
    %c0_27 = arith.constant 0 : index
    %41 = vector.load %arg7[%c2, %c0_26, %c0_27] : memref<8x8x400xf32, #tpu.memory_space<vmem>>, vector<1x8x400xf32>
    %42 = vector.shape_cast %41 : vector<1x8x400xf32> to vector<8x400xf32>
    %43 = arith.subf %42, %40 : vector<8x400xf32>
    %cst_28 = arith.constant 5.000000e-01 : f32
    %44 = vector.broadcast %cst_28 : f32 to vector<8x400xf32>
    %45 = arith.mulf %43, %44 : vector<8x400xf32>
    %46 = arith.addf %40, %45 : vector<8x400xf32>
    %cst_29 = arith.constant 1.000000e+00 : f32
    %47 = vector.broadcast %cst_29 : f32 to vector<8x400xf32>
    %48 = arith.cmpf oge, %46, %47 : vector<8x400xf32>
    %cst_30 = arith.constant 1.000000e+00 : f32
    %cst_31 = arith.constant 0.000000e+00 : f32
    %49 = vector.broadcast %cst_30 : f32 to vector<8x400xf32>
    %50 = vector.broadcast %cst_31 : f32 to vector<8x400xf32>
    %51 = arith.select %48, %49, %50 : vector<8x400xi1>, vector<8x400xf32>
    %52 = arith.addf %38, %51 : vector<8x400xf32>
    %cst_32 = arith.constant 0.000000e+00 : f32
    %53 = vector.broadcast %cst_32 : f32 to vector<8x400xf32>
    %54 = arith.select %48, %53, %46 : vector<8x400xi1>, vector<8x400xf32>
    %c3 = arith.constant 3 : index
    %c0_33 = arith.constant 0 : index
    %c0_34 = arith.constant 0 : index
    %55 = vector.load %arg7[%c3, %c0_33, %c0_34] : memref<8x8x400xf32, #tpu.memory_space<vmem>>, vector<1x8x400xf32>
    %56 = vector.shape_cast %55 : vector<1x8x400xf32> to vector<8x400xf32>
    %57 = arith.subf %56, %54 : vector<8x400xf32>
    %cst_35 = arith.constant 5.000000e-01 : f32
    %58 = vector.broadcast %cst_35 : f32 to vector<8x400xf32>
    %59 = arith.mulf %57, %58 : vector<8x400xf32>
    %60 = arith.addf %54, %59 : vector<8x400xf32>
    %cst_36 = arith.constant 1.000000e+00 : f32
    %61 = vector.broadcast %cst_36 : f32 to vector<8x400xf32>
    %62 = arith.cmpf oge, %60, %61 : vector<8x400xf32>
    %cst_37 = arith.constant 1.000000e+00 : f32
    %cst_38 = arith.constant 0.000000e+00 : f32
    %63 = vector.broadcast %cst_37 : f32 to vector<8x400xf32>
    %64 = vector.broadcast %cst_38 : f32 to vector<8x400xf32>
    %65 = arith.select %62, %63, %64 : vector<8x400xi1>, vector<8x400xf32>
    %66 = arith.addf %52, %65 : vector<8x400xf32>
    %cst_39 = arith.constant 0.000000e+00 : f32
    %67 = vector.broadcast %cst_39 : f32 to vector<8x400xf32>
    %68 = arith.select %62, %67, %60 : vector<8x400xi1>, vector<8x400xf32>
    %c4 = arith.constant 4 : index
    %c0_40 = arith.constant 0 : index
    %c0_41 = arith.constant 0 : index
    %69 = vector.load %arg7[%c4, %c0_40, %c0_41] : memref<8x8x400xf32, #tpu.memory_space<vmem>>, vector<1x8x400xf32>
    %70 = vector.shape_cast %69 : vector<1x8x400xf32> to vector<8x400xf32>
    %71 = arith.subf %70, %68 : vector<8x400xf32>
    %cst_42 = arith.constant 5.000000e-01 : f32
    %72 = vector.broadcast %cst_42 : f32 to vector<8x400xf32>
    %73 = arith.mulf %71, %72 : vector<8x400xf32>
    %74 = arith.addf %68, %73 : vector<8x400xf32>
    %cst_43 = arith.constant 1.000000e+00 : f32
    %75 = vector.broadcast %cst_43 : f32 to vector<8x400xf32>
    %76 = arith.cmpf oge, %74, %75 : vector<8x400xf32>
    %cst_44 = arith.constant 1.000000e+00 : f32
    %cst_45 = arith.constant 0.000000e+00 : f32
    %77 = vector.broadcast %cst_44 : f32 to vector<8x400xf32>
    %78 = vector.broadcast %cst_45 : f32 to vector<8x400xf32>
    %79 = arith.select %76, %77, %78 : vector<8x400xi1>, vector<8x400xf32>
    %80 = arith.addf %66, %79 : vector<8x400xf32>
    %cst_46 = arith.constant 0.000000e+00 : f32
    %81 = vector.broadcast %cst_46 : f32 to vector<8x400xf32>
    %82 = arith.select %76, %81, %74 : vector<8x400xi1>, vector<8x400xf32>
    %c5 = arith.constant 5 : index
    %c0_47 = arith.constant 0 : index
    %c0_48 = arith.constant 0 : index
    %83 = vector.load %arg7[%c5, %c0_47, %c0_48] : memref<8x8x400xf32, #tpu.memory_space<vmem>>, vector<1x8x400xf32>
    %84 = vector.shape_cast %83 : vector<1x8x400xf32> to vector<8x400xf32>
    %85 = arith.subf %84, %82 : vector<8x400xf32>
    %cst_49 = arith.constant 5.000000e-01 : f32
    %86 = vector.broadcast %cst_49 : f32 to vector<8x400xf32>
    %87 = arith.mulf %85, %86 : vector<8x400xf32>
    %88 = arith.addf %82, %87 : vector<8x400xf32>
    %cst_50 = arith.constant 1.000000e+00 : f32
    %89 = vector.broadcast %cst_50 : f32 to vector<8x400xf32>
    %90 = arith.cmpf oge, %88, %89 : vector<8x400xf32>
    %cst_51 = arith.constant 1.000000e+00 : f32
    %cst_52 = arith.constant 0.000000e+00 : f32
    %91 = vector.broadcast %cst_51 : f32 to vector<8x400xf32>
    %92 = vector.broadcast %cst_52 : f32 to vector<8x400xf32>
    %93 = arith.select %90, %91, %92 : vector<8x400xi1>, vector<8x400xf32>
    %94 = arith.addf %80, %93 : vector<8x400xf32>
    %cst_53 = arith.constant 0.000000e+00 : f32
    %95 = vector.broadcast %cst_53 : f32 to vector<8x400xf32>
    %96 = arith.select %90, %95, %88 : vector<8x400xi1>, vector<8x400xf32>
    %c6 = arith.constant 6 : index
    %c0_54 = arith.constant 0 : index
    %c0_55 = arith.constant 0 : index
    %97 = vector.load %arg7[%c6, %c0_54, %c0_55] : memref<8x8x400xf32, #tpu.memory_space<vmem>>, vector<1x8x400xf32>
    %98 = vector.shape_cast %97 : vector<1x8x400xf32> to vector<8x400xf32>
    %99 = arith.subf %98, %96 : vector<8x400xf32>
    %cst_56 = arith.constant 5.000000e-01 : f32
    %100 = vector.broadcast %cst_56 : f32 to vector<8x400xf32>
    %101 = arith.mulf %99, %100 : vector<8x400xf32>
    %102 = arith.addf %96, %101 : vector<8x400xf32>
    %cst_57 = arith.constant 1.000000e+00 : f32
    %103 = vector.broadcast %cst_57 : f32 to vector<8x400xf32>
    %104 = arith.cmpf oge, %102, %103 : vector<8x400xf32>
    %cst_58 = arith.constant 1.000000e+00 : f32
    %cst_59 = arith.constant 0.000000e+00 : f32
    %105 = vector.broadcast %cst_58 : f32 to vector<8x400xf32>
    %106 = vector.broadcast %cst_59 : f32 to vector<8x400xf32>
    %107 = arith.select %104, %105, %106 : vector<8x400xi1>, vector<8x400xf32>
    %108 = arith.addf %94, %107 : vector<8x400xf32>
    %cst_60 = arith.constant 0.000000e+00 : f32
    %109 = vector.broadcast %cst_60 : f32 to vector<8x400xf32>
    %110 = arith.select %104, %109, %102 : vector<8x400xi1>, vector<8x400xf32>
    %c7 = arith.constant 7 : index
    %c0_61 = arith.constant 0 : index
    %c0_62 = arith.constant 0 : index
    %111 = vector.load %arg7[%c7, %c0_61, %c0_62] : memref<8x8x400xf32, #tpu.memory_space<vmem>>, vector<1x8x400xf32>
    %112 = vector.shape_cast %111 : vector<1x8x400xf32> to vector<8x400xf32>
    %113 = arith.subf %112, %110 : vector<8x400xf32>
    %cst_63 = arith.constant 5.000000e-01 : f32
    %114 = vector.broadcast %cst_63 : f32 to vector<8x400xf32>
    %115 = arith.mulf %113, %114 : vector<8x400xf32>
    %116 = arith.addf %110, %115 : vector<8x400xf32>
    %cst_64 = arith.constant 1.000000e+00 : f32
    %117 = vector.broadcast %cst_64 : f32 to vector<8x400xf32>
    %118 = arith.cmpf oge, %116, %117 : vector<8x400xf32>
    %cst_65 = arith.constant 1.000000e+00 : f32
    %cst_66 = arith.constant 0.000000e+00 : f32
    %119 = vector.broadcast %cst_65 : f32 to vector<8x400xf32>
    %120 = vector.broadcast %cst_66 : f32 to vector<8x400xf32>
    %121 = arith.select %118, %119, %120 : vector<8x400xi1>, vector<8x400xf32>
    %122 = arith.addf %108, %121 : vector<8x400xf32>
    %c0_67 = arith.constant 0 : index
    %c0_68 = arith.constant 0 : index
    %123 = vector.load %arg4[%c0_67, %c0_68] : memref<1x400xf32, #tpu.memory_space<vmem>>, vector<1x400xf32>
    %124 = vector.broadcast %123 : vector<1x400xf32> to vector<8x400xf32>
    %125 = arith.mulf %122, %124 : vector<8x400xf32>
    %cst_69 = arith.constant dense<0.000000e+00> : vector<8xf32>
    %126 = vector.multi_reduction <add>, %125, %cst_69 [1] : vector<8x400xf32> to vector<8xf32>
    %127 = vector.shape_cast %126 : vector<8xf32> to vector<8x1xf32>
    %c0_70 = arith.constant 0 : index
    %128 = memref.load %arg5[%c0_70] : memref<1xf32, #tpu.memory_space<smem>>
    %cst_71 = arith.constant 8.000000e+00 : f32
    %129 = arith.mulf %cst_71, %128 : f32
    %130 = vector.broadcast %129 : f32 to vector<8x1xf32>
    %131 = arith.addf %127, %130 : vector<8x1xf32>
    %cst_72 = arith.constant 1.250000e-01 : f32
    %132 = vector.broadcast %cst_72 : f32 to vector<8x1xf32>
    %133 = arith.mulf %131, %132 : vector<8x1xf32>
    %134 = arith.negf %133 : vector<8x1xf32>
    %135 = math.exp %134 : vector<8x1xf32>
    %cst_73 = arith.constant 1.000000e+00 : f32
    %136 = vector.broadcast %cst_73 : f32 to vector<8x1xf32>
    %137 = arith.addf %136, %135 : vector<8x1xf32>
    %138 = arith.divf %136, %137 : vector<8x1xf32>
    %c0_74 = arith.constant 0 : index
    %c0_75 = arith.constant 0 : index
    %139 = vector.load %arg6[%c0_74, %c0_75] : memref<8x1xf32, #tpu.memory_space<vmem>>, vector<8x1xf32>
    tpu.vector_store %arg6[%c0_74, %c0_75], %138 {strides = array<i32>} : memref<8x1xf32, #tpu.memory_space<vmem>>, vector<8x1xf32>,
    return
  }
  func.func @transform_0(%arg0: i32) -> (i32, i32, i32) {
    %c0_i32 = arith.constant 0 : i32
    %c0_i32_0 = arith.constant 0 : i32
    %c0_i32_1 = arith.constant 0 : i32
    return %c0_i32, %arg0, %c0_i32_0 : i32, i32, i32
  }
  func.func @transform_1(%arg0: i32) -> (i32, i32) {
    %c0_i32 = arith.constant 0 : i32
    %c0_i32_0 = arith.constant 0 : i32
    %c0_i32_1 = arith.constant 0 : i32
    return %c0_i32, %c0_i32_0 : i32, i32
  }
  func.func @transform_2(%arg0: i32) -> (i32, i32) {
    %c0_i32 = arith.constant 0 : i32
    %c0_i32_0 = arith.constant 0 : i32
    %c0_i32_1 = arith.constant 0 : i32
    return %c0_i32, %c0_i32_0 : i32, i32
  }
  func.func @transform_3(%arg0: i32) -> (i32, i32) {
    %c0_i32 = arith.constant 0 : i32
    %c0_i32_0 = arith.constant 0 : i32
    %c0_i32_1 = arith.constant 0 : i32
    return %c0_i32, %c0_i32_0 : i32, i32
  }
  func.func @transform_4(%arg0: i32) -> i32 {
    %c0_i32 = arith.constant 0 : i32
    %c0_i32_0 = arith.constant 0 : i32
    return %c0_i32 : i32
  }
  func.func @transform_5(%arg0: i32) -> (i32, i32) {
    %c0_i32 = arith.constant 0 : i32
    %c0_i32_0 = arith.constant 0 : i32
    return %arg0, %c0_i32 : i32, i32
  }
}

</mosaic_0001>

<bundles_post_ra>
// kernel: discriminator_mp_dvs_28.1
= control target key start
LH: loop header
LB: loop body
LE: loop exit
PB: predicated region body
PF: predicated region fallthrough
CT: control target
= control target key end

     0   :  { %vm2688_vm0 = vcmask 261120   ;;  %s7290_s1 = inlined_call_operand.vmem [shape: bf16[1568,400], index: 1, kind: input, shape index: {}]   ;;  %s7291_s0 = inlined_call_operand.vmem [shape: s8[8,8,1568], index: 0, kind: input, shape index: {}]   ;;  %s7292_s2 = inlined_call_operand.vmem [shape: f32[1,400], index: 2, kind: input, shape index: {}]   ;;  %s7293_s3 = inlined_call_operand.vmem [shape: f32[1,400], index: 3, kind: input, shape index: {}]   ;;  %s7294_s4 = inlined_call_operand.<no memory space> [shape: f32[1], index: 4, kind: input, shape index: {}]   ;;  %s7295_s5 = inlined_call_operand.vmem [shape: f32[8,1], index: 5, kind: output, shape index: {}]  }
   0x1   :  { %v4463_v0 = vld [vmem:[%s7290_s1 + $0xe4] ss:$16 sps:$4 sm:$0xff]   ;;  %v4467_v2 = vld [vmem:[%s7290_s1 + $0xe0] ss:$16 sps:$4 sm:$0xff]   ;;  %s4044_s23 = smul.f32 8.0, %s7294_s4 }
   0x2   :  { %v4465_v1 = vld [vmem:[%s7290_s1 + $0x2e4] ss:$16 sps:$4 sm:$0xff]   ;;  %2701 = vmatprep.subr.bf16.mxu0 %v4463_v0  ;;  %v4468_v3 = vld [vmem:[%s7290_s1 + $0x2e0] ss:$16 sps:$4 sm:$0xff]  }
   0x3   :  { %2774 = vmatprep.subr.bf16.mxu1 %v4465_v1  ;;  %v4469_v4 = vld [vmem:[%s7290_s1 + $0xc4] ss:$16 sps:$4 sm:$0xff]   ;;  %2702 = vmatpush1.bf16.msra.mxu0 %v4467_v2  ;;  %v4473_v6 = vld [vmem:[%s7290_s1 + $0xc0] ss:$16 sps:$4 sm:$0xff]  }
   0x4   :  { %2775 = vmatpush1.bf16.msra.mxu1 %v4468_v3  ;;  %v4471_v5 = vld [vmem:[%s7290_s1 + $0x2c4] ss:$16 sps:$4 sm:$0xff]   ;;  %2703 = vmatprep.subr.bf16.mxu0 %v4469_v4  ;;  %v4474_v7 = vld [vmem:[%s7290_s1 + $0x2c0] ss:$16 sps:$4 sm:$0xff]  }
   0x5   :  { %2776 = vmatprep.subr.bf16.mxu1 %v4471_v5  ;;  %v4475_v8 = vld [vmem:[%s7290_s1 + $0xa4] ss:$16 sps:$4 sm:$0xff]   ;;  %v4479_v10 = vld [vmem:[%s7290_s1 + $0xa0] ss:$16 sps:$4 sm:$0xff]  }
   0x6   :  { %v4477_v9 = vld [vmem:[%s7290_s1 + $0x2a4] ss:$16 sps:$4 sm:$0xff]   ;;  %v4480_v11 = vld [vmem:[%s7290_s1 + $0x2a0] ss:$16 sps:$4 sm:$0xff]  }
   0x7   :  { %2704 = vmatpush1.bf16.msra.mxu0 %v4473_v6  ;;  %v4481_v12 = vld [vmem:[%s7290_s1 + $0x84] ss:$16 sps:$4 sm:$0xff]   ;;  %v4485_v14 = vld [vmem:[%s7290_s1 + $0x80] ss:$16 sps:$4 sm:$0xff]  }
   0x8   :  { %2777 = vmatpush1.bf16.msra.mxu1 %v4474_v7  ;;  %2705 = vmatprep.subr.bf16.mxu0 %v4475_v8  ;;  %v4483_v13 = vld [vmem:[%s7290_s1 + $0x284] ss:$16 sps:$4 sm:$0xff]   ;;  %v4486_v15 = vld [vmem:[%s7290_s1 + $0x280] ss:$16 sps:$4 sm:$0xff]  }
   0x9   :  { %2778 = vmatprep.subr.bf16.mxu1 %v4477_v9  ;;  %v4487_v16 = vld [vmem:[%s7290_s1 + $0x64] ss:$16 sps:$4 sm:$0xff]   ;;  %v4491_v18 = vld [vmem:[%s7290_s1 + $0x60] ss:$16 sps:$4 sm:$0xff]  }
   0xa   :  { %v4489_v17 = vld [vmem:[%s7290_s1 + $0x264] ss:$16 sps:$4 sm:$0xff]   ;;  %v4492_v19 = vld [vmem:[%s7290_s1 + $0x260] ss:$16 sps:$4 sm:$0xff]  }
   0xb   :  { %2706 = vmatpush1.bf16.msra.mxu0 %v4479_v10  ;;  %v4493_v20 = vld [vmem:[%s7290_s1 + $0x44] ss:$16 sps:$4 sm:$0xff]   ;;  %v4497_v22 = vld [vmem:[%s7290_s1 + $0x40] ss:$16 sps:$4 sm:$0xff]  }
   0xc   :  { %2779 = vmatpush1.bf16.msra.mxu1 %v4480_v11  ;;  %2707 = vmatprep.subr.bf16.mxu0 %v4481_v12  ;;  %v4495_v21 = vld [vmem:[%s7290_s1 + $0x244] ss:$16 sps:$4 sm:$0xff]   ;;  %v4498_v23 = vld [vmem:[%s7290_s1 + $0x240] ss:$16 sps:$4 sm:$0xff]  }
   0xd   :  { %2780 = vmatprep.subr.bf16.mxu1 %v4483_v13  ;;  %v4499_v24 = vld [vmem:[%s7290_s1 + $0x24] ss:$16 sps:$4 sm:$0xff]   ;;  %v4503_v26 = vld [vmem:[%s7290_s1 + $0x20] ss:$16 sps:$4 sm:$0xff]  }
   0xe   :  { %v4501_v25 = vld [vmem:[%s7290_s1 + $0x224] ss:$16 sps:$4 sm:$0xff]   ;;  %v4504_v27 = vld [vmem:[%s7290_s1 + $0x220] ss:$16 sps:$4 sm:$0xff]  }
   0xf   :  { %2708 = vmatpush1.bf16.msra.mxu0 %v4485_v14  ;;  %v4505_v28 = vld [vmem:[%s7290_s1 + $0x4] ss:$16 sps:$4 sm:$0xff]   ;;  %v4509_v30 = vld [vmem:[%s7290_s1] ss:$16 sps:$4 sm:$0xff]  }
  0x10   :  { %2781 = vmatpush1.bf16.msra.mxu1 %v4486_v15  ;;  %2709 = vmatprep.subr.bf16.mxu0 %v4487_v16  ;;  %v4507_v29 = vld [vmem:[%s7290_s1 + $0x204] ss:$16 sps:$4 sm:$0xff]   ;;  %v4510_v31 = vld [vmem:[%s7290_s1 + $0x200] ss:$16 sps:$4 sm:$0xff]  }
  0x11   :  { %2782 = vmatprep.subr.bf16.mxu1 %v4489_v17  ;;  %v4511_v32 = vld [vmem:[%s7290_s1 + $0x1e4] ss:$16 sps:$4 sm:$0xff]   ;;  %v4515_v34 = vld [vmem:[%s7290_s1 + $0x1e0] ss:$16 sps:$4 sm:$0xff]  }
  0x12   :  { %v4513_v33 = vld [vmem:[%s7290_s1 + $0x3e4] ss:$16 sps:$4 sm:$0xff]   ;;  %v4516_v35 = vld [vmem:[%s7290_s1 + $0x3e0] ss:$16 sps:$4 sm:$0xff]  }
  0x13   :  { %2710 = vmatpush1.bf16.msra.mxu0 %v4491_v18  ;;  %v4517_v36 = vld [vmem:[%s7290_s1 + $0x1c4] ss:$16 sps:$4 sm:$0xff]   ;;  %v4521_v38 = vld [vmem:[%s7290_s1 + $0x1c0] ss:$16 sps:$4 sm:$0xff]  }
  0x14   :  { %2783 = vmatpush1.bf16.msra.mxu1 %v4492_v19  ;;  %2711 = vmatprep.subr.bf16.mxu0 %v4493_v20  ;;  %v4519_v37 = vld [vmem:[%s7290_s1 + $0x3c4] ss:$16 sps:$4 sm:$0xff]   ;;  %v4522_v39 = vld [vmem:[%s7290_s1 + $0x3c0] ss:$16 sps:$4 sm:$0xff]  }
  0x15   :  { %2784 = vmatprep.subr.bf16.mxu1 %v4495_v21  ;;  %v4523_v40 = vld [vmem:[%s7290_s1 + $0x1a4] ss:$16 sps:$4 sm:$0xff]   ;;  %v4527_v42 = vld [vmem:[%s7290_s1 + $0x1a0] ss:$16 sps:$4 sm:$0xff]  }
  0x16   :  { %v4525_v41 = vld [vmem:[%s7290_s1 + $0x3a4] ss:$16 sps:$4 sm:$0xff]   ;;  %v4528_v43 = vld [vmem:[%s7290_s1 + $0x3a0] ss:$16 sps:$4 sm:$0xff]  }
  0x17   :  { %2712 = vmatpush1.bf16.msra.mxu0 %v4497_v22  ;;  %v4529_v44 = vld [vmem:[%s7290_s1 + $0x184] ss:$16 sps:$4 sm:$0xff]   ;;  %v26_v47 = vld [vmem:[%s7291_s0 + $0x1a] sm:$0xff] }
  0x18   :  { %2785 = vmatpush1.bf16.msra.mxu1 %v4498_v23  ;;  %2713 = vmatprep.subr.bf16.mxu0 %v4499_v24  ;;  %v4531_v45 = vld [vmem:[%s7290_s1 + $0x384] ss:$16 sps:$4 sm:$0xff]   ;;  %v4533_v50 = vld [vmem:[%s7290_s1 + $0x180] ss:$16 sps:$4 sm:$0xff]   ;;  %v68_v52 = vunpack.c.1.s8 %v26_v47  ;;  %v70_v53 = vunpack.c.3.s8 %v26_v47  ;;  %v67_v7 = vunpack.c.0.s8 %v26_v47  ;;  %v69_v9 = vunpack.c.2.s8 %v26_v47 }
  0x19   :  { %2786 = vmatprep.subr.bf16.mxu1 %v4501_v25  ;;  %v22_v46 = vld [vmem:[%s7291_s0] sm:$0xff] }
  0x1a   :  { %v55_v48 = vunpack.c.1.s8 %v22_v46  ;;  %v57_v49 = vunpack.c.3.s8 %v22_v46  ;;  %v4534_v51 = vld [vmem:[%s7290_s1 + $0x380] ss:$16 sps:$4 sm:$0xff]   ;;  %v4535_v54 = vld [vmem:[%s7290_s1 + $0x164] ss:$16 sps:$4 sm:$0xff]   ;;  %v172_v58 = vcvt.s32.f32 %v68_v52  ;;  %v174_v59 = vcvt.s32.f32 %v70_v53 }
  0x1b   :  { %2714 = vmatpush1.bf16.msra.mxu0 %v4503_v26  ;;  %v4537_v55 = vld [vmem:[%s7290_s1 + $0x364] ss:$16 sps:$4 sm:$0xff]   ;;  %v4539_v60 = vld [vmem:[%s7290_s1 + $0x160] ss:$16 sps:$4 sm:$0xff]   ;;  %v54_v6 = vunpack.c.0.s8 %v22_v46  ;;  %v56_v8 = vunpack.c.2.s8 %v22_v46  ;;  %v171_v15 = vcvt.s32.f32 %v67_v7  ;;  %v173_v17 = vcvt.s32.f32 %v69_v9 }
  0x1c   :  { %2787 = vmatpush1.bf16.msra.mxu1 %v4504_v27  ;;  %2715 = vmatprep.subr.bf16.mxu0 %v4505_v28  ;;  %v159_v56 = vcvt.s32.f32 %v55_v48  ;;  %v161_v57 = vcvt.s32.f32 %v57_v49  ;;  %v4540_v61 = vld [vmem:[%s7290_s1 + $0x360] ss:$16 sps:$4 sm:$0xff]   ;;  %v4541_v0 = vld [vmem:[%s7290_s1 + $0x144] ss:$16 sps:$4 sm:$0xff]  }
  0x1d   :  { %2788 = vmatprep.subr.bf16.mxu1 %v4507_v29  ;;  %v4543_v1 = vld [vmem:[%s7290_s1 + $0x344] ss:$16 sps:$4 sm:$0xff]   ;;  %v4545_v2 = vld [vmem:[%s7290_s1 + $0x140] ss:$16 sps:$4 sm:$0xff]   ;;  %v158_v14 = vcvt.s32.f32 %v54_v6  ;;  %v160_v16 = vcvt.s32.f32 %v56_v8 }
  0x1e   :  { %v5253_v62 = vpack.c.bf16 %v172_v58, %v159_v56  ;;  %v5255_v63 = vpack.c.bf16 %v174_v59, %v161_v57  ;;  %v4546_v3 = vld [vmem:[%s7290_s1 + $0x340] ss:$16 sps:$4 sm:$0xff]   ;;  %v4547_v4 = vld [vmem:[%s7290_s1 + $0x124] ss:$16 sps:$4 sm:$0xff]   ;;  %v38_v58 = vld [vmem:[%s7291_s0 + $0x68] sm:$0xff] }
  0x1f   :  { %2716 = vmatpush1.bf16.msra.mxu0 %v4509_v30  ;;  %v4549_v5 = vld [vmem:[%s7290_s1 + $0x324] ss:$16 sps:$4 sm:$0xff]   ;;  %v4551_v10 = vld [vmem:[%s7290_s1 + $0x120] ss:$16 sps:$4 sm:$0xff]   ;;  %v5301_v22 = vpack.c.bf16 %v171_v15, %v158_v14  ;;  %v5303_v23 = vpack.c.bf16 %v173_v17, %v160_v16 }
  0x20   :  { %2789 = vmatpush1.bf16.msra.mxu1 %v4510_v31  ;;  %2717 = vmatprep.subr.bf16.mxu0 %v4511_v32  ;;  %v4552_v11 = vld [vmem:[%s7290_s1 + $0x320] ss:$16 sps:$4 sm:$0xff]   ;;  %v4553_v12 = vld [vmem:[%s7290_s1 + $0x104] ss:$16 sps:$4 sm:$0xff]  }
  0x21   :  { %2790 = vmatprep.subr.bf16.mxu1 %v4513_v33  ;;  %2733 = vmatprep.mubr.bf16.mxu0 %v5253_v62  ;;  %v4555_v13 = vld [vmem:[%s7290_s1 + $0x304] ss:$16 sps:$4 sm:$0xff]   ;;  %v4557_v18 = vld [vmem:[%s7290_s1 + $0x100] ss:$16 sps:$4 sm:$0xff]  }
  0x22   :  { %2806 = vmatprep.mubr.bf16.mxu1 %v5255_v63  ;;  %v4558_v19 = vld [vmem:[%s7290_s1 + $0x300] ss:$16 sps:$4 sm:$0xff]   ;;  %v4561_v20 = vld [vmem:[%s7290_s1 + $0x4e4] ss:$16 sps:$4 sm:$0xff]  }
  0x23   :  { %2718 = vmatpush2.bf16.msra.mxu0 %v4515_v34  ;;  %v4564_v21 = vld [vmem:[%s7290_s1 + $0x6e4] ss:$16 sps:$4 sm:$0xff]   ;;  %v4559_v24 = vld [vmem:[%s7290_s1 + $0x4e0] ss:$16 sps:$4 sm:$0xff]  }
  0x24   :  { %2791 = vmatpush2.bf16.msra.mxu1 %v4516_v35  ;;  %2719 = vmatprep.subr.bf16.mxu0 %v4517_v36  ;;  %v4562_v25 = vld [vmem:[%s7290_s1 + $0x6e0] ss:$16 sps:$4 sm:$0xff]   ;;  %v4567_v26 = vld [vmem:[%s7290_s1 + $0x4c4] ss:$16 sps:$4 sm:$0xff]  }
  0x25   :  { %2792 = vmatprep.subr.bf16.mxu1 %v4519_v37  ;;  %v4570_v27 = vld [vmem:[%s7290_s1 + $0x6c4] ss:$16 sps:$4 sm:$0xff]   ;;  %v4565_v28 = vld [vmem:[%s7290_s1 + $0x4c0] ss:$16 sps:$4 sm:$0xff]  }
  0x26   :  { %v4568_v29 = vld [vmem:[%s7290_s1 + $0x6c0] ss:$16 sps:$4 sm:$0xff]   ;;  %v30_v30 = vld [vmem:[%s7291_s0 + $0x34] sm:$0xff] }
  0x27   :  { %2720 = vmatpush2.bf16.msra.mxu0 %v4521_v38  ;;  %v34_v31 = vld [vmem:[%s7291_s0 + $0x4e] sm:$0xff]  ;;  %v81_v33 = vunpack.c.1.s8 %v30_v30  ;;  %v80_v35 = vunpack.c.0.s8 %v30_v30  ;;  %v83_v38 = vunpack.c.3.s8 %v30_v30  ;;  %v42_v59 = vld [vmem:[%s7291_s0 + $0x82] sm:$0xff] }
  0x28   :  { %2793 = vmatpush2.bf16.msra.mxu1 %v4522_v39  ;;  %2721 = vmatprep.subr.bf16.mxu0 %v4523_v40  ;;  %v4573_v32 = vld [vmem:[%s7290_s1 + $0x4a4] ss:$16 sps:$4 sm:$0xff]   ;;  %v94_v34 = vunpack.c.1.s8 %v34_v31  ;;  %v93_v36 = vunpack.c.0.s8 %v34_v31  ;;  %v96_v39 = vunpack.c.3.s8 %v34_v31  ;;  %v82_v40 = vunpack.c.2.s8 %v30_v30  ;;  %v4571_v46 = vld [vmem:[%s7290_s1 + $0x4a0] ss:$16 sps:$4 sm:$0xff]  }
  0x29   :  { %2794 = vmatprep.subr.bf16.mxu1 %v4525_v41  ;;  %v4576_v37 = vld [vmem:[%s7290_s1 + $0x6a4] ss:$16 sps:$4 sm:$0xff]   ;;  %v95_v41 = vunpack.c.2.s8 %v34_v31  ;;  %v4574_v47 = vld [vmem:[%s7290_s1 + $0x6a0] ss:$16 sps:$4 sm:$0xff]   ;;  %v187_v48 = vcvt.s32.f32 %v83_v38 }
  0x2a   :  { %v200_v49 = vcvt.s32.f32 %v96_v39  ;;  %v4579_v52 = vld [vmem:[%s7290_s1 + $0x484] ss:$16 sps:$4 sm:$0xff]   ;;  %v4577_v6 = vld [vmem:[%s7290_s1 + $0x480] ss:$16 sps:$4 sm:$0xff]  }
  0x2b   :  { %2722 = vmatpush2.bf16.msra.mxu0 %v4527_v42  ;;  %v185_v42 = vcvt.s32.f32 %v81_v33  ;;  %v4580_v7 = vld [vmem:[%s7290_s1 + $0x680] ss:$16 sps:$4 sm:$0xff]  }
  0x2c   :  { %2795 = vmatpush2.bf16.msra.mxu1 %v4528_v43  ;;  %2723 = vmatprep.subr.bf16.mxu0 %v4529_v44  ;;  %v198_v43 = vcvt.s32.f32 %v94_v34  ;;  %v184_v44 = vcvt.s32.f32 %v80_v35  ;;  %v5353_v56 = vpack.c.bf16 %v200_v49, %v187_v48  ;;  %v4600_v48 = vld [vmem:[%s7290_s1 + $0x624] ss:$16 sps:$4 sm:$0xff]  }
  0x2d   :  { %2796 = vmatprep.subr.bf16.mxu1 %v4531_v45  ;;  %v197_v45 = vcvt.s32.f32 %v93_v36 }
  0x2e   :  { %v5346_v53 = vpack.c.bf16 %v198_v43, %v185_v42 }
  0x2f   :  { %2724 = vmatpush2.bf16.msra.mxu0 %v4533_v50  ;;  %v186_v50 = vcvt.s32.f32 %v82_v40  ;;  %v4589_v40 = vld [vmem:[%s7290_s1 + $0x440] ss:$16 sps:$4 sm:$0xff]  }
  0x30   :  { %2797 = vmatpush2.bf16.msra.mxu1 %v4534_v51  ;;  %2725 = vmatprep.subr.bf16.mxu0 %v4535_v54  ;;  %v199_v51 = vcvt.s32.f32 %v95_v41  ;;  %v5348_v54 = vpack.c.bf16 %v197_v45, %v184_v44  ;;  %v4592_v41 = vld [vmem:[%s7290_s1 + $0x640] ss:$16 sps:$4 sm:$0xff]  }
  0x31   :  { %2798 = vmatprep.subr.bf16.mxu1 %v4537_v55  ;;  %v4582_v55 = vld [vmem:[%s7290_s1 + $0x684] ss:$16 sps:$4 sm:$0xff]  }
  0x32   :  { %v5355_v57 = vpack.c.bf16 %v199_v51, %v186_v50 }
  0x33   :  { %2726 = vmatpush2.bf16.msra.mxu0 %v4539_v60  ;;  %v107_v60 = vunpack.c.1.s8 %v38_v58 }
  0x34   :  { %2799 = vmatpush2.bf16.msra.mxu1 %v4540_v61  ;;  %2727 = vmatprep.subr.bf16.mxu0 %v4541_v0  ;;  %v120_v61 = vunpack.c.1.s8 %v42_v59  ;;  %v106_v0 = vunpack.c.0.s8 %v38_v58 }
  0x35   :  { %2800 = vmatprep.subr.bf16.mxu1 %v4543_v1  ;;  %v119_v1 = vunpack.c.0.s8 %v42_v59  ;;  %v211_v8 = vcvt.s32.f32 %v107_v60  ;;  %v5443_v60 = vld [vmem:[%s7291_s0 + $0x22] sm:$0xff] }
  0x36   :  { %v224_v9 = vcvt.s32.f32 %v120_v61  ;;  %v4603_v61 = vld [vmem:[%s7290_s1 + $0x404] ss:$16 sps:$4 sm:$0xff]  }
  0x37   :  { %2728 = vmatpush2.bf16.msra.mxu0 %v4545_v2  ;;  %v109_v2 = vunpack.c.3.s8 %v38_v58 }
  0x38   :  { %2801 = vmatpush2.bf16.msra.mxu1 %v4546_v3  ;;  %2729 = vmatprep.subr.bf16.mxu0 %v4547_v4  ;;  %v122_v3 = vunpack.c.3.s8 %v42_v59  ;;  %v108_v4 = vunpack.c.2.s8 %v38_v58 }
  0x39   :  { %2802 = vmatprep.subr.bf16.mxu1 %v4549_v5  ;;  %v121_v5 = vunpack.c.2.s8 %v42_v59  ;;  %v213_v14 = vcvt.s32.f32 %v109_v2  ;;  %v5438_v59 = vld [vmem:[%s7291_s0 + $0x8] sm:$0xff]  ;;  %v72_v2 = vunpack.c.1.s8 %v5443_v60 }
  0x3a   :  { %v226_v15 = vcvt.s32.f32 %v122_v3  ;;  %v212_v16 = vcvt.s32.f32 %v108_v4  ;;  %v61_v3 = vunpack.c.3.s8 %v5438_v59  ;;  %v74_v4 = vunpack.c.3.s8 %v5443_v60 }
  0x3b   :  { %2730 = vmatpush2.bf16.msra.mxu0 %v4551_v10  ;;  %v210_v10 = vcvt.s32.f32 %v106_v0  ;;  %v225_v17 = vcvt.s32.f32 %v121_v5  ;;  %v4606_v0 = vld [vmem:[%s7290_s1 + $0x604] ss:$16 sps:$4 sm:$0xff]  }
  0x3c   :  { %2803 = vmatpush2.bf16.msra.mxu1 %v4552_v11  ;;  %2731 = vmatprep.subr.bf16.mxu0 %v4553_v12  ;;  %v223_v11 = vcvt.s32.f32 %v119_v1  ;;  %v4585_v12 = vld [vmem:[%s7290_s1 + $0x464] ss:$16 sps:$4 sm:$0xff]   ;;  %v59_v1 = vunpack.c.1.s8 %v5438_v59 }
  0x3d   :  { %2804 = vmatprep.subr.bf16.mxu1 %v4555_v13  ;;  %v4588_v13 = vld [vmem:[%s7290_s1 + $0x664] ss:$16 sps:$4 sm:$0xff]   ;;  %v5403_v33 = vpack.c.bf16 %v225_v17, %v212_v16  ;;  %v4607_v16 = vld [vmem:[%s7290_s1 + $0x5e0] ss:$16 sps:$4 sm:$0xff]  }
  0x3e   :  { %v4610_v17 = vld [vmem:[%s7290_s1 + $0x7e0] ss:$16 sps:$4 sm:$0xff]  }
  0x3f   :  { %2732 = vmatpush2.bf16.msra.mxu0 %v4557_v18  ;;  %v4583_v18 = vld [vmem:[%s7290_s1 + $0x460] ss:$16 sps:$4 sm:$0xff]  }
  0x40   :  { %2805 = vmatpush2.bf16.msra.mxu1 %v4558_v19  ;;  %2847 = vmatprep.subr.bf16.mxu0 %v4561_v20  ;;  %v5382_v19 = vpack.c.bf16 %v224_v9, %v211_v8  ;;  %v4586_v20 = vld [vmem:[%s7290_s1 + $0x660] ss:$16 sps:$4 sm:$0xff]   ;;  %v165_v8 = vcvt.s32.f32 %v61_v3  ;;  %v178_v9 = vcvt.s32.f32 %v74_v4 }
  0x41   :  { %2920 = vmatprep.subr.bf16.mxu1 %v4564_v21  ;;  %v5387_v21 = vpack.c.bf16 %v223_v11, %v210_v10  ;;  %v4601_v10 = vld [vmem:[%s7290_s1 + $0x400] ss:$16 sps:$4 sm:$0xff]  }
  0x42   :  { %2734 = vmatmul.mubr.bf16.vlgmr.msra.gmra.mxu0 %v5301_v22  ;;  %v4604_v11 = vld [vmem:[%s7290_s1 + $0x600] ss:$16 sps:$4 sm:$0xff]  }
  0x43   :  { %2807 = vmatmul.mubr.bf16.vlgmr.msra.gmra.mxu1 %v5303_v23  ;;  %2848 = vmatpush1.bf16.msra.mxu0 %v4559_v24  ;;  %v5389_v24 = vpack.c.bf16 %v226_v15, %v213_v14  ;;  %v5472_v15 = vpack.c.bf16 %v178_v9, %v165_v8 }
  0x44   :  { %2921 = vmatpush1.bf16.msra.mxu1 %v4562_v25  ;;  %2849 = vmatprep.subr.bf16.mxu0 %v4567_v26  ;;  %v46_v25 = vld [vmem:[%s7291_s0 + $0x9c] sm:$0xff] }
  0x45   :  { %2922 = vmatprep.subr.bf16.mxu1 %v4570_v27  ;;  %2743 = vmatprep.mubr.bf16.mxu0 %v5346_v53  ;;  %v50_v26 = vld [vmem:[%s7291_s0 + $0xb6] sm:$0xff]  ;;  %v132_v30 = vunpack.c.0.s8 %v46_v25  ;;  %v135_v34 = vunpack.c.3.s8 %v46_v25  ;;  %v134_v38 = vunpack.c.2.s8 %v46_v25 }
  0x46   :  { %2816 = vmatprep.mubr.bf16.mxu1 %v5353_v56  ;;  %v4591_v27 = vld [vmem:[%s7290_s1 + $0x444] ss:$16 sps:$4 sm:$0xff]   ;;  %v145_v31 = vunpack.c.0.s8 %v50_v26  ;;  %v148_v35 = vunpack.c.3.s8 %v50_v26  ;;  %v147_v39 = vunpack.c.2.s8 %v50_v26 }
  0x47   :  { %2850 = vmatpush1.bf16.msra.mxu0 %v4565_v28  ;;  %v133_v28 = vunpack.c.1.s8 %v46_v25  ;;  %v236_v42 = vcvt.s32.f32 %v132_v30  ;;  %v239_v44 = vcvt.s32.f32 %v135_v34  ;;  %v238_v50 = vcvt.s32.f32 %v134_v38  ;;  %v4613_v25 = vld [vmem:[%s7290_s1 + $0x5c0] ss:$16 sps:$4 sm:$0xff]  }
  0x48   :  { %2923 = vmatpush1.bf16.msra.mxu1 %v4568_v29  ;;  %2851 = vmatprep.subr.bf16.mxu0 %v4573_v32  ;;  %v146_v29 = vunpack.c.1.s8 %v50_v26  ;;  %v4594_v32 = vld [vmem:[%s7290_s1 + $0x644] ss:$16 sps:$4 sm:$0xff]   ;;  %v249_v43 = vcvt.s32.f32 %v145_v31  ;;  %v252_v45 = vcvt.s32.f32 %v148_v35  ;;  %v251_v51 = vcvt.s32.f32 %v147_v39  ;;  %v4616_v26 = vld [vmem:[%s7290_s1 + $0x7c0] ss:$16 sps:$4 sm:$0xff]  }
  0x49   :  { %2924 = vmatprep.subr.bf16.mxu1 %v4576_v37  ;;  %v237_v36 = vcvt.s32.f32 %v133_v28  ;;  %v4624_v28 = vld [vmem:[%s7290_s1 + $0x7a4] ss:$16 sps:$4 sm:$0xff]   ;;  %v4622_v30 = vld [vmem:[%s7290_s1 + $0x7a0] ss:$16 sps:$4 sm:$0xff]  }
  0x4a   :  { %2744 = vmatmul.mubr.bf16.gmra.mxu0 %v5348_v54  ;;  %v250_v37 = vcvt.s32.f32 %v146_v29  ;;  %v5422_v49 = vpack.c.bf16 %v252_v45, %v239_v44  ;;  %v5432_v58 = vpack.c.bf16 %v249_v43, %v236_v42  ;;  %v5455_v5 = vpack.c.bf16 %v251_v51, %v238_v50  ;;  %v4619_v29 = vld [vmem:[%s7290_s1 + $0x5a0] ss:$16 sps:$4 sm:$0xff]   ;;  %v4627_v31 = vld [vmem:[%s7290_s1 + $0x584] ss:$16 sps:$4 sm:$0xff]  }
  0x4b   :  { %2852 = vmatpush1.bf16.msra.mxu0 %v4571_v46  ;;  %2817 = vmatmul.mubr.bf16.gmra.mxu1 %v5355_v57  ;;  %v4597_v46 = vld [vmem:[%s7290_s1 + $0x424] ss:$16 sps:$4 sm:$0xff]   ;;  %v4625_v34 = vld [vmem:[%s7290_s1 + $0x580] ss:$16 sps:$4 sm:$0xff]   ;;  %v60_v50 = vunpack.c.2.s8 %v5438_v59  ;;  %v73_v51 = vunpack.c.2.s8 %v5443_v60 }
  0x4c   :  { %2925 = vmatpush1.bf16.msra.mxu1 %v4574_v47  ;;  %2853 = vmatprep.subr.bf16.mxu0 %v4579_v52  ;;  %v5417_v47 = vpack.c.bf16 %v250_v37, %v237_v36  ;;  %v4595_v52 = vld [vmem:[%s7290_s1 + $0x420] ss:$16 sps:$4 sm:$0xff]   ;;  %v4633_v36 = vld [vmem:[%s7290_s1 + $0x564] ss:$16 sps:$4 sm:$0xff]  }
  0x4d   :  { %2926 = vmatprep.subr.bf16.mxu1 %v4582_v55  ;;  %2753 = vmatprep.mubr.bf16.mxu0 %v5382_v19  ;;  %v4598_v55 = vld [vmem:[%s7290_s1 + $0x620] ss:$16 sps:$4 sm:$0xff]   ;;  %v4636_v37 = vld [vmem:[%s7290_s1 + $0x764] ss:$16 sps:$4 sm:$0xff]   ;;  %v164_v8 = vcvt.s32.f32 %v60_v50  ;;  %v177_v9 = vcvt.s32.f32 %v73_v51 }
  0x4e   :  { %2826 = vmatprep.mubr.bf16.mxu1 %v5389_v24  ;;  %v4628_v35 = vld [vmem:[%s7290_s1 + $0x780] ss:$16 sps:$4 sm:$0xff]   ;;  %v4645_v44 = vld [vmem:[%s7290_s1 + $0x524] ss:$16 sps:$4 sm:$0xff]  }
  0x4f   :  { %2854 = vmatpush1.bf16.msra.mxu0 %v4577_v6  ;;  %v163_v6 = vcvt.s32.f32 %v59_v1  ;;  %v4631_v38 = vld [vmem:[%s7290_s1 + $0x560] ss:$16 sps:$4 sm:$0xff]   ;;  %v4648_v45 = vld [vmem:[%s7290_s1 + $0x724] ss:$16 sps:$4 sm:$0xff]  }
  0x50   :  { %2927 = vmatpush1.bf16.msra.mxu1 %v4580_v7  ;;  %2855 = vmatprep.subr.bf16.mxu0 %v4585_v12  ;;  %v176_v7 = vcvt.s32.f32 %v72_v2  ;;  %v4609_v12 = vld [vmem:[%s7290_s1 + $0x5e4] ss:$16 sps:$4 sm:$0xff]   ;;  %v4634_v39 = vld [vmem:[%s7290_s1 + $0x760] ss:$16 sps:$4 sm:$0xff]  }
  0x51   :  { %2928 = vmatprep.subr.bf16.mxu1 %v4588_v13  ;;  %v4612_v13 = vld [vmem:[%s7290_s1 + $0x7e4] ss:$16 sps:$4 sm:$0xff]   ;;  %v4637_v42 = vld [vmem:[%s7290_s1 + $0x540] ss:$16 sps:$4 sm:$0xff]  }
  0x52   :  { %2754 = vmatmul.mubr.bf16.gmra.mxu0 %v5387_v21  ;;  %v5470_v14 = vpack.c.bf16 %v176_v7, %v163_v6  ;;  %v4640_v43 = vld [vmem:[%s7290_s1 + $0x740] ss:$16 sps:$4 sm:$0xff]  }
  0x53   :  { %2856 = vmatpush1.bf16.msra.mxu0 %v4583_v18  ;;  %2827 = vmatmul.mubr.bf16.gmra.mxu1 %v5403_v33  ;;  %v4615_v18 = vld [vmem:[%s7290_s1 + $0x5c4] ss:$16 sps:$4 sm:$0xff]   ;;  %v4664_v51 = vld [vmem:[%s7290_s1 + $0xac0] ss:$16 sps:$4 sm:$0xff]  }
  0x54   :  { %2929 = vmatpush1.bf16.msra.mxu1 %v4586_v20  ;;  %2857 = vmatprep.subr.bf16.mxu0 %v4591_v27  ;;  %v4618_v20 = vld [vmem:[%s7290_s1 + $0x7c4] ss:$16 sps:$4 sm:$0xff]  }
  0x55   :  { %2930 = vmatprep.subr.bf16.mxu1 %v4594_v32  ;;  %2763 = vmatprep.mubr.bf16.mxu0 %v5417_v47  ;;  %v4621_v27 = vld [vmem:[%s7290_s1 + $0x5a4] ss:$16 sps:$4 sm:$0xff]  }
  0x56   :  { %2836 = vmatprep.mubr.bf16.mxu1 %v5422_v49  ;;  %v4630_v32 = vld [vmem:[%s7290_s1 + $0x784] ss:$16 sps:$4 sm:$0xff]  }
  0x57   :  { %2858 = vmatpush1.bf16.msra.mxu0 %v4589_v40  ;;  %v4639_v40 = vld [vmem:[%s7290_s1 + $0x544] ss:$16 sps:$4 sm:$0xff]  }
  0x58   :  { %2931 = vmatpush1.bf16.msra.mxu1 %v4592_v41  ;;  %2859 = vmatprep.subr.bf16.mxu0 %v4597_v46  ;;  %v4642_v41 = vld [vmem:[%s7290_s1 + $0x744] ss:$16 sps:$4 sm:$0xff]   ;;  %v58_v46 = vunpack.c.0.s8 %v5438_v59 }
  0x59   :  { %2932 = vmatprep.subr.bf16.mxu1 %v4600_v48  ;;  %v71_v48 = vunpack.c.0.s8 %v5443_v60  ;;  %v4651_v59 = vld [vmem:[%s7290_s1 + $0x504] ss:$16 sps:$4 sm:$0xff]  }
  0x5a   :  { %2764 = vmatmul.mubr.bf16.gmra.mxu0 %v5432_v58  ;;  %v4654_v60 = vld [vmem:[%s7290_s1 + $0x704] ss:$16 sps:$4 sm:$0xff]   ;;  %v162_v6 = vcvt.s32.f32 %v58_v46 }
  0x5b   :  { %2860 = vmatpush1.bf16.msra.mxu0 %v4595_v52  ;;  %2837 = vmatmul.mubr.bf16.gmra.mxu1 %v5455_v5  ;;  %v31_v52 = vld [vmem:[%s7291_s0 + $0x3c] sm:$0xff]  ;;  %v175_v7 = vcvt.s32.f32 %v71_v48 }
  0x5c   :  { %2933 = vmatpush1.bf16.msra.mxu1 %v4598_v55  ;;  %2861 = vmatprep.subr.bf16.mxu0 %v4603_v61  ;;  %v35_v55 = vld [vmem:[%s7291_s0 + $0x56] sm:$0xff]  ;;  %v4643_v61 = vld [vmem:[%s7290_s1 + $0x520] ss:$16 sps:$4 sm:$0xff]   ;;  %v85_v1 = vunpack.c.1.s8 %v31_v52  ;;  %v87_v3 = vunpack.c.3.s8 %v31_v52 }
  0x5d   :  { %2934 = vmatprep.subr.bf16.mxu1 %v4606_v0  ;;  %2879 = vmatprep.mubr.bf16.mxu0 %v5470_v14  ;;  %v4646_v0 = vld [vmem:[%s7290_s1 + $0x720] ss:$16 sps:$4 sm:$0xff]   ;;  %v98_v2 = vunpack.c.1.s8 %v35_v55  ;;  %v100_v4 = vunpack.c.3.s8 %v35_v55 }
  0x5e   :  { %2952 = vmatprep.mubr.bf16.mxu1 %v5472_v15 }
  0x5f   :  { %2862 = vmatpush1.bf16.msra.mxu0 %v4601_v10  ;;  %v4649_v10 = vld [vmem:[%s7290_s1 + $0x500] ss:$16 sps:$4 sm:$0xff]  }
  0x60   :  { %2935 = vmatpush1.bf16.msra.mxu1 %v4604_v11  ;;  %2863 = vmatprep.subr.bf16.mxu0 %v4609_v12  ;;  %v4652_v11 = vld [vmem:[%s7290_s1 + $0x700] ss:$16 sps:$4 sm:$0xff]   ;;  %v4657_v12 = vld [vmem:[%s7290_s1 + $0x8e4] ss:$16 sps:$4 sm:$0xff]  }
  0x61   :  { %2936 = vmatprep.subr.bf16.mxu1 %v4612_v13  ;;  %v4660_v13 = vld [vmem:[%s7290_s1 + $0xae4] ss:$16 sps:$4 sm:$0xff]  }
  0x63   :  { %2864 = vmatpush2.bf16.msra.mxu0 %v4607_v16  ;;  %v189_v16 = vcvt.s32.f32 %v85_v1  ;;  %v5626_v1 = vld [vmem:[%s7291_s0 + $0xa4] sm:$0xff] }
  0x64   :  { %2937 = vmatpush2.bf16.msra.mxu1 %v4610_v17  ;;  %2865 = vmatprep.subr.bf16.mxu0 %v4615_v18  ;;  %v202_v17 = vcvt.s32.f32 %v98_v2  ;;  %v191_v18 = vcvt.s32.f32 %v87_v3 }
  0x65   :  { %2938 = vmatprep.subr.bf16.mxu1 %v4618_v20  ;;  %v204_v20 = vcvt.s32.f32 %v100_v4 }
  0x67   :  { %2866 = vmatpush2.bf16.msra.mxu0 %v4613_v25  ;;  %v5583_v25 = vpack.c.bf16 %v175_v7, %v162_v6  ;;  %v5633_v7 = vld [vmem:[%s7291_s0 + $0xbe] sm:$0xff] }
  0x68   :  { %2939 = vmatpush2.bf16.msra.mxu1 %v4616_v26  ;;  %2867 = vmatprep.subr.bf16.mxu0 %v4621_v27  ;;  %v5585_v26 = vpack.c.bf16 %v177_v9, %v164_v8  ;;  %v4655_v27 = vld [vmem:[%s7290_s1 + $0x8e0] ss:$16 sps:$4 sm:$0xff]  }
  0x69   :  { %2940 = vmatprep.subr.bf16.mxu1 %v4624_v28  ;;  %v4658_v28 = vld [vmem:[%s7290_s1 + $0xae0] ss:$16 sps:$4 sm:$0xff]  }
  0x6b   :  { %2868 = vmatpush2.bf16.msra.mxu0 %v4619_v29  ;;  %v84_v29 = vunpack.c.0.s8 %v31_v52 }
  0x6c   :  { %2941 = vmatpush2.bf16.msra.mxu1 %v4622_v30  ;;  %2869 = vmatprep.subr.bf16.mxu0 %v4627_v31  ;;  %v97_v30 = vunpack.c.0.s8 %v35_v55  ;;  %v86_v31 = vunpack.c.2.s8 %v31_v52 }
  0x6d   :  { %2942 = vmatprep.subr.bf16.mxu1 %v4630_v32  ;;  %v99_v32 = vunpack.c.2.s8 %v35_v55 }
  0x6e   :  { %v201_v46 = vcvt.s32.f32 %v97_v30  ;;  %v190_v48 = vcvt.s32.f32 %v86_v31 }
  0x6f   :  { %2870 = vmatpush2.bf16.msra.mxu0 %v4625_v34  ;;  %v39_v34 = vld [vmem:[%s7291_s0 + $0x70] sm:$0xff]  ;;  %v203_v50 = vcvt.s32.f32 %v99_v32 }
  0x70   :  { %2943 = vmatpush2.bf16.msra.mxu1 %v4628_v35  ;;  %2871 = vmatprep.subr.bf16.mxu0 %v4633_v36  ;;  %v43_v35 = vld [vmem:[%s7291_s0 + $0x8a] sm:$0xff]  ;;  %v4663_v36 = vld [vmem:[%s7290_s1 + $0x8c4] ss:$16 sps:$4 sm:$0xff]   ;;  %v110_v52 = vunpack.c.0.s8 %v39_v34 }
  0x71   :  { %2944 = vmatprep.subr.bf16.mxu1 %v4636_v37  ;;  %v4666_v37 = vld [vmem:[%s7290_s1 + $0xac4] ss:$16 sps:$4 sm:$0xff]   ;;  %v123_v55 = vunpack.c.0.s8 %v43_v35  ;;  %v5637_v9 = vpack.c.bf16 %v203_v50, %v190_v48  ;;  %v136_v48 = vunpack.c.0.s8 %v5626_v1  ;;  %v149_v50 = vunpack.c.0.s8 %v5633_v7 }
  0x73   :  { %2872 = vmatpush2.bf16.msra.mxu0 %v4631_v38  ;;  %v5605_v38 = vpack.c.bf16 %v202_v17, %v189_v16  ;;  %v4675_v16 = vld [vmem:[%s7290_s1 + $0x884] ss:$16 sps:$4 sm:$0xff]  }
  0x74   :  { %2945 = vmatpush2.bf16.msra.mxu1 %v4634_v39  ;;  %2873 = vmatprep.subr.bf16.mxu0 %v4639_v40  ;;  %v5607_v39 = vpack.c.bf16 %v204_v20, %v191_v18  ;;  %v111_v40 = vunpack.c.1.s8 %v39_v34  ;;  %v4678_v17 = vld [vmem:[%s7290_s1 + $0xa84] ss:$16 sps:$4 sm:$0xff]   ;;  %v137_v18 = vunpack.c.1.s8 %v5626_v1  ;;  %v150_v20 = vunpack.c.1.s8 %v5633_v7 }
  0x75   :  { %2946 = vmatprep.subr.bf16.mxu1 %v4642_v41  ;;  %v124_v41 = vunpack.c.1.s8 %v43_v35 }
  0x76   :  { %v215_v2 = vcvt.s32.f32 %v111_v40  ;;  %v241_v40 = vcvt.s32.f32 %v137_v18  ;;  %v4693_v18 = vld [vmem:[%s7290_s1 + $0x824] ss:$16 sps:$4 sm:$0xff]  }
  0x77   :  { %2874 = vmatpush2.bf16.msra.mxu0 %v4637_v42  ;;  %v113_v42 = vunpack.c.3.s8 %v39_v34  ;;  %v228_v3 = vcvt.s32.f32 %v124_v41  ;;  %v254_v41 = vcvt.s32.f32 %v150_v20  ;;  %v4696_v20 = vld [vmem:[%s7290_s1 + $0xa24] ss:$16 sps:$4 sm:$0xff]  }
  0x78   :  { %2947 = vmatpush2.bf16.msra.mxu1 %v4640_v43  ;;  %2875 = vmatprep.subr.bf16.mxu0 %v4645_v44  ;;  %v126_v43 = vunpack.c.3.s8 %v43_v35  ;;  %v4661_v44 = vld [vmem:[%s7290_s1 + $0x8c0] ss:$16 sps:$4 sm:$0xff]  }
  0x79   :  { %2948 = vmatprep.subr.bf16.mxu1 %v4648_v45  ;;  %v188_v45 = vcvt.s32.f32 %v84_v29  ;;  %v217_v4 = vcvt.s32.f32 %v113_v42  ;;  %v5655_v29 = vpack.c.bf16 %v228_v3, %v215_v2 }
  0x7a   :  { %v230_v6 = vcvt.s32.f32 %v126_v43 }
  0x7b   :  { %2876 = vmatpush2.bf16.msra.mxu0 %v4643_v61  ;;  %v4669_v61 = vld [vmem:[%s7290_s1 + $0x8a4] ss:$16 sps:$4 sm:$0xff]   ;;  %v5635_v8 = vpack.c.bf16 %v201_v46, %v188_v45 }
  0x7c   :  { %2949 = vmatpush2.bf16.msra.mxu1 %v4646_v0  ;;  %2877 = vmatprep.subr.bf16.mxu0 %v4651_v59  ;;  %v4672_v0 = vld [vmem:[%s7290_s1 + $0xaa4] ss:$16 sps:$4 sm:$0xff]   ;;  %v112_v59 = vunpack.c.2.s8 %v39_v34  ;;  %v5657_v30 = vpack.c.bf16 %v230_v6, %v217_v4  ;;  %v4673_v34 = vld [vmem:[%s7290_s1 + $0x880] ss:$16 sps:$4 sm:$0xff]  }
  0x7d   :  { %2950 = vmatprep.subr.bf16.mxu1 %v4654_v60  ;;  %v125_v60 = vunpack.c.2.s8 %v43_v35  ;;  %v4676_v35 = vld [vmem:[%s7290_s1 + $0xa80] ss:$16 sps:$4 sm:$0xff]  }
  0x7e   :  { %v216_v31 = vcvt.s32.f32 %v112_v59  ;;  %v5682_v46 = vld [vmem:[%s7291_s0 + $0x10] sm:$0xff] }
  0x7f   :  { %2878 = vmatpush2.bf16.msra.mxu0 %v4649_v10  ;;  %v4667_v10 = vld [vmem:[%s7290_s1 + $0x8a0] ss:$16 sps:$4 sm:$0xff]   ;;  %v229_v32 = vcvt.s32.f32 %v125_v60  ;;  %v4687_v59 = vld [vmem:[%s7290_s1 + $0x844] ss:$16 sps:$4 sm:$0xff]   ;;  %v63_v3 = vunpack.c.1.s8 %v5682_v46  ;;  %v65_v6 = vunpack.c.3.s8 %v5682_v46 }
  0x80   :  { %2951 = vmatpush2.bf16.msra.mxu1 %v4652_v11  ;;  %2993 = vmatprep.subr.bf16.mxu0 %v4657_v12  ;;  %v4670_v11 = vld [vmem:[%s7290_s1 + $0xaa0] ss:$16 sps:$4 sm:$0xff]   ;;  %v214_v12 = vcvt.s32.f32 %v110_v52  ;;  %v151_v52 = vunpack.c.2.s8 %v5633_v7  ;;  %v4690_v60 = vld [vmem:[%s7290_s1 + $0xa44] ss:$16 sps:$4 sm:$0xff]  }
  0x81   :  { %3066 = vmatprep.subr.bf16.mxu1 %v4660_v13  ;;  %v227_v13 = vcvt.s32.f32 %v123_v55  ;;  %v5677_v45 = vpack.c.bf16 %v229_v32, %v216_v31  ;;  %v5691_v55 = vld [vmem:[%s7291_s0 + $0x2a] sm:$0xff]  ;;  %v169_v31 = vcvt.s32.f32 %v65_v6  ;;  %v4717_v6 = vld [vmem:[%s7290_s1 + $0x9a4] ss:$16 sps:$4 sm:$0xff]  }
  0x82   :  { %2880 = vmatmul.mubr.bf16.vlgmr.msra.gmra.mxu0 %v5583_v25  ;;  %v76_v4 = vunpack.c.1.s8 %v5691_v55 }
  0x83   :  { %2953 = vmatmul.mubr.bf16.vlgmr.msra.gmra.mxu1 %v5585_v26  ;;  %2994 = vmatpush1.bf16.msra.mxu0 %v4655_v27  ;;  %v139_v27 = vunpack.c.3.s8 %v5626_v1 }
  0x84   :  { %3067 = vmatpush1.bf16.msra.mxu1 %v4658_v28  ;;  %2995 = vmatprep.subr.bf16.mxu0 %v4663_v36  ;;  %v152_v28 = vunpack.c.3.s8 %v5633_v7  ;;  %v4681_v36 = vld [vmem:[%s7290_s1 + $0x864] ss:$16 sps:$4 sm:$0xff]   ;;  %v78_v7 = vunpack.c.3.s8 %v5691_v55 }
  0x85   :  { %3068 = vmatprep.subr.bf16.mxu1 %v4666_v37  ;;  %2889 = vmatprep.mubr.bf16.mxu0 %v5605_v38  ;;  %v4684_v37 = vld [vmem:[%s7290_s1 + $0xa64] ss:$16 sps:$4 sm:$0xff]   ;;  %v243_v42 = vcvt.s32.f32 %v139_v27  ;;  %v167_v27 = vcvt.s32.f32 %v63_v3  ;;  %v4709_v3 = vld [vmem:[%s7290_s1 + $0x9c0] ss:$16 sps:$4 sm:$0xff]  }
  0x86   :  { %2962 = vmatprep.mubr.bf16.mxu1 %v5607_v39  ;;  %v256_v43 = vcvt.s32.f32 %v152_v28  ;;  %v180_v28 = vcvt.s32.f32 %v76_v4  ;;  %v182_v32 = vcvt.s32.f32 %v78_v7  ;;  %v4712_v4 = vld [vmem:[%s7290_s1 + $0xbc0] ss:$16 sps:$4 sm:$0xff]   ;;  %v4720_v7 = vld [vmem:[%s7290_s1 + $0xba4] ss:$16 sps:$4 sm:$0xff]  }
  0x87   :  { %2996 = vmatpush1.bf16.msra.mxu0 %v4661_v44  ;;  %v5674_v44 = vpack.c.bf16 %v227_v13, %v214_v12  ;;  %v240_v12 = vcvt.s32.f32 %v136_v48  ;;  %v253_v13 = vcvt.s32.f32 %v149_v50  ;;  %v4697_v48 = vld [vmem:[%s7290_s1 + $0x800] ss:$16 sps:$4 sm:$0xff]  }
  0x88   :  { %3069 = vmatpush1.bf16.msra.mxu1 %v4664_v51  ;;  %2997 = vmatprep.subr.bf16.mxu0 %v4669_v61  ;;  %v138_v51 = vunpack.c.2.s8 %v5626_v1  ;;  %v4679_v61 = vld [vmem:[%s7290_s1 + $0x860] ss:$16 sps:$4 sm:$0xff]   ;;  %v5705_v1 = vpack.c.bf16 %v254_v41, %v241_v40  ;;  %v5707_v2 = vpack.c.bf16 %v256_v43, %v243_v42  ;;  %v4699_v40 = vld [vmem:[%s7290_s1 + $0x804] ss:$16 sps:$4 sm:$0xff]   ;;  %v5745_v42 = vpack.c.bf16 %v180_v28, %v167_v27 }
  0x89   :  { %3070 = vmatprep.subr.bf16.mxu1 %v4672_v0  ;;  %v4682_v0 = vld [vmem:[%s7290_s1 + $0xa60] ss:$16 sps:$4 sm:$0xff]   ;;  %v4702_v41 = vld [vmem:[%s7290_s1 + $0xa04] ss:$16 sps:$4 sm:$0xff]   ;;  %v5747_v43 = vpack.c.bf16 %v182_v32, %v169_v31 }
  0x8a   :  { %2890 = vmatmul.mubr.bf16.gmra.mxu0 %v5635_v8  ;;  %v4700_v50 = vld [vmem:[%s7290_s1 + $0xa00] ss:$16 sps:$4 sm:$0xff]   ;;  %v4735_v31 = vld [vmem:[%s7290_s1 + $0x944] ss:$16 sps:$4 sm:$0xff]  }
  0x8b   :  { %2963 = vmatmul.mubr.bf16.gmra.mxu1 %v5637_v9  ;;  %2998 = vmatpush1.bf16.msra.mxu0 %v4667_v10  ;;  %v4685_v10 = vld [vmem:[%s7290_s1 + $0x840] ss:$16 sps:$4 sm:$0xff]   ;;  %v4738_v32 = vld [vmem:[%s7290_s1 + $0xb44] ss:$16 sps:$4 sm:$0xff]  }
  0x8c   :  { %3071 = vmatpush1.bf16.msra.mxu1 %v4670_v11  ;;  %2999 = vmatprep.subr.bf16.mxu0 %v4675_v16  ;;  %v4688_v11 = vld [vmem:[%s7290_s1 + $0xa40] ss:$16 sps:$4 sm:$0xff]   ;;  %v242_v16 = vcvt.s32.f32 %v138_v51  ;;  %v4705_v51 = vld [vmem:[%s7290_s1 + $0x9e4] ss:$16 sps:$4 sm:$0xff]  }
  0x8d   :  { %3072 = vmatprep.subr.bf16.mxu1 %v4678_v17  ;;  %2899 = vmatprep.mubr.bf16.mxu0 %v5655_v29  ;;  %v255_v17 = vcvt.s32.f32 %v151_v52  ;;  %v4708_v52 = vld [vmem:[%s7290_s1 + $0xbe4] ss:$16 sps:$4 sm:$0xff]   ;;  %v4727_v27 = vld [vmem:[%s7290_s1 + $0x960] ss:$16 sps:$4 sm:$0xff]  }
  0x8e   :  { %2972 = vmatprep.mubr.bf16.mxu1 %v5657_v30  ;;  %v4730_v28 = vld [vmem:[%s7290_s1 + $0xb60] ss:$16 sps:$4 sm:$0xff]  }
  0x8f   :  { %3000 = vmatpush1.bf16.msra.mxu0 %v4673_v34  ;;  %v5729_v34 = vpack.c.bf16 %v253_v13, %v240_v12  ;;  %v4723_v12 = vld [vmem:[%s7290_s1 + $0x984] ss:$16 sps:$4 sm:$0xff]  }
  0x90   :  { %3073 = vmatpush1.bf16.msra.mxu1 %v4676_v35  ;;  %3001 = vmatprep.subr.bf16.mxu0 %v4681_v36  ;;  %v4691_v35 = vld [vmem:[%s7290_s1 + $0x820] ss:$16 sps:$4 sm:$0xff]   ;;  %v5734_v36 = vpack.c.bf16 %v255_v17, %v242_v16  ;;  %v4726_v13 = vld [vmem:[%s7290_s1 + $0xb84] ss:$16 sps:$4 sm:$0xff]  }
  0x91   :  { %3074 = vmatprep.subr.bf16.mxu1 %v4684_v37  ;;  %v4694_v37 = vld [vmem:[%s7290_s1 + $0xa20] ss:$16 sps:$4 sm:$0xff]  }
  0x92   :  { %2900 = vmatmul.mubr.bf16.gmra.mxu0 %v5674_v44  ;;  %v4721_v16 = vld [vmem:[%s7290_s1 + $0x980] ss:$16 sps:$4 sm:$0xff]  }
  0x93   :  { %2973 = vmatmul.mubr.bf16.gmra.mxu1 %v5677_v45  ;;  %3002 = vmatpush1.bf16.msra.mxu0 %v4679_v61  ;;  %v4703_v61 = vld [vmem:[%s7290_s1 + $0x9e0] ss:$16 sps:$4 sm:$0xff]  }
  0x94   :  { %3075 = vmatpush1.bf16.msra.mxu1 %v4682_v0  ;;  %3003 = vmatprep.subr.bf16.mxu0 %v4687_v59  ;;  %v4706_v0 = vld [vmem:[%s7290_s1 + $0xbe0] ss:$16 sps:$4 sm:$0xff]   ;;  %v4711_v59 = vld [vmem:[%s7290_s1 + $0x9c4] ss:$16 sps:$4 sm:$0xff]  }
  0x95   :  { %3076 = vmatprep.subr.bf16.mxu1 %v4690_v60  ;;  %2909 = vmatprep.mubr.bf16.mxu0 %v5705_v1  ;;  %v4714_v60 = vld [vmem:[%s7290_s1 + $0xbc4] ss:$16 sps:$4 sm:$0xff]   ;;  %v4724_v17 = vld [vmem:[%s7290_s1 + $0xb80] ss:$16 sps:$4 sm:$0xff]  }
  0x96   :  { %2982 = vmatprep.mubr.bf16.mxu1 %v5707_v2 }
  0x97   :  { %3004 = vmatpush1.bf16.msra.mxu0 %v4685_v10  ;;  %v4715_v10 = vld [vmem:[%s7290_s1 + $0x9a0] ss:$16 sps:$4 sm:$0xff]  }
  0x98   :  { %3077 = vmatpush1.bf16.msra.mxu1 %v4688_v11  ;;  %3005 = vmatprep.subr.bf16.mxu0 %v4693_v18  ;;  %v4718_v11 = vld [vmem:[%s7290_s1 + $0xba0] ss:$16 sps:$4 sm:$0xff]   ;;  %v4729_v18 = vld [vmem:[%s7290_s1 + $0x964] ss:$16 sps:$4 sm:$0xff]  }
  0x99   :  { %3078 = vmatprep.subr.bf16.mxu1 %v4696_v20  ;;  %v4732_v20 = vld [vmem:[%s7290_s1 + $0xb64] ss:$16 sps:$4 sm:$0xff]  }
  0x9a   :  { %2910 = vmatmul.mubr.bf16.gmra.mxu0 %v5729_v34 }
  0x9b   :  { %2983 = vmatmul.mubr.bf16.gmra.mxu1 %v5734_v36  ;;  %3006 = vmatpush1.bf16.msra.mxu0 %v4691_v35  ;;  %v4733_v35 = vld [vmem:[%s7290_s1 + $0x940] ss:$16 sps:$4 sm:$0xff]  }
  0x9c   :  { %3079 = vmatpush1.bf16.msra.mxu1 %v4694_v37  ;;  %3007 = vmatprep.subr.bf16.mxu0 %v4699_v40  ;;  %v4736_v37 = vld [vmem:[%s7290_s1 + $0xb40] ss:$16 sps:$4 sm:$0xff]   ;;  %v4741_v40 = vld [vmem:[%s7290_s1 + $0x924] ss:$16 sps:$4 sm:$0xff]  }
  0x9d   :  { %3080 = vmatprep.subr.bf16.mxu1 %v4702_v41  ;;  %3025 = vmatprep.mubr.bf16.mxu0 %v5745_v42  ;;  %v4744_v41 = vld [vmem:[%s7290_s1 + $0xb24] ss:$16 sps:$4 sm:$0xff]  }
  0x9e   :  { %3098 = vmatprep.mubr.bf16.mxu1 %v5747_v43 }
  0x9f   :  { %3008 = vmatpush1.bf16.msra.mxu0 %v4697_v48  ;;  %v62_v48 = vunpack.c.0.s8 %v5682_v46 }
  0xa0   :  { %3081 = vmatpush1.bf16.msra.mxu1 %v4700_v50  ;;  %3009 = vmatprep.subr.bf16.mxu0 %v4705_v51  ;;  %v75_v50 = vunpack.c.0.s8 %v5691_v55  ;;  %v64_v51 = vunpack.c.2.s8 %v5682_v46  ;;  %v4742_v46 = vld [vmem:[%s7290_s1 + $0xb20] ss:$16 sps:$4 sm:$0xff]  }
  0xa1   :  { %3082 = vmatprep.subr.bf16.mxu1 %v4708_v52  ;;  %v77_v52 = vunpack.c.2.s8 %v5691_v55  ;;  %v4747_v55 = vld [vmem:[%s7290_s1 + $0x904] ss:$16 sps:$4 sm:$0xff]  }
  0xa3   :  { %3010 = vmatpush2.bf16.msra.mxu0 %v4703_v61  ;;  %v32_v61 = vld [vmem:[%s7291_s0 + $0x44] sm:$0xff] }
  0xa4   :  { %3083 = vmatpush2.bf16.msra.mxu1 %v4706_v0  ;;  %3011 = vmatprep.subr.bf16.mxu0 %v4711_v59  ;;  %v36_v0 = vld [vmem:[%s7291_s0 + $0x5e] sm:$0xff] }
  0xa5   :  { %3084 = vmatprep.subr.bf16.mxu1 %v4714_v60  ;;  %v4739_v59 = vld [vmem:[%s7290_s1 + $0x920] ss:$16 sps:$4 sm:$0xff]   ;;  %v4750_v60 = vld [vmem:[%s7290_s1 + $0xb04] ss:$16 sps:$4 sm:$0xff]  }
  0xa7   :  { %3012 = vmatpush2.bf16.msra.mxu0 %v4709_v3  ;;  %v166_v3 = vcvt.s32.f32 %v62_v48  ;;  %v4751_v48 = vld [vmem:[%s7290_s1 + $0xc20] ss:$16 sps:$4 sm:$0xff]  }
  0xa8   :  { %3085 = vmatpush2.bf16.msra.mxu1 %v4712_v4  ;;  %3013 = vmatprep.subr.bf16.mxu0 %v4717_v6  ;;  %v179_v4 = vcvt.s32.f32 %v75_v50  ;;  %v89_v6 = vunpack.c.1.s8 %v32_v61  ;;  %v88_v50 = vunpack.c.0.s8 %v32_v61 }
  0xa9   :  { %3086 = vmatprep.subr.bf16.mxu1 %v4720_v7  ;;  %v102_v7 = vunpack.c.1.s8 %v36_v0 }
  0xab   :  { %3014 = vmatpush2.bf16.msra.mxu0 %v4715_v10  ;;  %v4745_v10 = vld [vmem:[%s7290_s1 + $0x900] ss:$16 sps:$4 sm:$0xff]  }
  0xac   :  { %3087 = vmatpush2.bf16.msra.mxu1 %v4718_v11  ;;  %3015 = vmatprep.subr.bf16.mxu0 %v4723_v12  ;;  %v4748_v11 = vld [vmem:[%s7290_s1 + $0xb00] ss:$16 sps:$4 sm:$0xff]   ;;  %v168_v12 = vcvt.s32.f32 %v64_v51  ;;  %v101_v51 = vunpack.c.0.s8 %v36_v0 }
  0xad   :  { %3088 = vmatprep.subr.bf16.mxu1 %v4726_v13  ;;  %v181_v13 = vcvt.s32.f32 %v77_v52  ;;  %v90_v52 = vunpack.c.2.s8 %v32_v61 }
  0xaf   :  { %3016 = vmatpush2.bf16.msra.mxu0 %v4721_v16  ;;  %v91_v16 = vunpack.c.3.s8 %v32_v61 }
  0xb0   :  { %3089 = vmatpush2.bf16.msra.mxu1 %v4724_v17  ;;  %3017 = vmatprep.subr.bf16.mxu0 %v4729_v18  ;;  %v104_v17 = vunpack.c.3.s8 %v36_v0  ;;  %v4753_v18 = vld [vmem:[%s7290_s1 + $0xc24] ss:$16 sps:$4 sm:$0xff]  }
  0xb1   :  { %3090 = vmatprep.subr.bf16.mxu1 %v4732_v20  ;;  %v4756_v20 = vld [vmem:[%s7290_s1 + $0xec] ss:$16 sps:$4 sm:$0xff]  }
  0xb3   :  { %3018 = vmatpush2.bf16.msra.mxu0 %v4727_v27  ;;  %v193_v27 = vcvt.s32.f32 %v89_v6  ;;  %v4757_v6 = vld [vmem:[%s7290_s1 + $0xc8] ss:$16 sps:$4 sm:$0xff]  }
  0xb4   :  { %3091 = vmatpush2.bf16.msra.mxu1 %v4730_v28  ;;  %3019 = vmatprep.subr.bf16.mxu0 %v4735_v31  ;;  %v206_v28 = vcvt.s32.f32 %v102_v7  ;;  %v5874_v31 = vld [vmem:[%s7291_s0 + $0x78] sm:$0xff] }
  0xb5   :  { %3092 = vmatprep.subr.bf16.mxu1 %v4738_v32  ;;  %v5879_v32 = vld [vmem:[%s7291_s0 + $0x92] sm:$0xff]  ;;  %v117_v61 = vunpack.c.3.s8 %v5874_v31 }
  0xb7   :  { %3020 = vmatpush2.bf16.msra.mxu0 %v4733_v35  ;;  %v5881_v35 = vpack.c.bf16 %v179_v4, %v166_v3  ;;  %v4759_v3 = vld [vmem:[%s7290_s1 + $0xcc] ss:$16 sps:$4 sm:$0xff]   ;;  %v5896_v4 = vpack.c.bf16 %v206_v28, %v193_v27 }
  0xb8   :  { %3093 = vmatpush2.bf16.msra.mxu1 %v4736_v37  ;;  %3021 = vmatprep.subr.bf16.mxu0 %v4741_v40  ;;  %v5883_v37 = vpack.c.bf16 %v181_v13, %v168_v12  ;;  %v195_v40 = vcvt.s32.f32 %v91_v16  ;;  %v205_v12 = vcvt.s32.f32 %v101_v51  ;;  %v4762_v13 = vld [vmem:[%s7290_s1 + $0xac] ss:$16 sps:$4 sm:$0xff]   ;;  %v194_v16 = vcvt.s32.f32 %v90_v52 }
  0xb9   :  { %3094 = vmatprep.subr.bf16.mxu1 %v4744_v41  ;;  %v208_v41 = vcvt.s32.f32 %v104_v17  ;;  %v48_v28 = vld [vmem:[%s7291_s0 + $0xac] sm:$0xff]  ;;  %v114_v51 = vunpack.c.0.s8 %v5874_v31  ;;  %v127_v52 = vunpack.c.0.s8 %v5879_v32 }
  0xba   :  { %7325 = vst [vmem:[#allocation4_spill] sm:$0xff] %v5883_v37 }
  0xbb   :  { %3022 = vmatpush2.bf16.msra.mxu0 %v4739_v59  ;;  %v103_v59 = vunpack.c.2.s8 %v36_v0  ;;  %v130_v0 = vunpack.c.3.s8 %v5879_v32  ;;  %v5903_v7 = vpack.c.bf16 %v208_v41, %v195_v40  ;;  %v221_v40 = vcvt.s32.f32 %v117_v61 }
  0xbc   :  { %3095 = vmatpush2.bf16.msra.mxu1 %v4742_v46  ;;  %3023 = vmatprep.subr.bf16.mxu0 %v4747_v55  ;;  %v4754_v46 = vld [vmem:[%s7290_s1 + $0xe8] ss:$16 sps:$4 sm:$0xff]   ;;  %v115_v55 = vunpack.c.1.s8 %v5874_v31 }
  0xbd   :  { %3096 = vmatprep.subr.bf16.mxu1 %v4750_v60  ;;  %v128_v60 = vunpack.c.1.s8 %v5879_v32  ;;  %7326 = vst [vmem:[#allocation5_spill] sm:$0xff] %v5903_v7  ;;  %v207_v17 = vcvt.s32.f32 %v103_v59  ;;  %v234_v41 = vcvt.s32.f32 %v130_v0  ;;  %v141_v0 = vunpack.c.1.s8 %v48_v28 }
  0xbf   :  { %3024 = vmatpush2.bf16.msra.mxu0 %v4745_v10  ;;  %v4768_v10 = vld [vmem:[%s7290_s1 + $0xc04] ss:$16 sps:$4 sm:$0xff]   ;;  %v232_v27 = vcvt.s32.f32 %v128_v60  ;;  %v129_v60 = vunpack.c.2.s8 %v5879_v32  ;;  %v218_v32 = vcvt.s32.f32 %v114_v51  ;;  %v140_v51 = vunpack.c.0.s8 %v48_v28 }
  0xc0   :  { %3097 = vmatpush2.bf16.msra.mxu1 %v4748_v11  ;;  %3151 = vmatprep.subr.bf16.mxu0 %v4753_v18  ;;  %v192_v11 = vcvt.s32.f32 %v88_v50  ;;  %v4766_v18 = vld [vmem:[%s7290_s1 + $0xc00] ss:$16 sps:$4 sm:$0xff]   ;;  %v52_v50 = vld [vmem:[%s7291_s0 + $0xc6] sm:$0xff] }
  0xc1   :  { %3212 = vmatprep.subr.bf16.mxu1 %v4756_v20  ;;  %v219_v20 = vcvt.s32.f32 %v115_v55  ;;  %v116_v55 = vunpack.c.2.s8 %v5874_v31  ;;  %v143_v31 = vunpack.c.3.s8 %v48_v28 }
  0xc2   :  { %3026 = vmatmul.mubr.bf16.vlgmr.msra.gmra.mxu0 %v5881_v35  ;;  %v5929_v59 = vpack.c.bf16 %v205_v12, %v192_v11  ;;  %v5943_v11 = vpack.c.bf16 %v234_v41, %v221_v40  ;;  %v156_v12 = vunpack.c.3.s8 %v52_v50 }
  0xc3   :  { %3099 = vmatmul.mubr.bf16.vlgmr.msra.gmra.mxu1 %v5883_v37  ;;  %3152 = vmatpush1.bf16.msra.mxu0 %v4751_v48  ;;  %v4783_v48 = vld [vmem:[%s7290_s1 + $0x2ec] ss:$16 sps:$4 sm:$0xff]   ;;  %v5938_v61 = vpack.c.bf16 %v232_v27, %v219_v20  ;;  %v247_v40 = vcvt.s32.f32 %v143_v31 }
  0xc4   :  { %3213 = vmatpush1.bf16.msra.mxu1 %v4754_v46  ;;  %3035 = vmatprep.mubr.bf16.mxu0 %v5896_v4  ;;  %v5931_v46 = vpack.c.bf16 %v207_v17, %v194_v16  ;;  %7328 = vst [vmem:[#allocation7_spill] sm:$0xff] %v5943_v11  ;;  %v220_v16 = vcvt.s32.f32 %v116_v55  ;;  %v233_v17 = vcvt.s32.f32 %v129_v60  ;;  %v4771_v27 = vld [vmem:[%s7290_s1 + $0x6c] ss:$16 sps:$4 sm:$0xff]   ;;  %v260_v41 = vcvt.s32.f32 %v156_v12 }
  0xc5   :  { %3214 = vmatprep.subr.bf16.mxu1 %v4759_v3  ;;  %3108 = vmatprep.mubr.bf16.mxu1 %v5903_v7  ;;  %v4760_v3 = vld [vmem:[%s7290_s1 + $0xa8] ss:$16 sps:$4 sm:$0xff]   ;;  %v154_v7 = vunpack.c.1.s8 %v52_v50  ;;  %v153_v55 = vunpack.c.0.s8 %v52_v50  ;;  %v142_v60 = vunpack.c.2.s8 %v48_v28  ;;  %v4951_v37 = vld [vmem:[%s7290_s1 + $0x76c] ss:$16 sps:$4 sm:$0xff]  }
  0xc6   :  { %3153 = vmatprep.subr.bf16.mxu0 %v4768_v10  ;;  %7327 = vst [vmem:[#allocation6_spill] sm:$0xff] %v5931_v46  ;;  %v4765_v10 = vld [vmem:[%s7290_s1 + $0x8c] ss:$16 sps:$4 sm:$0xff]   ;;  %v5967_v31 = vpack.c.bf16 %v260_v41, %v247_v40  ;;  %v4772_v28 = vld [vmem:[%s7290_s1 + $0x48] ss:$16 sps:$4 sm:$0xff]   ;;  %v7301_v41 = vmov 0  }
  0xc7   :  { %3154 = vmatpush1.bf16.msra.mxu0 %v4766_v18  ;;  %v245_v18 = vcvt.s32.f32 %v141_v0  ;;  %v258_v20 = vcvt.s32.f32 %v154_v7  ;;  %v4769_v7 = vld [vmem:[%s7290_s1 + $0x68] ss:$16 sps:$4 sm:$0xff]   ;;  %v257_v12 = vcvt.s32.f32 %v153_v55  ;;  %v4786_v55 = vld [vmem:[%s7290_s1 + $0x1ec] ss:$16 sps:$4 sm:$0xff]  }
  0xc8   :  { %3215 = vmatpush1.bf16.msra.mxu1 %v4757_v6  ;;  %3285 = vmatprep.subr.bf16.mxu0 %v4783_v48  ;;  %v231_v6 = vcvt.s32.f32 %v127_v52  ;;  %v5957_v52 = vpack.c.bf16 %v233_v17, %v220_v16  ;;  %7330 = vst [vmem:[#allocation9_spill] sm:$0xff] %v5967_v31  ;;  %v5978_v16 = vld [vmem:[%s7291_s0 + $0x18] ss:$26 sps:$2 sm:$0xf]   ;;  %v4777_v17 = vld [vmem:[%s7290_s1 + $0x2c] ss:$16 sps:$4 sm:$0xff]  }
  0xc9   :  { %3216 = vmatprep.subr.bf16.mxu1 %v4762_v13  ;;  %v4763_v13 = vld [vmem:[%s7290_s1 + $0x88] ss:$16 sps:$4 sm:$0xff]   ;;  %v5962_v0 = vpack.c.bf16 %v258_v20, %v245_v18  ;;  %7331 = vst [vmem:[#allocation10_spill] sm:$0xff] %v5978_v16 }
  0xca   :  { %3036 = vmatmul.mubr.bf16.gmra.mxu0 %v5929_v59  ;;  %v5955_v48 = vpack.c.bf16 %v231_v6, %v218_v32  ;;  %7329 = vst [vmem:[#allocation8_spill] sm:$0xff] %v5957_v52  ;;  %v246_v32 = vcvt.s32.f32 %v142_v60  ;;  %v4775_v20 = vld [vmem:[%s7290_s1 + $0x28] ss:$16 sps:$4 sm:$0xff]  }
  0xcb   :  { %3109 = vmatmul.mubr.bf16.gmra.mxu1 %v5931_v46  ;;  %3045 = vmatprep.mubr.bf16.mxu0 %v5938_v61  ;;  %v4778_v40 = vld [vmem:[%s7290_s1 + $0x8] ss:$16 sps:$4 sm:$0xff]  }
  0xcc   :  { %3217 = vmatpush1.bf16.msra.mxu1 %v4760_v3  ;;  %3118 = vmatprep.mubr.bf16.mxu1 %v5943_v11  ;;  %v155_v3 = vunpack.c.2.s8 %v52_v50  ;;  %v244_v50 = vcvt.s32.f32 %v140_v51  ;;  %v6003_v51 = vld [vmem:[%s7291_s0 + $0x4c] ss:$26 sps:$2 sm:$0xf]   ;;  %v4781_v60 = vld [vmem:[%s7290_s1 + $0x2e8] ss:$16 sps:$4 sm:$0xff]  }
  0xcd   :  { %3218 = vmatprep.subr.bf16.mxu1 %v4765_v10  ;;  %v4774_v10 = vld [vmem:[%s7290_s1 + $0x4c] ss:$16 sps:$4 sm:$0xff]   ;;  %7333 = vst [vmem:[#allocation12_spill] sm:$0xff] %v6003_v51 }
  0xce   :  { %v259_v6 = vcvt.s32.f32 %v155_v3  ;;  %v7300_v3 = vunpack.c.l.s8.bf16 %v5978_v16  ;;  %v4927_v11 = vld [vmem:[%s7290_s1 + $0x7ec] ss:$16 sps:$4 sm:$0xff]   ;;  %v4943_v16 = vld [vmem:[%s7290_s1 + $0x788] ss:$16 sps:$4 sm:$0xff]  }
  0xd0   :  { %3219 = vmatpush1.bf16.msra.mxu1 %v4763_v13  ;;  %v5984_v13 = vpack.c.bf16 %v257_v12, %v244_v50  ;;  %v5986_v18 = vpack.c.bf16 %v259_v6, %v246_v32  ;;  %v4790_v50 = vld [vmem:[%s7290_s1 + $0x1c8] ss:$16 sps:$4 sm:$0xff]   ;;  %v4795_v32 = vld [vmem:[%s7290_s1 + $0x2ac] ss:$16 sps:$4 sm:$0xff]  }
  0xd1   :  { %3220 = vmatprep.subr.bf16.mxu1 %v4771_v27  ;;  %v4780_v27 = vld [vmem:[%s7290_s1 + $0xc] ss:$16 sps:$4 sm:$0xff]   ;;  %v6034_v12 = vld [vmem:[%s7291_s0 + $0x80] ss:$26 sps:$2 sm:$0xf]  }
  0xd2   :  { %3046 = vmatmul.mubr.bf16.gmra.mxu0 %v5955_v48  ;;  %7332 = vst [vmem:[#allocation11_spill] sm:$0xff] %v5986_v18  ;;  %7334 = vst [vmem:[#allocation13_spill] sm:$0xff] %v6034_v12  ;;  %v4798_v6 = vld [vmem:[%s7290_s1 + $0x1ac] ss:$16 sps:$4 sm:$0xff]  }
  0xd3   :  { %3119 = vmatmul.mubr.bf16.gmra.mxu1 %v5957_v52  ;;  %3055 = vmatprep.mubr.bf16.mxu0 %v5962_v0  ;;  %v4919_v52 = vld [vmem:[%s7290_s1 + $0x608] ss:$16 sps:$4 sm:$0xff]  }
  0xd4   :  { %3221 = vmatpush1.bf16.msra.mxu1 %v4769_v7  ;;  %3128 = vmatprep.mubr.bf16.mxu1 %v5967_v31  ;;  %v4784_v7 = vld [vmem:[%s7290_s1 + $0x1e8] ss:$16 sps:$4 sm:$0xff]  }
  0xd5   :  { %3222 = vmatprep.subr.bf16.mxu1 %v4774_v10  ;;  %v4789_v10 = vld [vmem:[%s7290_s1 + $0x2cc] ss:$16 sps:$4 sm:$0xff]  }
  0xd8   :  { %3223 = vmatpush1.bf16.msra.mxu1 %v4772_v28  ;;  %v4787_v28 = vld [vmem:[%s7290_s1 + $0x2c8] ss:$16 sps:$4 sm:$0xff]  }
  0xd9   :  { %3224 = vmatprep.subr.bf16.mxu1 %v4777_v17  ;;  %v4793_v17 = vld [vmem:[%s7290_s1 + $0x2a8] ss:$16 sps:$4 sm:$0xff]  }
  0xda   :  { %3056 = vmatmul.mubr.bf16.gmra.mxu0 %v5984_v13 }
  0xdb   :  { %3129 = vmatmul.mubr.bf16.gmra.mxu1 %v5986_v18  ;;  %3171 = vmatprep.mubr.bf16.mxu0 %v7301_v41 }
  0xdc   :  { %3225 = vmatpush1.bf16.msra.mxu1 %v4775_v20  ;;  %3244 = vmatprep.mubr.bf16.mxu1 %v5253_v62  ;;  %v4792_v62 = vld [vmem:[%s7290_s1 + $0x1cc] ss:$16 sps:$4 sm:$0xff]   ;;  %v7299_v20 = vunpack.c.l.s8.bf16 %v6003_v51  ;;  %v4931_v51 = vld [vmem:[%s7290_s1 + $0x7c8] ss:$16 sps:$4 sm:$0xff]  }
  0xdd   :  { %3226 = vmatprep.subr.bf16.mxu1 %v4780_v27  ;;  %v4796_v27 = vld [vmem:[%s7290_s1 + $0x1a8] ss:$16 sps:$4 sm:$0xff]  }
  0xe0   :  { %3227 = vmatpush1.bf16.msra.mxu1 %v4778_v40  ;;  %v4801_v40 = vld [vmem:[%s7290_s1 + $0x28c] ss:$16 sps:$4 sm:$0xff]  }
  0xe1   :  { %3228 = vmatprep.subr.bf16.mxu1 %v4786_v55  ;;  %v4804_v55 = vld [vmem:[%s7290_s1 + $0x18c] ss:$16 sps:$4 sm:$0xff]  }
  0xe2   :  { %4452 = vmatmul.mubr.msk.bf16.vlgmr.msra.gmra.mxu0 %vm2688_vm0, %v7300_v3  ;;  %v4891_v3 = vld [vmem:[%s7290_s1 + $0x6ac] ss:$16 sps:$4 sm:$0xff]  }
  0xe3   :  { %3286 = vmatpush1.bf16.msra.mxu0 %v4781_v60  ;;  %3181 = vmatprep.mubr.bf16.mxu0 %v7301_v41  ;;  %v4799_v60 = vld [vmem:[%s7290_s1 + $0x288] ss:$16 sps:$4 sm:$0xff]  }
  0xe4   :  { %3229 = vmatpush2.bf16.msra.mxu1 %v4784_v7  ;;  %3287 = vmatprep.subr.bf16.mxu0 %v4789_v10  ;;  %v4802_v7 = vld [vmem:[%s7290_s1 + $0x188] ss:$16 sps:$4 sm:$0xff]   ;;  %v6068_v10 = vld [vmem:[%s7291_s0 + $0xb4] ss:$26 sps:$2 sm:$0xf]  }
  0xe5   :  { %3230 = vmatprep.subr.bf16.mxu1 %v4792_v62  ;;  %7335 = vst [vmem:[#allocation14_spill] sm:$0xff] %v6068_v10  ;;  %v4807_v62 = vld [vmem:[%s7290_s1 + $0x26c] ss:$16 sps:$4 sm:$0xff]  }
  0xe7   :  { %3288 = vmatpush1.bf16.msra.mxu0 %v4787_v28  ;;  %v4810_v28 = vld [vmem:[%s7290_s1 + $0x16c] ss:$16 sps:$4 sm:$0xff]  }
  0xe8   :  { %3231 = vmatpush2.bf16.msra.mxu1 %v4790_v50  ;;  %3289 = vmatprep.subr.bf16.mxu0 %v4795_v32  ;;  %v4805_v50 = vld [vmem:[%s7290_s1 + $0x268] ss:$16 sps:$4 sm:$0xff]   ;;  %v7298_v32 = vunpack.c.l.s8.bf16 %v6034_v12 }
  0xe9   :  { %3232 = vmatprep.subr.bf16.mxu1 %v4798_v6  ;;  %v4808_v6 = vld [vmem:[%s7290_s1 + $0x168] ss:$16 sps:$4 sm:$0xff]  }
  0xea   :  { %4453 = vmatmul.mubr.msk.bf16.gmra.mxu0 %vm2688_vm0, %v7299_v20  ;;  %v4885_v20 = vld [vmem:[%s7290_s1 + $0x6cc] ss:$16 sps:$4 sm:$0xff]   ;;  %v4913_v12 = vld [vmem:[%s7290_s1 + $0x628] ss:$16 sps:$4 sm:$0xff]  }
  0xeb   :  { %3290 = vmatpush1.bf16.msra.mxu0 %v4793_v17  ;;  %3191 = vmatprep.mubr.bf16.mxu0 %v7301_v41  ;;  %v4813_v17 = vld [vmem:[%s7290_s1 + $0x24c] ss:$16 sps:$4 sm:$0xff]  }
  0xec   :  { %3233 = vmatpush2.bf16.msra.mxu1 %v4796_v27  ;;  %3291 = vmatprep.subr.bf16.mxu0 %v4801_v40  ;;  %v4816_v27 = vld [vmem:[%s7290_s1 + $0x14c] ss:$16 sps:$4 sm:$0xff]   ;;  %v4811_v40 = vld [vmem:[%s7290_s1 + $0x248] ss:$16 sps:$4 sm:$0xff]  }
  0xed   :  { %3234 = vmatprep.subr.bf16.mxu1 %v4804_v55  ;;  %v4814_v55 = vld [vmem:[%s7290_s1 + $0x148] ss:$16 sps:$4 sm:$0xff]  }
  0xef   :  { %3292 = vmatpush1.bf16.msra.mxu0 %v4799_v60  ;;  %v4819_v60 = vld [vmem:[%s7290_s1 + $0x22c] ss:$16 sps:$4 sm:$0xff]  }
  0xf0   :  { %3235 = vmatpush2.bf16.msra.mxu1 %v4802_v7  ;;  %3293 = vmatprep.subr.bf16.mxu0 %v4807_v62  ;;  %v4822_v7 = vld [vmem:[%s7290_s1 + $0x12c] ss:$16 sps:$4 sm:$0xff]   ;;  %v4817_v62 = vld [vmem:[%s7290_s1 + $0x228] ss:$16 sps:$4 sm:$0xff]  }
  0xf1   :  { %3236 = vmatprep.subr.bf16.mxu1 %v4810_v28  ;;  %v7297_v28 = vunpack.c.l.s8.bf16 %v6068_v10 }
  0xf2   :  { %4454 = vmatmul.mubr.msk.bf16.gmra.mxu0 %vm2688_vm0, %v7298_v32  ;;  %v4879_v32 = vld [vmem:[%s7290_s1 + $0x6ec] ss:$16 sps:$4 sm:$0xff]  }
  0xf3   :  { %3294 = vmatpush1.bf16.msra.mxu0 %v4805_v50  ;;  %3201 = vmatprep.mubr.bf16.mxu0 %v7301_v41  ;;  %v4820_v50 = vld [vmem:[%s7290_s1 + $0x128] ss:$16 sps:$4 sm:$0xff]   ;;  %v4897_v41 = vld [vmem:[%s7290_s1 + $0x68c] ss:$16 sps:$4 sm:$0xff]  }
  0xf4   :  { %3237 = vmatpush2.bf16.msra.mxu1 %v4808_v6  ;;  %3295 = vmatprep.subr.bf16.mxu0 %v4813_v17  ;;  %v4825_v6 = vld [vmem:[%s7290_s1 + $0x20c] ss:$16 sps:$4 sm:$0xff]  }
  0xf5   :  { %3238 = vmatprep.subr.bf16.mxu1 %v4816_v27  ;;  %v4828_v17 = vld [vmem:[%s7290_s1 + $0x10c] ss:$16 sps:$4 sm:$0xff]   ;;  %v4823_v27 = vld [vmem:[%s7290_s1 + $0x208] ss:$16 sps:$4 sm:$0xff]  }
  0xf7   :  { %3296 = vmatpush1.bf16.msra.mxu0 %v4811_v40  ;;  %v4826_v40 = vld [vmem:[%s7290_s1 + $0x108] ss:$16 sps:$4 sm:$0xff]  }
  0xf8   :  { %3239 = vmatpush2.bf16.msra.mxu1 %v4814_v55  ;;  %3297 = vmatprep.subr.bf16.mxu0 %v4819_v60  ;;  %v4831_v55 = vld [vmem:[%s7290_s1 + $0x3ec] ss:$16 sps:$4 sm:$0xff]  }
  0xf9   :  { %3240 = vmatprep.subr.bf16.mxu1 %v4822_v7  ;;  %v4834_v60 = vld [vmem:[%s7290_s1 + $0x4ec] ss:$16 sps:$4 sm:$0xff]   ;;  %v4829_v7 = vld [vmem:[%s7290_s1 + $0x3e8] ss:$16 sps:$4 sm:$0xff]  }
  0xfa   :  { %4455 = vmatmul.mubr.msk.bf16.gmra.mxu0 %vm2688_vm0, %v7297_v28  ;;  %v4876_v28 = vld [vmem:[%s7290_s1 + $0x40c] ss:$16 sps:$4 sm:$0xff]  }
  0xfb   :  { %3298 = vmatpush1.bf16.msra.mxu0 %v4817_v62  ;;  %3317 = vmatprep.mubr.bf16.mxu0 %v5255_v63  ;;  %v4832_v62 = vld [vmem:[%s7290_s1 + $0x4e8] ss:$16 sps:$4 sm:$0xff]   ;;  %v4840_v63 = vld [vmem:[%s7290_s1 + $0x4cc] ss:$16 sps:$4 sm:$0xff]  }
  0xfc   :  { %3241 = vmatpush2.bf16.msra.mxu1 %v4820_v50  ;;  %3299 = vmatprep.subr.bf16.mxu0 %v4825_v6  ;;  %v4837_v50 = vld [vmem:[%s7290_s1 + $0x3cc] ss:$16 sps:$4 sm:$0xff]   ;;  %v4835_v6 = vld [vmem:[%s7290_s1 + $0x3c8] ss:$16 sps:$4 sm:$0xff]  }
  0xfd   :  { %3242 = vmatprep.subr.bf16.mxu1 %v4828_v17  ;;  %v4838_v17 = vld [vmem:[%s7290_s1 + $0x4c8] ss:$16 sps:$4 sm:$0xff]  }
  0xff   :  { %3300 = vmatpush1.bf16.msra.mxu0 %v4823_v27  ;;  %v4843_v27 = vld [vmem:[%s7290_s1 + $0x3ac] ss:$16 sps:$4 sm:$0xff]  }
 0x100   :  { %3243 = vmatpush2.bf16.msra.mxu1 %v4826_v40  ;;  %3301 = vmatprep.subr.bf16.mxu0 %v4831_v55  ;;  %v4846_v40 = vld [vmem:[%s7290_s1 + $0x4ac] ss:$16 sps:$4 sm:$0xff]   ;;  %v4841_v55 = vld [vmem:[%s7290_s1 + $0x3a8] ss:$16 sps:$4 sm:$0xff]  }
 0x101   :  { %3358 = vmatprep.subr.bf16.mxu1 %v4834_v60  ;;  %v4849_v60 = vld [vmem:[%s7290_s1 + $0x38c] ss:$16 sps:$4 sm:$0xff]  }
 0x103   :  { %3245 = vmatmul.mubr.bf16.vlgmr.msra.gmra.mxu1 %v5301_v22  ;;  %3302 = vmatpush2.bf16.msra.mxu0 %v4829_v7  ;;  %v4844_v22 = vld [vmem:[%s7290_s1 + $0x4a8] ss:$16 sps:$4 sm:$0xff]   ;;  %v6170_v7 = vpop.f32.mrf.mxu0 }
 0x104   :  { %3359 = vmatpush1.bf16.msra.mxu1 %v4832_v62  ;;  %3303 = vmatprep.subr.bf16.mxu0 %v4837_v50  ;;  %v4852_v62 = vld [vmem:[%s7290_s1 + $0x48c] ss:$16 sps:$4 sm:$0xff]   ;;  %v6175_v50 = vpop.f32.mrf.mxu1 }
 0x105   :  { %3360 = vmatprep.subr.bf16.mxu1 %v4840_v63  ;;  %3254 = vmatprep.mubr.bf16.mxu1 %v5346_v53  ;;  %v4847_v53 = vld [vmem:[%s7290_s1 + $0x388] ss:$16 sps:$4 sm:$0xff]  }
 0x106   :  { %v4850_v63 = vld [vmem:[%s7290_s1 + $0x488] ss:$16 sps:$4 sm:$0xff]  }
 0x107   :  { %3304 = vmatpush2.bf16.msra.mxu0 %v4835_v6  ;;  %v6184_v6 = vpop.f32.mrf.mxu0 }
 0x108   :  { %3361 = vmatpush1.bf16.msra.mxu1 %v4838_v17  ;;  %3305 = vmatprep.subr.bf16.mxu0 %v4843_v27  ;;  %v4855_v17 = vld [vmem:[%s7290_s1 + $0x36c] ss:$16 sps:$4 sm:$0xff]   ;;  %v6193_v27 = vpop.f32.mrf.mxu1 }
 0x109   :  { %3362 = vmatprep.subr.bf16.mxu1 %v4846_v40  ;;  %v4853_v40 = vld [vmem:[%s7290_s1 + $0x368] ss:$16 sps:$4 sm:$0xff]  }
 0x10b   :  { %3255 = vmatmul.mubr.bf16.gmra.mxu1 %v5348_v54  ;;  %3306 = vmatpush2.bf16.msra.mxu0 %v4841_v55  ;;  %v4858_v54 = vld [vmem:[%s7290_s1 + $0x46c] ss:$16 sps:$4 sm:$0xff]   ;;  %v4856_v55 = vld [vmem:[%s7290_s1 + $0x468] ss:$16 sps:$4 sm:$0xff]  }
 0x10c   :  { %3363 = vmatpush1.bf16.msra.mxu1 %v4844_v22  ;;  %3307 = vmatprep.subr.bf16.mxu0 %v4849_v60  ;;  %v6201_v22 = vpop.f32.mrf.mxu0  ;;  %v4864_v60 = vld [vmem:[%s7290_s1 + $0x44c] ss:$16 sps:$4 sm:$0xff]  }
 0x10d   :  { %3364 = vmatprep.subr.bf16.mxu1 %v4852_v62  ;;  %3264 = vmatprep.mubr.bf16.mxu1 %v5382_v19  ;;  %v4861_v19 = vld [vmem:[%s7290_s1 + $0x34c] ss:$16 sps:$4 sm:$0xff]   ;;  %v6209_v62 = vpop.f32.mrf.mxu1 }
 0x10f   :  { %3308 = vmatpush2.bf16.msra.mxu0 %v4847_v53  ;;  %v4859_v53 = vld [vmem:[%s7290_s1 + $0x348] ss:$16 sps:$4 sm:$0xff]  }
 0x110   :  { %3365 = vmatpush1.bf16.msra.mxu1 %v4850_v63  ;;  %3309 = vmatprep.subr.bf16.mxu0 %v4855_v17  ;;  %v4862_v63 = vld [vmem:[%s7290_s1 + $0x448] ss:$16 sps:$4 sm:$0xff]   ;;  %v6218_v17 = vpop.f32.mrf.mxu0 }
 0x111   :  { %3366 = vmatprep.subr.bf16.mxu1 %v4858_v54  ;;  %v4867_v54 = vld [vmem:[%s7290_s1 + $0x32c] ss:$16 sps:$4 sm:$0xff]  }
 0x113   :  { %3265 = vmatmul.mubr.bf16.gmra.mxu1 %v5387_v21  ;;  %3310 = vmatpush2.bf16.msra.mxu0 %v4853_v40  ;;  %v4870_v21 = vld [vmem:[%s7290_s1 + $0x42c] ss:$16 sps:$4 sm:$0xff]   ;;  %v6227_v40 = vpop.f32.mrf.mxu1 }
 0x114   :  { %3367 = vmatpush1.bf16.msra.mxu1 %v4856_v55  ;;  %3311 = vmatprep.subr.bf16.mxu0 %v4861_v19  ;;  %v6229_v55 = vpop.f32.mrf.mxu0  ;;  %v4865_v19 = vld [vmem:[%s7290_s1 + $0x328] ss:$16 sps:$4 sm:$0xff]  }
 0x115   :  { %3368 = vmatprep.subr.bf16.mxu1 %v4864_v60  ;;  %3274 = vmatprep.mubr.bf16.mxu1 %v5417_v47  ;;  %v4868_v60 = vld [vmem:[%s7290_s1 + $0x428] ss:$16 sps:$4 sm:$0xff]   ;;  %v4873_v47 = vld [vmem:[%s7290_s1 + $0x30c] ss:$16 sps:$4 sm:$0xff]  }
 0x117   :  { %3312 = vmatpush2.bf16.msra.mxu0 %v4859_v53  ;;  %v6243_v53 = vpop.f32.mrf.mxu1 }
 0x118   :  { %3369 = vmatpush1.bf16.msra.mxu1 %v4862_v63  ;;  %3313 = vmatprep.subr.bf16.mxu0 %v4867_v54  ;;  %v6245_v63 = vpop.f32.mrf.mxu0  ;;  %v4871_v54 = vld [vmem:[%s7290_s1 + $0x308] ss:$16 sps:$4 sm:$0xff]  }
 0x119   :  { %3370 = vmatprep.subr.bf16.mxu1 %v4870_v21  ;;  %v4874_v21 = vld [vmem:[%s7290_s1 + $0x408] ss:$16 sps:$4 sm:$0xff]  }
 0x11b   :  { %3275 = vmatmul.mubr.bf16.gmra.mxu1 %v5432_v58  ;;  %3314 = vmatpush2.bf16.msra.mxu0 %v4865_v19  ;;  %v4882_v58 = vld [vmem:[%s7290_s1 + $0x5ec] ss:$16 sps:$4 sm:$0xff]   ;;  %v6260_v19 = vpop.f32.mrf.mxu1 }
 0x11c   :  { %3371 = vmatpush1.bf16.msra.mxu1 %v4868_v60  ;;  %3315 = vmatprep.subr.bf16.mxu0 %v4873_v47  ;;  %v6263_v60 = vpop.f32.mrf.mxu0  ;;  %v4880_v47 = vld [vmem:[%s7290_s1 + $0x5e8] ss:$16 sps:$4 sm:$0xff]  }
 0x11d   :  { %3372 = vmatprep.subr.bf16.mxu1 %v4876_v28  ;;  %3390 = vmatprep.mubr.bf16.mxu1 %v5470_v14  ;;  %v4877_v28 = vld [vmem:[%s7290_s1 + $0x6e8] ss:$16 sps:$4 sm:$0xff]   ;;  %v4888_v14 = vld [vmem:[%s7290_s1 + $0x5cc] ss:$16 sps:$4 sm:$0xff]  }
 0x11f   :  { %3316 = vmatpush2.bf16.msra.mxu0 %v4871_v54  ;;  %v6277_v54 = vpop.f32.mrf.mxu1 }
 0x120   :  { %3373 = vmatpush1.bf16.msra.mxu1 %v4874_v21  ;;  %3431 = vmatprep.subr.bf16.mxu0 %v4879_v32  ;;  %v6280_v21 = vpop.f32.mrf.mxu0  ;;  %v4883_v32 = vld [vmem:[%s7290_s1 + $0x6c8] ss:$16 sps:$4 sm:$0xff]  }
 0x121   :  { %3374 = vmatprep.subr.bf16.mxu1 %v4882_v58  ;;  %v4886_v58 = vld [vmem:[%s7290_s1 + $0x5c8] ss:$16 sps:$4 sm:$0xff]  }
 0x122   :  { %3318 = vmatmul.mubr.bf16.vlgmr.msra.gmra.mxu0 %v5303_v23  ;;  %v4894_v23 = vld [vmem:[%s7290_s1 + $0x5ac] ss:$16 sps:$4 sm:$0xff]  }
 0x123   :  { %3432 = vmatpush1.bf16.msra.mxu0 %v4877_v28  ;;  %v6294_v28 = vpop.f32.mrf.mxu1  ;;  %3327 = vmatprep.mubr.bf16.mxu0 %v5353_v56  ;;  %v4900_v56 = vld [vmem:[%s7290_s1 + $0x58c] ss:$16 sps:$4 sm:$0xff]  }
 0x124   :  { %3375 = vmatpush2.bf16.msra.mxu1 %v4880_v47  ;;  %3433 = vmatprep.subr.bf16.mxu0 %v4885_v20  ;;  %v6297_v47 = vpop.f32.mrf.mxu0  ;;  %v4889_v20 = vld [vmem:[%s7290_s1 + $0x6a8] ss:$16 sps:$4 sm:$0xff]  }
 0x125   :  { %3376 = vmatprep.subr.bf16.mxu1 %v4888_v14  ;;  %v4892_v14 = vld [vmem:[%s7290_s1 + $0x5a8] ss:$16 sps:$4 sm:$0xff]   ;;  %v6308_v10 = vpop.f32.mrf.mxu1 }
 0x127   :  { %3434 = vmatpush1.bf16.msra.mxu0 %v4883_v32  ;;  %v6314_v32 = vpop.f32.mrf.mxu0 }
 0x128   :  { %3377 = vmatpush2.bf16.msra.mxu1 %v4886_v58  ;;  %3435 = vmatprep.subr.bf16.mxu0 %v4891_v3  ;;  %v4895_v3 = vld [vmem:[%s7290_s1 + $0x688] ss:$16 sps:$4 sm:$0xff]  }
 0x129   :  { %3378 = vmatprep.subr.bf16.mxu1 %v4894_v23  ;;  %v4898_v58 = vld [vmem:[%s7290_s1 + $0x588] ss:$16 sps:$4 sm:$0xff]   ;;  %v6322_v23 = vpop.f32.mrf.mxu1 }
 0x12a   :  { %3328 = vmatmul.mubr.bf16.gmra.mxu0 %v5355_v57  ;;  %v4903_v57 = vld [vmem:[%s7290_s1 + $0x66c] ss:$16 sps:$4 sm:$0xff]  }
 0x12b   :  { %3436 = vmatpush1.bf16.msra.mxu0 %v4889_v20  ;;  %v4906_v20 = vld [vmem:[%s7290_s1 + $0x56c] ss:$16 sps:$4 sm:$0xff]   ;;  %3337 = vmatprep.mubr.bf16.mxu0 %v5389_v24  ;;  %v6339_v18 = vpop.f32.mrf.mxu1 }
 0x12c   :  { %3379 = vmatpush2.bf16.msra.mxu1 %v4892_v14  ;;  %3437 = vmatprep.subr.bf16.mxu0 %v4897_v41  ;;  %v6331_v14 = vpop.f32.mrf.mxu0  ;;  %v4901_v41 = vld [vmem:[%s7290_s1 + $0x668] ss:$16 sps:$4 sm:$0xff]   ;;  %v4909_v24 = vld [vmem:[%s7290_s1 + $0x64c] ss:$16 sps:$4 sm:$0xff]  }
 0x12d   :  { %3380 = vmatprep.subr.bf16.mxu1 %v4900_v56  ;;  %v4904_v56 = vld [vmem:[%s7290_s1 + $0x568] ss:$16 sps:$4 sm:$0xff]   ;;  %v6356_v31 = vpop.f32.mrf.mxu1 }
 0x12f   :  { %3438 = vmatpush1.bf16.msra.mxu0 %v4895_v3  ;;  %v4912_v3 = vld [vmem:[%s7290_s1 + $0x54c] ss:$16 sps:$4 sm:$0xff]  }
 0x130   :  { %3381 = vmatpush2.bf16.msra.mxu1 %v4898_v58  ;;  %3439 = vmatprep.subr.bf16.mxu0 %v4903_v57  ;;  %v6348_v58 = vpop.f32.mrf.mxu0  ;;  %v4907_v57 = vld [vmem:[%s7290_s1 + $0x648] ss:$16 sps:$4 sm:$0xff]  }
 0x131   :  { %3382 = vmatprep.subr.bf16.mxu1 %v4906_v20  ;;  %v4910_v20 = vld [vmem:[%s7290_s1 + $0x548] ss:$16 sps:$4 sm:$0xff]  }
 0x132   :  { %3338 = vmatmul.mubr.bf16.gmra.mxu0 %v5403_v33  ;;  %v4915_v33 = vld [vmem:[%s7290_s1 + $0x62c] ss:$16 sps:$4 sm:$0xff]  }
 0x133   :  { %3440 = vmatpush1.bf16.msra.mxu0 %v4901_v41  ;;  %v4918_v41 = vld [vmem:[%s7290_s1 + $0x52c] ss:$16 sps:$4 sm:$0xff]   ;;  %3347 = vmatprep.mubr.bf16.mxu0 %v5422_v49 }
 0x134   :  { %3383 = vmatpush2.bf16.msra.mxu1 %v4904_v56  ;;  %3441 = vmatprep.subr.bf16.mxu0 %v4909_v24  ;;  %v6365_v56 = vpop.f32.mrf.mxu0  ;;  %v4916_v24 = vld [vmem:[%s7290_s1 + $0x528] ss:$16 sps:$4 sm:$0xff]   ;;  %v4921_v49 = vld [vmem:[%s7290_s1 + $0x60c] ss:$16 sps:$4 sm:$0xff]  }
 0x135   :  { %3384 = vmatprep.subr.bf16.mxu1 %v4912_v3  ;;  %v6373_v3 = vpop.f32.mrf.mxu1 }
 0x137   :  { %3442 = vmatpush1.bf16.msra.mxu0 %v4907_v57  ;;  %v4924_v57 = vld [vmem:[%s7290_s1 + $0x50c] ss:$16 sps:$4 sm:$0xff]  }
 0x138   :  { %3385 = vmatpush2.bf16.msra.mxu1 %v4910_v20  ;;  %3443 = vmatprep.subr.bf16.mxu0 %v4915_v33  ;;  %v6381_v20 = vpop.f32.mrf.mxu0  ;;  %v4922_v33 = vld [vmem:[%s7290_s1 + $0x508] ss:$16 sps:$4 sm:$0xff]  }
 0x139   :  { %3386 = vmatprep.subr.bf16.mxu1 %v4918_v41  ;;  %v6390_v41 = vpop.f32.mrf.mxu1 }
 0x13a   :  { %3348 = vmatmul.mubr.bf16.gmra.mxu0 %v5455_v5  ;;  %v4930_v5 = vld [vmem:[%s7290_s1 + $0x8ec] ss:$16 sps:$4 sm:$0xff]  }
 0x13b   :  { %3444 = vmatpush1.bf16.msra.mxu0 %v4913_v12  ;;  %3463 = vmatprep.mubr.bf16.mxu0 %v5472_v15  ;;  %v6399_v12 = vpop.f32.mrf.mxu0  ;;  %v4933_v15 = vld [vmem:[%s7290_s1 + $0x7cc] ss:$16 sps:$4 sm:$0xff]  }
 0x13c   :  { %3387 = vmatpush2.bf16.msra.mxu1 %v4916_v24  ;;  %3445 = vmatprep.subr.bf16.mxu0 %v4921_v49  ;;  %v4925_v24 = vld [vmem:[%s7290_s1 + $0x7e8] ss:$16 sps:$4 sm:$0xff]  }
 0x13d   :  { %3388 = vmatprep.subr.bf16.mxu1 %v4924_v57  ;;  %v4928_v49 = vld [vmem:[%s7290_s1 + $0x8e8] ss:$16 sps:$4 sm:$0xff]   ;;  %v6407_v57 = vpop.f32.mrf.mxu1 }
 0x13e   :  { %7336 = vst [vmem:[#allocation15_spill] sm:$0xff] %v6407_v57  ;;  %v4955_v57 = vld [vmem:[%s7290_s1 + $0x748] ss:$16 sps:$4 sm:$0xff]  }
 0x13f   :  { %3446 = vmatpush1.bf16.msra.mxu0 %v4919_v52  ;;  %v4936_v52 = vld [vmem:[%s7290_s1 + $0x8cc] ss:$16 sps:$4 sm:$0xff]  }
 0x140   :  { %3389 = vmatpush2.bf16.msra.mxu1 %v4922_v33  ;;  %3447 = vmatprep.subr.bf16.mxu0 %v4927_v11  ;;  %v6415_v33 = vpop.f32.mrf.mxu0  ;;  %v4934_v11 = vld [vmem:[%s7290_s1 + $0x8c8] ss:$16 sps:$4 sm:$0xff]  }
 0x141   :  { %3504 = vmatprep.subr.bf16.mxu1 %v4930_v5  ;;  %v6424_v5 = vpop.f32.mrf.mxu1 }
 0x142   :  { %7337 = vst [vmem:[#allocation16_spill] sm:$0xff] %v6424_v5  ;;  %v6426_v46 = vpop.f32.mrf.mxu0  ;;  %v4937_v5 = vld [vmem:[%s7290_s1 + $0x7a8] ss:$16 sps:$4 sm:$0xff]  }
 0x143   :  { %3391 = vmatmul.mubr.bf16.vlgmr.msra.gmra.mxu1 %v5583_v25  ;;  %3448 = vmatpush2.bf16.msra.mxu0 %v4925_v24  ;;  %v4939_v25 = vld [vmem:[%s7290_s1 + $0x7ac] ss:$16 sps:$4 sm:$0xff]  }
 0x144   :  { %3505 = vmatpush1.bf16.msra.mxu1 %v4928_v49  ;;  %3449 = vmatprep.subr.bf16.mxu0 %v4933_v15  ;;  %v4942_v24 = vld [vmem:[%s7290_s1 + $0x8ac] ss:$16 sps:$4 sm:$0xff]   ;;  %v6435_v49 = vpop.f32.mrf.mxu1  ;;  %v4940_v15 = vld [vmem:[%s7290_s1 + $0x8a8] ss:$16 sps:$4 sm:$0xff]  }
 0x145   :  { %3506 = vmatprep.subr.bf16.mxu1 %v4936_v52  ;;  %3400 = vmatprep.mubr.bf16.mxu1 %v5605_v38  ;;  %v6443_v52 = vpop.f32.mrf.mxu0  ;;  %v4945_v38 = vld [vmem:[%s7290_s1 + $0x78c] ss:$16 sps:$4 sm:$0xff]  }
 0x147   :  { %3450 = vmatpush2.bf16.msra.mxu0 %v4931_v51  ;;  %v4948_v51 = vld [vmem:[%s7290_s1 + $0x88c] ss:$16 sps:$4 sm:$0xff]  }
 0x148   :  { %3507 = vmatpush1.bf16.msra.mxu1 %v4934_v11  ;;  %3451 = vmatprep.subr.bf16.mxu0 %v4939_v25  ;;  %v6451_v11 = vpop.f32.mrf.mxu1  ;;  %v4946_v25 = vld [vmem:[%s7290_s1 + $0x888] ss:$16 sps:$4 sm:$0xff]  }
 0x149   :  { %3508 = vmatprep.subr.bf16.mxu1 %v4942_v24  ;;  %v6460_v24 = vpop.f32.mrf.mxu0 }
 0x14b   :  { %3401 = vmatmul.mubr.bf16.gmra.mxu1 %v5635_v8  ;;  %3452 = vmatpush2.bf16.msra.mxu0 %v4937_v5  ;;  %v4954_v8 = vld [vmem:[%s7290_s1 + $0x86c] ss:$16 sps:$4 sm:$0xff]   ;;  %v6469_v5 = vpop.f32.mrf.mxu1 }
 0x14c   :  { %3509 = vmatpush1.bf16.msra.mxu1 %v4940_v15  ;;  %3453 = vmatprep.subr.bf16.mxu0 %v4945_v38  ;;  %7338 = vst [vmem:[#allocation17_spill] sm:$0xff] %v6469_v5  ;;  %v4949_v15 = vld [vmem:[%s7290_s1 + $0x768] ss:$16 sps:$4 sm:$0xff]  }
 0x14d   :  { %3510 = vmatprep.subr.bf16.mxu1 %v4948_v51  ;;  %3410 = vmatprep.mubr.bf16.mxu1 %v5655_v29  ;;  %v4952_v38 = vld [vmem:[%s7290_s1 + $0x868] ss:$16 sps:$4 sm:$0xff]   ;;  %v6477_v51 = vpop.f32.mrf.mxu0  ;;  %v4957_v29 = vld [vmem:[%s7290_s1 + $0x74c] ss:$16 sps:$4 sm:$0xff]  }
 0x14f   :  { %3454 = vmatpush2.bf16.msra.mxu0 %v4943_v16  ;;  %v4960_v16 = vld [vmem:[%s7290_s1 + $0x84c] ss:$16 sps:$4 sm:$0xff]  }
 0x150   :  { %3511 = vmatpush1.bf16.msra.mxu1 %v4946_v25  ;;  %3455 = vmatprep.subr.bf16.mxu0 %v4951_v37  ;;  %v6485_v25 = vpop.f32.mrf.mxu1  ;;  %v4958_v37 = vld [vmem:[%s7290_s1 + $0x848] ss:$16 sps:$4 sm:$0xff]  }
 0x151   :  { %3512 = vmatprep.subr.bf16.mxu1 %v4954_v8  ;;  %v6494_v8 = vpop.f32.mrf.mxu0 }
 0x152   :  { %v6496_v5 = vpop.f32.mrf.mxu1 }
 0x153   :  { %3411 = vmatmul.mubr.bf16.gmra.mxu1 %v5674_v44  ;;  %3456 = vmatpush2.bf16.msra.mxu0 %v4949_v15  ;;  %7339 = vst [vmem:[#allocation18_spill] sm:$0xff] %v6496_v5  ;;  %v4963_v44 = vld [vmem:[%s7290_s1 + $0x72c] ss:$16 sps:$4 sm:$0xff]  }
 0x154   :  { %3513 = vmatpush1.bf16.msra.mxu1 %v4952_v38  ;;  %3457 = vmatprep.subr.bf16.mxu0 %v4957_v29  ;;  %v4966_v15 = vld [vmem:[%s7290_s1 + $0x82c] ss:$16 sps:$4 sm:$0xff]   ;;  %v4961_v38 = vld [vmem:[%s7290_s1 + $0x728] ss:$16 sps:$4 sm:$0xff]   ;;  %v6513_v5 = vpop.f32.mrf.mxu1 }
 0x155   :  { %3514 = vmatprep.subr.bf16.mxu1 %v4960_v16  ;;  %3420 = vmatprep.mubr.bf16.mxu1 %v5705_v1  ;;  %v4964_v29 = vld [vmem:[%s7290_s1 + $0x828] ss:$16 sps:$4 sm:$0xff]   ;;  %v6511_v16 = vpop.f32.mrf.mxu0  ;;  %7340 = vst [vmem:[#allocation19_spill] sm:$0xff] %v6513_v5  ;;  %v4969_v1 = vld [vmem:[%s7290_s1 + $0x70c] ss:$16 sps:$4 sm:$0xff]  }
 0x156   :  { %v6530_v5 = vpop.f32.mrf.mxu1 }
 0x157   :  { %3458 = vmatpush2.bf16.msra.mxu0 %v4955_v57  ;;  %v4972_v57 = vld [vmem:[%s7290_s1 + $0x80c] ss:$16 sps:$4 sm:$0xff]   ;;  %7341 = vst [vmem:[#allocation20_spill] sm:$0xff] %v6530_v5 }
 0x158   :  { %3515 = vmatpush1.bf16.msra.mxu1 %v4958_v37  ;;  %3459 = vmatprep.subr.bf16.mxu0 %v4963_v44  ;;  %v4967_v37 = vld [vmem:[%s7290_s1 + $0x708] ss:$16 sps:$4 sm:$0xff]   ;;  %v6547_v5 = vpop.f32.mrf.mxu1 }
 0x159   :  { %3516 = vmatprep.subr.bf16.mxu1 %v4966_v15  ;;  %v4970_v44 = vld [vmem:[%s7290_s1 + $0x808] ss:$16 sps:$4 sm:$0xff]   ;;  %v6528_v15 = vpop.f32.mrf.mxu0  ;;  %7342 = vst [vmem:[#allocation21_spill] sm:$0xff] %v6547_v5 }
 0x15a   :  { %v6564_v5 = vpop.f32.mrf.mxu1 }
 0x15b   :  { %3421 = vmatmul.mubr.bf16.gmra.mxu1 %v5729_v34  ;;  %3460 = vmatpush2.bf16.msra.mxu0 %v4961_v38  ;;  %v4975_v34 = vld [vmem:[%s7290_s1 + $0xaec] ss:$16 sps:$4 sm:$0xff]   ;;  %7343 = vst [vmem:[#allocation22_spill] sm:$0xff] %v6564_v5 }
 0x15c   :  { %3517 = vmatpush1.bf16.msra.mxu1 %v4964_v29  ;;  %3461 = vmatprep.subr.bf16.mxu0 %v4969_v1  ;;  %v4978_v38 = vld [vmem:[%s7290_s1 + $0x9ec] ss:$16 sps:$4 sm:$0xff]   ;;  %v4973_v29 = vld [vmem:[%s7290_s1 + $0xae8] ss:$16 sps:$4 sm:$0xff]   ;;  %v6581_v5 = vpop.f32.mrf.mxu1 }
 0x15d   :  { %3518 = vmatprep.subr.bf16.mxu1 %v4972_v57  ;;  %3536 = vmatprep.mubr.bf16.mxu1 %v5745_v42  ;;  %v4976_v1 = vld [vmem:[%s7290_s1 + $0x9e8] ss:$16 sps:$4 sm:$0xff]   ;;  %v6545_v57 = vpop.f32.mrf.mxu0  ;;  %v4981_v42 = vld [vmem:[%s7290_s1 + $0xacc] ss:$16 sps:$4 sm:$0xff]   ;;  %7344 = vst [vmem:[#allocation23_spill] sm:$0xff] %v6581_v5 }
 0x15e   :  { %v6598_v5 = vpop.f32.mrf.mxu1 }
 0x15f   :  { %3462 = vmatpush2.bf16.msra.mxu0 %v4967_v37  ;;  %v4984_v37 = vld [vmem:[%s7290_s1 + $0x9cc] ss:$16 sps:$4 sm:$0xff]   ;;  %7346 = vst [vmem:[#allocation25_spill] sm:$0xff] %v6598_v5 }
 0x160   :  { %3519 = vmatpush1.bf16.msra.mxu1 %v4970_v44  ;;  %3577 = vmatprep.subr.bf16.mxu0 %v4975_v34  ;;  %v4979_v44 = vld [vmem:[%s7290_s1 + $0xac8] ss:$16 sps:$4 sm:$0xff]   ;;  %v6615_v5 = vpop.f32.mrf.mxu1 }
 0x161   :  { %3520 = vmatprep.subr.bf16.mxu1 %v4978_v38  ;;  %v4982_v34 = vld [vmem:[%s7290_s1 + $0x9c8] ss:$16 sps:$4 sm:$0xff]   ;;  %v6562_v38 = vpop.f32.mrf.mxu0  ;;  %7348 = vst [vmem:[#allocation27_spill] sm:$0xff] %v6615_v5 }
 0x162   :  { %3464 = vmatmul.mubr.bf16.vlgmr.msra.gmra.mxu0 %v5585_v26  ;;  %v4987_v26 = vld [vmem:[%s7290_s1 + $0xaac] ss:$16 sps:$4 sm:$0xff]   ;;  %v6632_v5 = vpop.f32.mrf.mxu1 }
 0x163   :  { %3578 = vmatpush1.bf16.msra.mxu0 %v4973_v29  ;;  %v4990_v29 = vld [vmem:[%s7290_s1 + $0x9ac] ss:$16 sps:$4 sm:$0xff]   ;;  %3473 = vmatprep.mubr.bf16.mxu0 %v5607_v39  ;;  %7350 = vst [vmem:[#allocation29_spill] sm:$0xff] %v6632_v5 }
 0x164   :  { %3521 = vmatpush2.bf16.msra.mxu1 %v4976_v1  ;;  %3579 = vmatprep.subr.bf16.mxu0 %v4981_v42  ;;  %v4985_v1 = vld [vmem:[%s7290_s1 + $0xaa8] ss:$16 sps:$4 sm:$0xff]   ;;  %v4993_v39 = vld [vmem:[%s7290_s1 + $0xa8c] ss:$16 sps:$4 sm:$0xff]   ;;  %v6649_v5 = vpop.f32.mrf.mxu1 }
 0x165   :  { %3522 = vmatprep.subr.bf16.mxu1 %v4984_v37  ;;  %v4988_v42 = vld [vmem:[%s7290_s1 + $0x9a8] ss:$16 sps:$4 sm:$0xff]   ;;  %v6579_v37 = vpop.f32.mrf.mxu0  ;;  %7352 = vst [vmem:[#allocation31_spill] sm:$0xff] %v6649_v5 }
 0x166   :  { %v6666_v5 = vpop.f32.mrf.mxu1 }
 0x167   :  { %3580 = vmatpush1.bf16.msra.mxu0 %v4979_v44  ;;  %v4996_v44 = vld [vmem:[%s7290_s1 + $0x98c] ss:$16 sps:$4 sm:$0xff]   ;;  %7354 = vst [vmem:[#allocation33_spill] sm:$0xff] %v6666_v5 }
 0x168   :  { %3523 = vmatpush2.bf16.msra.mxu1 %v4982_v34  ;;  %3581 = vmatprep.subr.bf16.mxu0 %v4987_v26  ;;  %v4991_v34 = vld [vmem:[%s7290_s1 + $0xa88] ss:$16 sps:$4 sm:$0xff]   ;;  %v6683_v5 = vpop.f32.mrf.mxu1 }
 0x169   :  { %3524 = vmatprep.subr.bf16.mxu1 %v4990_v29  ;;  %v4994_v26 = vld [vmem:[%s7290_s1 + $0x988] ss:$16 sps:$4 sm:$0xff]   ;;  %v6596_v29 = vpop.f32.mrf.mxu0  ;;  %7356 = vst [vmem:[#allocation35_spill] sm:$0xff] %v6683_v5 }
 0x16a   :  { %3474 = vmatmul.mubr.bf16.gmra.mxu0 %v5637_v9  ;;  %7345 = vst [vmem:[#allocation24_spill] sm:$0xff] %v6596_v29  ;;  %v4999_v9 = vld [vmem:[%s7290_s1 + $0xa6c] ss:$16 sps:$4 sm:$0xff]  }
 0x16b   :  { %3582 = vmatpush1.bf16.msra.mxu0 %v4985_v1  ;;  %v5002_v1 = vld [vmem:[%s7290_s1 + $0x96c] ss:$16 sps:$4 sm:$0xff]   ;;  %3483 = vmatprep.mubr.bf16.mxu0 %v5657_v30 }
 0x16c   :  { %3525 = vmatpush2.bf16.msra.mxu1 %v4988_v42  ;;  %3583 = vmatprep.subr.bf16.mxu0 %v4993_v39  ;;  %v4997_v42 = vld [vmem:[%s7290_s1 + $0xa68] ss:$16 sps:$4 sm:$0xff]   ;;  %v5005_v30 = vld [vmem:[%s7290_s1 + $0xa4c] ss:$16 sps:$4 sm:$0xff]  }
 0x16d   :  { %3526 = vmatprep.subr.bf16.mxu1 %v4996_v44  ;;  %v5000_v39 = vld [vmem:[%s7290_s1 + $0x968] ss:$16 sps:$4 sm:$0xff]   ;;  %v6613_v44 = vpop.f32.mrf.mxu0  ;;  %v5038_v29 = vld [vmem:[%s7290_s1 + $0xb6c] ss:$16 sps:$4 sm:$0xff]  }
 0x16e   :  { %7347 = vst [vmem:[#allocation26_spill] sm:$0xff] %v6613_v44 }
 0x16f   :  { %3584 = vmatpush1.bf16.msra.mxu0 %v4991_v34  ;;  %v5008_v34 = vld [vmem:[%s7290_s1 + $0x94c] ss:$16 sps:$4 sm:$0xff]  }
 0x170   :  { %3527 = vmatpush2.bf16.msra.mxu1 %v4994_v26  ;;  %3585 = vmatprep.subr.bf16.mxu0 %v4999_v9  ;;  %v5003_v26 = vld [vmem:[%s7290_s1 + $0xa48] ss:$16 sps:$4 sm:$0xff]  }
 0x171   :  { %3528 = vmatprep.subr.bf16.mxu1 %v5002_v1  ;;  %v5006_v9 = vld [vmem:[%s7290_s1 + $0x948] ss:$16 sps:$4 sm:$0xff]   ;;  %v6630_v1 = vpop.f32.mrf.mxu0 }
 0x172   :  { %3484 = vmatmul.mubr.bf16.gmra.mxu0 %v5677_v45  ;;  %7349 = vst [vmem:[#allocation28_spill] sm:$0xff] %v6630_v1  ;;  %v5011_v45 = vld [vmem:[%s7290_s1 + $0xa2c] ss:$16 sps:$4 sm:$0xff]   ;;  %v5030_v1 = vld [vmem:[%s7290_s1 + $0xba8] ss:$16 sps:$4 sm:$0xff]  }
 0x173   :  { %3586 = vmatpush1.bf16.msra.mxu0 %v4997_v42  ;;  %v5014_v42 = vld [vmem:[%s7290_s1 + $0x92c] ss:$16 sps:$4 sm:$0xff]   ;;  %3493 = vmatprep.mubr.bf16.mxu0 %v5707_v2 }
 0x174   :  { %3529 = vmatpush2.bf16.msra.mxu1 %v5000_v39  ;;  %3587 = vmatprep.subr.bf16.mxu0 %v5005_v30  ;;  %v5009_v39 = vld [vmem:[%s7290_s1 + $0xa28] ss:$16 sps:$4 sm:$0xff]   ;;  %v5017_v2 = vld [vmem:[%s7290_s1 + $0xa0c] ss:$16 sps:$4 sm:$0xff]  }
 0x175   :  { %3530 = vmatprep.subr.bf16.mxu1 %v5008_v34  ;;  %v5012_v30 = vld [vmem:[%s7290_s1 + $0x928] ss:$16 sps:$4 sm:$0xff]   ;;  %v6647_v34 = vpop.f32.mrf.mxu0 }
 0x176   :  { %7351 = vst [vmem:[#allocation30_spill] sm:$0xff] %v6647_v34 }
 0x177   :  { %3588 = vmatpush1.bf16.msra.mxu0 %v5003_v26  ;;  %v5020_v26 = vld [vmem:[%s7290_s1 + $0x90c] ss:$16 sps:$4 sm:$0xff]  }
 0x178   :  { %3531 = vmatpush2.bf16.msra.mxu1 %v5006_v9  ;;  %3589 = vmatprep.subr.bf16.mxu0 %v5011_v45  ;;  %v5015_v9 = vld [vmem:[%s7290_s1 + $0xa08] ss:$16 sps:$4 sm:$0xff]  }
 0x179   :  { %3532 = vmatprep.subr.bf16.mxu1 %v5014_v42  ;;  %v5018_v45 = vld [vmem:[%s7290_s1 + $0x908] ss:$16 sps:$4 sm:$0xff]   ;;  %v6664_v42 = vpop.f32.mrf.mxu0 }
 0x17a   :  { %3494 = vmatmul.mubr.bf16.gmra.mxu0 %v5734_v36  ;;  %7353 = vst [vmem:[#allocation32_spill] sm:$0xff] %v6664_v42  ;;  %v5023_v36 = vld [vmem:[%s7290_s1 + $0xbec] ss:$16 sps:$4 sm:$0xff]  }
 0x17b   :  { %3590 = vmatpush1.bf16.msra.mxu0 %v5009_v39  ;;  %v5026_v39 = vld [vmem:[%s7290_s1 + $0xc2c] ss:$16 sps:$4 sm:$0xff]   ;;  %3609 = vmatprep.mubr.bf16.mxu0 %v5747_v43 }
 0x17c   :  { %3533 = vmatpush2.bf16.msra.mxu1 %v5012_v30  ;;  %3591 = vmatprep.subr.bf16.mxu0 %v5017_v2  ;;  %v5021_v30 = vld [vmem:[%s7290_s1 + $0xbe8] ss:$16 sps:$4 sm:$0xff]   ;;  %v5029_v43 = vld [vmem:[%s7290_s1 + $0xbcc] ss:$16 sps:$4 sm:$0xff]  }
 0x17d   :  { %3534 = vmatprep.subr.bf16.mxu1 %v5020_v26  ;;  %v5024_v2 = vld [vmem:[%s7290_s1 + $0xc28] ss:$16 sps:$4 sm:$0xff]   ;;  %v6681_v26 = vpop.f32.mrf.mxu0 }
 0x17e   :  { %7355 = vst [vmem:[#allocation34_spill] sm:$0xff] %v6681_v26  ;;  %v5032_v26 = vld [vmem:[%s7290_s1 + $0xbac] ss:$16 sps:$4 sm:$0xff]  }
 0x17f   :  { %3592 = vmatpush1.bf16.msra.mxu0 %v5015_v9  ;;  %v708_v9 = vlaneseq }
 0x180   :  { %3535 = vmatpush2.bf16.msra.mxu1 %v5018_v45  ;;  %3593 = vmatprep.subr.bf16.mxu0 %v5023_v36  ;;  %v5041_v45 = vld [vmem:[%s7290_s1 + $0xc0c] ss:$16 sps:$4 sm:$0xff]   ;;  %v5027_v36 = vld [vmem:[%s7290_s1 + $0xbc8] ss:$16 sps:$4 sm:$0xff]  }
 0x181   :  { %3662 = vmatprep.subr.bf16.mxu1 %v5026_v39  ;;  %v5039_v39 = vld [vmem:[%s7290_s1 + $0xc08] ss:$16 sps:$4 sm:$0xff]  }
 0x182   :  { %v6691_v42 = vpop.f32.mrf.mxu0 }
 0x183   :  { %v6693_v34 = vpop.f32.mrf.mxu1  ;;  %3537 = vmatmul.mubr.bf16.vlgmr.msra.gmra.mxu1 %v5881_v35  ;;  %3594 = vmatpush2.bf16.msra.mxu0 %v5021_v30  ;;  %v6708_v35 = vshrl.u32 %v708_v9, 7 }
 0x184   :  { %3663 = vmatpush1.bf16.msra.mxu1 %v5024_v2  ;;  %v6702_v5 = vpop.f32.mrf.mxu0  ;;  %3595 = vmatprep.subr.bf16.mxu0 %v5029_v43 }
 0x185   :  { %3546 = vmatprep.mubr.bf16.mxu1 %v5896_v4  ;;  %7357 = vst [vmem:[#allocation36_spill] sm:$0xff] %v6708_v35  ;;  %3664 = vmatprep.subr.bf16.mxu1 %v5041_v45  ;;  %v6710_v30 = vpop.f32.mrf.mxu1  ;;  %v5035_v4 = vld [vmem:[%s7290_s1 + $0xb8c] ss:$16 sps:$4 sm:$0xff]   ;;  %v6726_v45 = vld [vmem:[%s7292_s2] sm:$0xf] }
 0x186   :  { %7358 = vst [vmem:[#allocation37_spill] sm:$0xff] %v6710_v30  ;;  %v6712_v2 = vpop.f32.mrf.mxu0  ;;  %7359 = vst [vmem:[#allocation38_spill] sm:$0xff] %v6726_v45 }
 0x187   :  { %3596 = vmatpush2.bf16.msra.mxu0 %v5027_v36  ;;  %v6728_v36 = vpop.f32.mrf.mxu1 }
 0x188   :  { %3665 = vmatpush1.bf16.msra.mxu1 %v5039_v39  ;;  %v6717_v43 = vpop.f32.mrf.mxu0  ;;  %3597 = vmatprep.subr.bf16.mxu0 %v5032_v26  ;;  %7360 = vst [vmem:[#allocation39_spill] sm:$0xff] %v6728_v36  ;;  %v7315_v39 = vsub.s32 1, %v6708_v35  ;;  %v5033_v26 = vld [vmem:[%s7290_s1 + $0xb88] ss:$16 sps:$4 sm:$0xff]   ;;  %v7363_v36 = vsub.s32 0, %v6708_v35 }
 0x18a   :  { %v6730_v44 = vpop.f32.mrf.mxu0  ;;  %v6753_v30 = vrot.slane %v6726_v45, %v7315_v39  ;;  %v5042_v39 = vld [vmem:[%s7290_s1 + $0xb48] ss:$16 sps:$4 sm:$0xff]  }
 0x18b   :  { %7361 = vst [vmem:[#allocation40_spill] sm:$0xff] %v6730_v44  ;;  %3547 = vmatmul.mubr.bf16.gmra.mxu1 %v5929_v59  ;;  %3598 = vmatpush2.bf16.msra.mxu0 %v5030_v1  ;;  %v711_v59 = vrot.slane %v6726_v45, %v7363_v36  ;;  %v6746_v44 = vpop.f32.mrf.mxu1  ;;  %v5044_v36 = vld [vmem:[%s7290_s1 + $0xb4c] ss:$16 sps:$4 sm:$0xff]  }
 0x18c   :  { %3556 = vmatprep.mubr.bf16.mxu1 %v5938_v61  ;;  %v6738_v9 = vpop.f32.mrf.mxu0  ;;  %3599 = vmatprep.subr.bf16.mxu0 %v5035_v4  ;;  %v5036_v61 = vld [vmem:[%s7290_s1 + $0xb68] ss:$16 sps:$4 sm:$0xff]   ;;  %v2742_v45 = vadd.f32 %v6218_v17, %v6753_v30 }
 0x18d   :  { %7362 = vst [vmem:[#allocation41_spill] sm:$0xff] %v6738_v9  ;;  %v6758_v4 = vpop.f32.mrf.mxu1 }
 0x18e   :  { %v6748_v1 = vpop.f32.mrf.mxu0 }
 0x18f   :  { %7364 = vst [vmem:[#allocation42_spill] sm:$0xff] %v6748_v1  ;;  %3600 = vmatpush2.bf16.msra.mxu0 %v5033_v26  ;;  %v2736_v1 = vadd.f32 %v6170_v7, %v711_v59  ;;  %v2738_v26 = vadd.f32 %v6184_v6, %v6753_v30  ;;  %v6778_v7 = vpop.f32.mrf.mxu1 }
 0x190   :  { %v6760_v9 = vpop.f32.mrf.mxu0  ;;  %3601 = vmatprep.subr.bf16.mxu0 %v5038_v29  ;;  %v2740_v29 = vadd.f32 %v6201_v22, %v711_v59  ;;  %7366 = vst [vmem:[#allocation44_spill] sm:$0xff] %v6778_v7 }
 0x191   :  { %v2809_v6 = vadd.f32 %v6175_v50, %v2736_v1  ;;  %v2811_v17 = vadd.f32 %v6193_v27, %v2738_v26  ;;  %v2815_v50 = vadd.f32 %v6227_v40, %v2742_v45  ;;  %v6801_v1 = vpop.f32.mrf.mxu1  ;;  %v2756_v40 = vadd.f32 %v6297_v47, %v711_v59 }
 0x192   :  { %v6766_v35 = vpop.f32.mrf.mxu0  ;;  %v2760_v45 = vadd.f32 %v6331_v14, %v711_v59  ;;  %v2766_v26 = vadd.f32 %v6365_v56, %v711_v59  ;;  %v7369_v14 = vmov 0  }
 0x193   :  { %7365 = vst [vmem:[#allocation43_spill] sm:$0xff] %v6766_v35  ;;  %3557 = vmatmul.mubr.bf16.gmra.mxu1 %v5955_v48  ;;  %3602 = vmatpush2.bf16.msra.mxu0 %v5036_v61  ;;  %v5047_v48 = vld [vmem:[%s7290_s1 + $0xb2c] ss:$16 sps:$4 sm:$0xff]   ;;  %v2746_v61 = vadd.f32 %v6229_v55, %v711_v59  ;;  %v2882_v7 = vadd.f32 %v6426_v46, %v2809_v6 }
 0x194   :  { %3566 = vmatprep.mubr.bf16.mxu1 %v5962_v0  ;;  %v6780_v35 = vpop.f32.mrf.mxu0  ;;  %3603 = vmatprep.subr.bf16.mxu0 %v5044_v36  ;;  %v2748_v0 = vadd.f32 %v6245_v63, %v6753_v30  ;;  %v5045_v36 = vld [vmem:[%s7290_s1 + $0xb28] ss:$16 sps:$4 sm:$0xff]   ;;  %v2750_v55 = vadd.f32 %v6263_v60, %v711_v59  ;;  %v2752_v63 = vadd.f32 %v6280_v21, %v6753_v30  ;;  %v5050_v46 = vld [vmem:[%s7290_s1 + $0xb0c] ss:$16 sps:$4 sm:$0xff]  }
 0x195   :  { %7367 = vst [vmem:[#allocation45_spill] sm:$0xff] %v6780_v35  ;;  %v2813_v35 = vadd.f32 %v6209_v62, %v2740_v29  ;;  %v2819_v27 = vadd.f32 %v6243_v53, %v2746_v61  ;;  %v2884_v60 = vadd.f32 %v6443_v52, %v2811_v17  ;;  %v2758_v21 = vadd.f32 %v6314_v32, %v6753_v30  ;;  %v5048_v32 = vld [vmem:[%s7290_s1 + $0xb08] ss:$16 sps:$4 sm:$0xff]   ;;  %v7372_v17 = vld [vmem:[#allocation18_spill] sm:$0xff] }
 0x196   :  { %v6789_v22 = vpop.f32.mrf.mxu0  ;;  %v2821_v62 = vadd.f32 %v6260_v19, %v2748_v0  ;;  %v2768_v53 = vadd.f32 %v6381_v20, %v6753_v30  ;;  %v2955_v19 = vadd.f32 %v6435_v49, %v2882_v7  ;;  %v2825_v56 = vadd.f32 %v6294_v28, %v2752_v63  ;;  %v6833_v20 = vpop.f32.mrf.mxu1  ;;  %v7374_v63 = vld [vmem:[#allocation10_spill] sm:$0xff] }
 0x197   :  { %7368 = vst [vmem:[#allocation46_spill] sm:$0xff] %v6789_v22  ;;  %3604 = vmatpush2.bf16.msra.mxu0 %v5042_v39  ;;  %v2762_v39 = vadd.f32 %v6348_v58, %v6753_v30  ;;  %v2886_v47 = vadd.f32 %v6460_v24, %v2813_v35  ;;  %v2823_v58 = vadd.f32 %v6277_v54, %v2750_v55  ;;  %v7373_v55 = vld [vmem:[#allocation4_spill] sm:$0xff] }
 0x198   :  { %v6803_v22 = vpop.f32.mrf.mxu0  ;;  %3605 = vmatprep.subr.bf16.mxu0 %v5047_v48  ;;  %v2888_v52 = vadd.f32 %v6477_v51, %v2815_v50  ;;  %v2829_v24 = vadd.f32 %v6308_v10, %v2756_v40  ;;  %v2957_v35 = vadd.f32 %v6451_v11, %v2884_v60  ;;  %v2892_v7 = vadd.f32 %v6494_v8, %v2819_v27  ;;  %v7370_v11 = vld [vmem:[#allocation17_spill] sm:$0xff]  ;;  %v6860_v0 = vpop.f32.mrf.mxu1  ;;  %v7376_v27 = vld [vmem:[#allocation16_spill] sm:$0xff] }
 0x199   :  { %v3028_v48 = vadd.f32 %v6691_v42, %v2955_v19  ;;  %v2831_v54 = vadd.f32 %v6322_v23, %v2758_v21  ;;  %v2833_v28 = vadd.f32 %v6339_v18, %v2760_v45  ;;  %v2839_v51 = vadd.f32 %v6373_v3, %v2766_v26  ;;  %v7371_v23 = vld [vmem:[#allocation15_spill] sm:$0xff]  ;;  %v7378_v60 = vld [vmem:[#allocation5_spill] sm:$0xff]  ;;  %v7381_v21 = vld [vmem:[#allocation40_spill] sm:$0xff] }
 0x19a   :  { %v6818_v29 = vpop.f32.mrf.mxu0  ;;  %v6848_v6 = vadd.f32 %v6390_v41, %v2768_v53  ;;  %v2772_v10 = vadd.f32 %v6415_v33, %v6753_v30  ;;  %v2959_v8 = vadd.f32 %v7370_v11, %v2886_v47  ;;  %v3030_v42 = vadd.f32 %v6702_v5, %v2957_v35  ;;  %v7382_v53 = vld [vmem:[#allocation21_spill] sm:$0xff]  ;;  %v7383_v47 = vld [vmem:[#allocation39_spill] sm:$0xff] }
 0x19b   :  { %3567 = vmatmul.mubr.bf16.gmra.mxu1 %v5984_v13  ;;  %3606 = vmatpush2.bf16.msra.mxu0 %v5045_v36  ;;  %v2770_v13 = vadd.f32 %v6399_v12, %v711_v59  ;;  %v2835_v12 = vadd.f32 %v6356_v31, %v2762_v39  ;;  %v2961_v31 = vadd.f32 %v6485_v25, %v2888_v52  ;;  %v3122_v39 = vpop.f32.mrf.mxu1  ;;  %v7387_v11 = vld [vmem:[#allocation41_spill] sm:$0xff] }
 0x19c   :  { %3682 = vmatprep.mubr.bf16.mxu1 %v7369_v14  ;;  %v6835_v49 = vpop.f32.mrf.mxu0  ;;  %3607 = vmatprep.subr.bf16.mxu0 %v5050_v46  ;;  %v2894_v18 = vadd.f32 %v6511_v16, %v2821_v62  ;;  %v2896_v3 = vadd.f32 %v6528_v15, %v2823_v58  ;;  %v2965_v33 = vadd.f32 %v7372_v17, %v2892_v7  ;;  %v7375_v46 = vunpack.c.l.s8.bf16 %v7374_v63  ;;  %v7386_v7 = vld [vmem:[#allocation23_spill] sm:$0xff] }
 0x19d   :  { %v6855_v61 = vadd.f32 %v7371_v23, %v2770_v13  ;;  %v2898_v30 = vadd.f32 %v6545_v57, %v2825_v56  ;;  %v3101_v5 = vadd.f32 %v6693_v34, %v3028_v48  ;;  %v3032_v36 = vadd.f32 %v6712_v2, %v2959_v8  ;;  %v7377_v57 = vld [vmem:[#allocation37_spill] sm:$0xff]  ;;  %v7380_v2 = vld [vmem:[#allocation20_spill] sm:$0xff]  ;;  %v7384_v13 = vld [vmem:[#allocation22_spill] sm:$0xff] }
 0x19e   :  { %v6845_v59 = vpop.f32.mrf.mxu0  ;;  %v2902_v50 = vadd.f32 %v6562_v38, %v2829_v24  ;;  %v2904_v25 = vadd.f32 %v6579_v37, %v2831_v54  ;;  %v3034_v16 = vadd.f32 %v6717_v43, %v2961_v31  ;;  %v2845_v62 = vadd.f32 %v7376_v27, %v2772_v10  ;;  %v7379_v38 = vld [vmem:[#allocation19_spill] sm:$0xff]  ;;  %v7385_v24 = vld [vmem:[#allocation24_spill] sm:$0xff]  ;;  %v7388_v31 = vld [vmem:[#allocation26_spill] sm:$0xff] }
 0x19f   :  { %3608 = vmatpush2.bf16.msra.mxu0 %v5048_v32  ;;  %v3103_v40 = vadd.f32 %v7377_v57, %v3030_v42  ;;  %v2967_v37 = vadd.f32 %v7379_v38, %v2894_v18  ;;  %v2969_v43 = vadd.f32 %v7380_v2, %v2896_v3  ;;  %v3038_v45 = vadd.f32 %v7381_v21, %v2965_v33  ;;  %v7389_v3 = vld [vmem:[#allocation28_spill] sm:$0xff]  ;;  %v7392_v63 = vld [vmem:[#allocation43_spill] sm:$0xff]  ;;  %v7399_v21 = vld [vmem:[#allocation30_spill] sm:$0xff] }
 0x1a0   :  { %v6862_v41 = vpop.f32.mrf.mxu0  ;;  %v2971_v19 = vadd.f32 %v7382_v53, %v2898_v30  ;;  %v3105_v32 = vadd.f32 %v7383_v47, %v3032_v36  ;;  %v2975_v52 = vadd.f32 %v7384_v13, %v2902_v50  ;;  %v2906_v35 = vadd.f32 %v7385_v24, %v2833_v28  ;;  %v6892_v30 = vpop.f32.mrf.mxu1  ;;  %v7390_v36 = vld [vmem:[#allocation42_spill] sm:$0xff]  ;;  %v7397_v38 = vld [vmem:[#allocation7_spill] sm:$0xff] }
 0x1a1   :  { %v2977_v48 = vadd.f32 %v7386_v7, %v2904_v25  ;;  %v3107_v54 = vadd.f32 %v6746_v44, %v3034_v16  ;;  %v3040_v8 = vadd.f32 %v7387_v11, %v2967_v37  ;;  %v2908_v18 = vadd.f32 %v7388_v31, %v2835_v12  ;;  %v7391_v16 = vld [vmem:[#allocation25_spill] sm:$0xff]  ;;  %v7398_v2 = vld [vmem:[#allocation27_spill] sm:$0xff]  ;;  %v7402_v7 = vld [vmem:[#allocation32_spill] sm:$0xff] }
 0x1a2   :  { %3610 = vmatmul.mubr.bf16.vlgmr.msra.gmra.mxu0 %v7373_v55  ;;  %v3173_v15 = vpop.f32.mrf.mxu0  ;;  %v2912_v17 = vadd.f32 %v7389_v3, %v2839_v51  ;;  %v3111_v33 = vadd.f32 %v6758_v4, %v3038_v45  ;;  %v3042_v50 = vadd.f32 %v7390_v36, %v2969_v43  ;;  %v2979_v55 = vadd.f32 %v7391_v16, %v2906_v35  ;;  %v7394_v4 = vld [vmem:[#allocation12_spill] sm:$0xff]  ;;  %v7404_v31 = vld [vmem:[#allocation46_spill] sm:$0xff]  ;;  %v7406_v16 = vld [vmem:[#allocation13_spill] sm:$0xff] }
 0x1a3   :  { %4456 = vmatmul.mubr.msk.bf16.vlgmr.msra.gmra.mxu1 %vm2688_vm0, %v7375_v46  ;;  %v3174_v34 = vadd.f32 %v3173_v15, %v3101_v5  ;;  %3619 = vmatprep.mubr.bf16.mxu0 %v7378_v60  ;;  %v3044_v15 = vadd.f32 %v6760_v9, %v2971_v19  ;;  %v3048_v12 = vadd.f32 %v7392_v63, %v2975_v52  ;;  %v7393_v46 = vld [vmem:[#allocation6_spill] sm:$0xff]  ;;  %v7395_v27 = vunpack.c.l.s8.bf16 %v7394_v4  ;;  %v7401_v19 = vld [vmem:[#allocation45_spill] sm:$0xff]  ;;  %v7409_v4 = vld [vmem:[#allocation31_spill] sm:$0xff] }
 0x1a4   :  { %3692 = vmatprep.mubr.bf16.mxu1 %v7369_v14  ;;  %v3175_v26 = vpop.f32.mrf.mxu0  ;;  %v2981_v43 = vadd.f32 %v7398_v2, %v2908_v18  ;;  %v2914_v45 = vadd.f32 %v7399_v21, %v6848_v6  ;;  %v3050_v47 = vadd.f32 %v7401_v19, %v2977_v48  ;;  %v3115_v13 = vadd.f32 %v6801_v1, %v3042_v50 }
 0x1a5   :  { %v3176_v58 = vadd.f32 %v3175_v26, %v3103_v40  ;;  %v3760_v56 = vmul.f32 0.5, %v3174_v34  ;;  %v7396_v40 = vld [vmem:[#allocation44_spill] sm:$0xff]  ;;  %v7400_v26 = vld [vmem:[#allocation29_spill] sm:$0xff]  ;;  %v3121_v6 = vadd.f32 %v6860_v0, %v3048_v12  ;;  %v3052_v18 = vadd.f32 %v7404_v31, %v2979_v55 }
 0x1a6   :  { %v3177_v10 = vpop.f32.mrf.mxu0  ;;  %v3113_v34 = vadd.f32 %v7396_v40, %v3040_v8  ;;  %v2985_v53 = vadd.f32 %v7400_v26, %v2912_v17  ;;  %v3117_v8 = vadd.f32 %v6833_v20, %v3044_v15  ;;  %v3123_v1 = vadd.f32 %v3122_v39, %v3050_v47  ;;  %v7408_v12 = vld [vmem:[#allocation9_spill] sm:$0xff] }
 0x1a7   :  { %v3178_v42 = vadd.f32 %v3177_v10, %v3105_v32  ;;  %v3761_v23 = vmul.f32 0.5, %v3176_v58  ;;  %vm3768_vm1 = vcmp.ge.f32.partialorder %v3760_v56, 1.0  ;;  %v3126_v32 = vpop.f32.mrf.mxu1  ;;  %v7403_v10 = vld [vmem:[#allocation34_spill] sm:$0xff]  ;;  %v3054_v50 = vadd.f32 %v6803_v22, %v2981_v43  ;;  %v7411_v43 = vld [vmem:[#allocation35_spill] sm:$0xff] }
 0x1a8   :  { %v3179_v5 = vpop.f32.mrf.mxu0  ;;  %v3780_v28 = vsel %vm3768_vm1, 0.0, %v3760_v56  ;;  %v2918_v11 = vadd.f32 %v7403_v10, %v2845_v62  ;;  %v7407_v39 = vunpack.c.l.s8.bf16 %v7406_v16 }
 0x1a9   :  { %v3180_v44 = vadd.f32 %v3179_v5, %v3107_v54  ;;  %vm3769_vm2 = vcmp.ge.f32.partialorder %v3761_v23, 1.0  ;;  %v3789_v25 = vsub.f32 %v3178_v42, %v3780_v28  ;;  %v2916_v54 = vadd.f32 %v7402_v7, %v6855_v61  ;;  %v3130_v17 = vpop.f32.mrf.mxu1 }
 0x1aa   :  { %3620 = vmatmul.mubr.bf16.gmra.mxu0 %v7393_v46  ;;  %v3183_v51 = vpop.f32.mrf.mxu0  ;;  %v3781_v57 = vsel %vm3769_vm2, 0.0, %v3761_v23  ;;  %v7318_v5 = vmov 0.0   ;;  %v3125_v23 = vadd.f32 %v6892_v30, %v3052_v18  ;;  %v2991_v21 = vadd.f32 %v7411_v43, %v2918_v11  ;;  %v7413_v11 = vld [vmem:[#allocation14_spill] sm:$0xff] }
 0x1ab   :  { %4457 = vmatmul.mubr.msk.bf16.gmra.mxu1 %vm2688_vm0, %v7395_v27  ;;  %v3184_v60 = vadd.f32 %v3183_v51, %v3111_v33  ;;  %3629 = vmatprep.mubr.bf16.mxu0 %v7397_v38  ;;  %v3790_v37 = vsub.f32 %v3180_v44, %v3781_v57  ;;  %v3793_v9 = vmul.f32 0.5, %v3789_v25  ;;  %v3772_v61 = vsel %vm3768_vm1, 1.0, %v7318_v5  ;;  %v7405_v44 = vld [vmem:[#allocation8_spill] sm:$0xff]  ;;  %v3132_v40 = vpop.f32.mrf.mxu1 }
 0x1ac   :  { %3702 = vmatprep.mubr.bf16.mxu1 %v7369_v14  ;;  %v3185_v58 = vpop.f32.mrf.mxu0  ;;  %v3773_v56 = vsel %vm3769_vm2, 1.0, %v7318_v5  ;;  %v2987_v27 = vadd.f32 %v7409_v4, %v2914_v45  ;;  %v3127_v19 = vadd.f32 %v3126_v32, %v3054_v50  ;;  %v7412_v32 = vld [vmem:[#allocation11_spill] sm:$0xff]  ;;  %vm3726_vm1 = vcmask 130048  }
 0x1ad   :  { %v3186_v52 = vadd.f32 %v3185_v58, %v3113_v34  ;;  %v3794_v24 = vmul.f32 0.5, %v3790_v37  ;;  %v3797_v35 = vadd.f32 %v3793_v9, %v3780_v28  ;;  %v7410_v9 = vld [vmem:[#allocation33_spill] sm:$0xff] }
 0x1ae   :  { %v3187_v42 = vpop.f32.mrf.mxu0  ;;  %v2989_v2 = vadd.f32 %v7410_v9, %v2916_v54 }
 0x1af   :  { %v6919_v48 = vadd.f32 %v3187_v42, %v3115_v13  ;;  %v3798_v3 = vadd.f32 %v3794_v24, %v3781_v57  ;;  %vm3801_vm3 = vcmp.ge.f32.partialorder %v3797_v35, 1.0  ;;  %v3058_v57 = vadd.f32 %v6818_v29, %v2985_v53  ;;  %v3134_v53 = vpop.f32.mrf.mxu1 }
 0x1b0   :  { %v3189_v33 = vpop.f32.mrf.mxu0  ;;  %v3805_v62 = vsel %vm3801_vm3, 1.0, %v7318_v5  ;;  %v3813_v28 = vsel %vm3801_vm3, 0.0, %v3797_v35  ;;  %v3062_v29 = vadd.f32 %v6845_v59, %v2989_v2 }
 0x1b1   :  { %v3190_v20 = vadd.f32 %v3189_v33, %v3117_v8  ;;  %vm3802_vm4 = vcmp.ge.f32.partialorder %v3798_v3, 1.0  ;;  %v3809_v0 = vadd.f32 %v3805_v62, %v3772_v61  ;;  %v3822_v36 = vsub.f32 %v3184_v60, %v3813_v28 }
 0x1b2   :  { %3630 = vmatmul.mubr.bf16.gmra.mxu0 %v7405_v44  ;;  %v3193_v25 = vpop.f32.mrf.mxu0  ;;  %v3806_v55 = vsel %vm3802_vm4, 1.0, %v7318_v5  ;;  %v3814_v15 = vsel %vm3802_vm4, 0.0, %v3798_v3  ;;  %v3131_v45 = vadd.f32 %v3130_v17, %v3058_v57  ;;  %v7414_v8 = vunpack.c.l.s8.bf16 %v7413_v11 }
 0x1b3   :  { %4458 = vmatmul.mubr.msk.bf16.gmra.mxu1 %vm2688_vm0, %v7407_v39  ;;  %v6932_v63 = vadd.f32 %v3193_v25, %v3121_v6  ;;  %3639 = vmatprep.mubr.bf16.mxu0 %v7408_v12  ;;  %v3810_v22 = vadd.f32 %v3806_v55, %v3773_v56  ;;  %v3823_v46 = vsub.f32 %v3186_v52, %v3814_v15  ;;  %v3826_v51 = vmul.f32 0.5, %v3822_v36 }
 0x1b4   :  { %3712 = vmatprep.mubr.bf16.mxu1 %v7369_v14  ;;  %v3195_v34 = vpop.f32.mrf.mxu0  ;;  %v3060_v14 = vadd.f32 %v6835_v49, %v2987_v27  ;;  %v3064_v49 = vadd.f32 %v6862_v41, %v2991_v21 }
 0x1b5   :  { %v3196_v60 = vadd.f32 %v3195_v34, %v3123_v1  ;;  %v3827_v38 = vmul.f32 0.5, %v3823_v46  ;;  %v3830_v37 = vadd.f32 %v3826_v51, %v3813_v28  ;;  %v3136_v1 = vpop.f32.mrf.mxu1 }
 0x1b6   :  { %v3197_v26 = vpop.f32.mrf.mxu0  ;;  %v3133_v54 = vadd.f32 %v3132_v40, %v3060_v14  ;;  %v3137_v28 = vadd.f32 %v3136_v1, %v3064_v49 }
 0x1b7   :  { %v3198_v47 = vadd.f32 %v3197_v26, %v3125_v23  ;;  %v3831_v58 = vadd.f32 %v3827_v38, %v3814_v15  ;;  %vm3834_vm5 = vcmp.ge.f32.partialorder %v3830_v37, 1.0 }
 0x1b8   :  { %v3199_v13 = vpop.f32.mrf.mxu0  ;;  %v3838_v30 = vsel %vm3834_vm5, 1.0, %v7318_v5  ;;  %v3846_v52 = vsel %vm3834_vm5, 0.0, %v3830_v37 }
 0x1b9   :  { %v3200_v24 = vadd.f32 %v3199_v13, %v3127_v19  ;;  %vm3835_vm6 = vcmp.ge.f32.partialorder %v3831_v58, 1.0  ;;  %v3842_v35 = vadd.f32 %v3838_v30, %v3809_v0  ;;  %v3855_v7 = vsub.f32 %v6919_v48, %v3846_v52 }
 0x1ba   :  { %3640 = vmatmul.mubr.bf16.gmra.mxu0 %v7412_v32  ;;  %v3203_v10 = vpop.f32.mrf.mxu0  ;;  %v3839_v59 = vsel %vm3835_vm6, 1.0, %v7318_v5  ;;  %v3847_v6 = vsel %vm3835_vm6, 0.0, %v3831_v58  ;;  %v3135_v48 = vadd.f32 %v3134_v53, %v3062_v29 }
 0x1bb   :  { %4459 = vmatmul.mubr.msk.bf16.gmra.mxu1 %vm2688_vm0, %v7414_v8  ;;  %v3204_v42 = vadd.f32 %v3203_v10, %v3131_v45  ;;  %v3843_v31 = vadd.f32 %v3839_v59, %v3810_v22  ;;  %v3856_v18 = vsub.f32 %v3190_v20, %v3847_v6  ;;  %v3859_v3 = vmul.f32 0.5, %v3855_v7 }
 0x1bc   :  { %v3205_v17 = vpop.f32.mrf.mxu0 }
 0x1bd   :  { %v3206_v33 = vadd.f32 %v3205_v17, %v3133_v54  ;;  %v3860_v61 = vmul.f32 0.5, %v3856_v18  ;;  %v3863_v41 = vadd.f32 %v3859_v3, %v3846_v52 }
 0x1be   :  { %v3207_v62 = vpop.f32.mrf.mxu0 }
 0x1bf   :  { %v6951_v0 = vadd.f32 %v3207_v62, %v3135_v48  ;;  %v3864_v36 = vadd.f32 %v3860_v61, %v3847_v6  ;;  %vm3867_vm7 = vcmp.ge.f32.partialorder %v3863_v41, 1.0 }
 0x1c0   :  { %v3209_v50 = vpop.f32.mrf.mxu0  ;;  %v3871_v44 = vsel %vm3867_vm7, 1.0, %v7318_v5  ;;  %v3879_v25 = vsel %vm3867_vm7, 0.0, %v3863_v41 }
 0x1c1   :  { %v3210_v16 = vadd.f32 %v3209_v50, %v3137_v28  ;;  %vm3868_vm8 = vcmp.ge.f32.partialorder %v3864_v36, 1.0  ;;  %v3875_v20 = vadd.f32 %v3871_v44, %v3842_v35  ;;  %v3888_v39 = vsub.f32 %v6932_v63, %v3879_v25  ;;  %v7416_v28 = vld [vmem:[#allocation36_spill] sm:$0xff] }
 0x1c2   :  { %v3872_v56 = vsel %vm3868_vm8, 1.0, %v7318_v5  ;;  %v3880_v55 = vsel %vm3868_vm8, 0.0, %v3864_v36  ;;  %v7418_v50 = vsub.s32 1, %v7416_v28 }
 0x1c3   :  { %v3876_v15 = vadd.f32 %v3872_v56, %v3843_v31  ;;  %v3889_v12 = vsub.f32 %v3196_v60, %v3880_v55  ;;  %v3892_v22 = vmul.f32 0.5, %v3888_v39  ;;  %v6956_v27 = vpop.f32.mrf.mxu1 }
 0x1c5   :  { %v3893_v46 = vmul.f32 0.5, %v3889_v12  ;;  %v3896_v51 = vadd.f32 %v3892_v22, %v3879_v25  ;;  %v6960_v60 = vpop.f32.mrf.mxu1 }
 0x1c7   :  { %v3897_v4 = vadd.f32 %v3893_v46, %v3880_v55  ;;  %vm3900_vm9 = vcmp.ge.f32.partialorder %v3896_v51, 1.0  ;;  %v6962_v26 = vpop.f32.mrf.mxu1 }
 0x1c8   :  { %v3904_v57 = vsel %vm3900_vm9, 1.0, %v7318_v5  ;;  %v3912_v40 = vsel %vm3900_vm9, 0.0, %v3896_v51 }
 0x1c9   :  { %vm3901_vm10 = vcmp.ge.f32.partialorder %v3897_v4, 1.0  ;;  %v3908_v34 = vadd.f32 %v3904_v57, %v3875_v20  ;;  %v3921_v23 = vsub.f32 %v3198_v47, %v3912_v40 }
 0x1ca   :  { %v3905_v63 = vsel %vm3901_vm10, 1.0, %v7318_v5  ;;  %v3913_v38 = vsel %vm3901_vm10, 0.0, %v3897_v4 }
 0x1cb   :  { %v3909_v37 = vadd.f32 %v3905_v63, %v3876_v15  ;;  %v3922_v9 = vsub.f32 %v3200_v24, %v3913_v38  ;;  %v3925_v2 = vmul.f32 0.5, %v3921_v23  ;;  %v6966_v24 = vpop.f32.mrf.mxu1 }
 0x1cd   :  { %v3926_v43 = vmul.f32 0.5, %v3922_v9  ;;  %v3929_v21 = vadd.f32 %v3925_v2, %v3912_v40  ;;  %v6968_v54 = vpop.f32.mrf.mxu1 }
 0x1cf   :  { %v3930_v14 = vadd.f32 %v3926_v43, %v3913_v38  ;;  %vm3933_vm11 = vcmp.ge.f32.partialorder %v3929_v21, 1.0  ;;  %v6972_v59 = vpop.f32.mrf.mxu1 }
 0x1d0   :  { %v3937_v19 = vsel %vm3933_vm11, 1.0, %v7318_v5  ;;  %v3945_v58 = vsel %vm3933_vm11, 0.0, %v3929_v21 }
 0x1d1   :  { %vm3934_vm12 = vcmp.ge.f32.partialorder %v3930_v14, 1.0  ;;  %v3941_v45 = vadd.f32 %v3937_v19, %v3908_v34  ;;  %v3954_v47 = vsub.f32 %v3204_v42, %v3945_v58  ;;  %v6975_v48 = vpop.f32.mrf.mxu1 }
 0x1d2   :  { %v3938_v29 = vsel %vm3934_vm12, 1.0, %v7318_v5  ;;  %v3946_v53 = vsel %vm3934_vm12, 0.0, %v3930_v14 }
 0x1d3   :  { %v3942_v13 = vadd.f32 %v3938_v29, %v3909_v37  ;;  %v3955_v30 = vsub.f32 %v3206_v33, %v3946_v53  ;;  %v3958_v52 = vmul.f32 0.5, %v3954_v47  ;;  %v6980_v33 = vld [vmem:[%s7293_s3] sm:$0xf]  ;;  %v6989_v25 = vpop.f32.mrf.mxu1 }
 0x1d4   :  { %7415 = vst [vmem:[#allocation17_spill] sm:$0xff] %v6980_v33  ;;  %v4020_v44 = vrot.slane %v6980_v33, %v7418_v50 }
 0x1d5   :  { %v3959_v35 = vmul.f32 0.5, %v3955_v30  ;;  %v3962_v7 = vadd.f32 %v3958_v52, %v3945_v58  ;;  %v6994_v15 = vpop.f32.mrf.mxu1 }
 0x1d7   :  { %v3963_v49 = vadd.f32 %v3959_v35, %v3946_v53  ;;  %vm3966_vm13 = vcmp.ge.f32.partialorder %v3962_v7, 1.0  ;;  %v7000_v46 = vpop.f32.mrf.mxu1 }
 0x1d8   :  { %v3970_v32 = vsel %vm3966_vm13, 1.0, %v7318_v5  ;;  %v3978_v10 = vsel %vm3966_vm13, 0.0, %v3962_v7 }
 0x1d9   :  { %vm3967_vm14 = vcmp.ge.f32.partialorder %v3963_v49, 1.0  ;;  %v3974_v11 = vadd.f32 %v3970_v32, %v3941_v45  ;;  %v3987_v8 = vsub.f32 %v6951_v0, %v3978_v10  ;;  %v7417_v0 = vsub.s32 0, %v7416_v28  ;;  %v7004_v4 = vpop.f32.mrf.mxu1 }
 0x1da   :  { %v3971_v6 = vsel %vm3967_vm14, 1.0, %v7318_v5  ;;  %v3979_v42 = vsel %vm3967_vm14, 0.0, %v3963_v49 }
 0x1db   :  { %v3975_v31 = vadd.f32 %v3971_v6, %v3942_v13  ;;  %v3988_v18 = vsub.f32 %v3210_v16, %v3979_v42  ;;  %v3991_v3 = vmul.f32 0.5, %v3987_v8  ;;  %v4016_v36 = vrot.slane %v6980_v33, %v7417_v0  ;;  %v7008_v40 = vpop.f32.mrf.mxu1 }
 0x1dd   :  { %v3992_v1 = vmul.f32 0.5, %v3988_v18  ;;  %v3995_v17 = vadd.f32 %v3991_v3, %v3978_v10  ;;  %v7012_v23 = vpop.f32.mrf.mxu1 }
 0x1df   :  { %v3996_v61 = vadd.f32 %v3992_v1, %v3979_v42  ;;  %vm3999_vm15 = vcmp.ge.f32.partialorder %v3995_v17, 1.0  ;;  %v7016_v38 = vpop.f32.mrf.mxu1 }
 0x1e0   :  { %v4003_v41 = vsel %vm3999_vm15, 1.0, %v7318_v5 }
 0x1e1   :  { %vm4000_vm0 = vcmp.ge.f32.partialorder %v3996_v61, 1.0  ;;  %v4007_v62 = vadd.f32 %v4003_v41, %v3974_v11  ;;  %v7020_v9 = vpop.f32.mrf.mxu1 }
 0x1e2   :  { %v4004_v16 = vsel %vm4000_vm0, 1.0, %v7318_v5  ;;  %v6992_v55 = vpop.f32.mrf.mxu0 }
 0x1e3   :  { %v4008_v20 = vadd.f32 %v4004_v16, %v3975_v31  ;;  %v4033_v39 = vmul.f32 %v4016_v36, %v4007_v62  ;;  %v7024_v43 = vpop.f32.mrf.mxu1 }
 0x1e4   :  { %v6998_v22 = vpop.f32.mrf.mxu0 }
 0x1e5   :  { %v4034_v56 = vmul.f32 %v4020_v44, %v4008_v20 }
 0x1e6   :  { %v7002_v51 = vpop.f32.mrf.mxu0 }
 0x1e7   :  { %v6996_v12 = vadd.f32 %v4034_v56, %v4033_v39 }
 0x1e8   :  { %v7006_v57 = vpop.f32.mrf.mxu0 }
 0x1e9   :  { %7419 = vst [vmem:[#allocation15_spill] sm:$0xff] %v6996_v12 }
 0x1ea   :  { %v7010_v34 = vpop.f32.mrf.mxu0 }
 0x1ec   :  { %v7014_v63 = vpop.f32.mrf.mxu0 }
 0x1ee   :  { %v7018_v37 = vpop.f32.mrf.mxu0 }
 0x1f0   :  { %v7022_v2 = vpop.f32.mrf.mxu0 }
 0x1f2   :  { %v7026_v14 = vpop.f32.mrf.mxu0 }
 0x1f4   :  { %v7030_v58 = vpop.f32.mrf.mxu0 }
 0x1f6   :  { %v7034_v47 = vpop.f32.mrf.mxu0 }
 0x1f8   :  { %v7038_v53 = vpop.f32.mrf.mxu0 }
 0x1fa   :  { %v7042_v30 = vpop.f32.mrf.mxu0 }
 0x1fc   :  { %v7046_v35 = vpop.f32.mrf.mxu0 }
 0x1fd   :  { %7420 = vst [vmem:[#allocation18_spill] sm:$0xff] %v7046_v35 }
 0x1fe   :  { %v7050_v49 = vpop.f32.mrf.mxu0 }
 0x1ff   :  { %7421 = vst [vmem:[#allocation4_spill] sm:$0xff] %v7050_v49 }
 0x200   :  { %v7054_v10 = vpop.f32.mrf.mxu0 }
 0x201   :  { %7422 = vst [vmem:[#allocation10_spill] sm:$0xff] %v7054_v10 }
 0x203   :  { %v3392_v21 = vpop.f32.mrf.mxu1 }
 0x205   :  { %v7028_v19 = vpop.f32.mrf.mxu1 }
 0x207   :  { %v7032_v45 = vpop.f32.mrf.mxu1 }
 0x209   :  { %v7036_v29 = vpop.f32.mrf.mxu1 }
 0x20b   :  { %v7040_v13 = vpop.f32.mrf.mxu1 }
 0x20d   :  { %v7044_v52 = vpop.f32.mrf.mxu1 }
 0x20f   :  { %v7048_v7 = vpop.f32.mrf.mxu1 }
 0x211   :  { %v7052_v32 = vpop.f32.mrf.mxu1 }
 0x213   :  { %v7056_v11 = vpop.f32.mrf.mxu1 }
 0x214   :  { %7423 = vst [vmem:[#allocation16_spill] sm:$0xff] %v7056_v11 }
 0x215   :  { %v7058_v6 = vpop.f32.mrf.mxu1 }
 0x216   :  { %7424 = vst [vmem:[#allocation37_spill] sm:$0xff] %v7058_v6 }
 0x217   :  { %v7060_v31 = vpop.f32.mrf.mxu1 }
 0x218   :  { %7425 = vst [vmem:[#allocation5_spill] sm:$0xff] %v7060_v31 }
 0x219   :  { %v7064_v3 = vpop.f32.mrf.mxu1 }
 0x21a   :  { %7426 = vst [vmem:[#allocation19_spill] sm:$0xff] %v7064_v3 }
 0x21b   :  { %v7068_v17 = vpop.f32.mrf.mxu1 }
 0x21c   :  { %7427 = vst [vmem:[#allocation20_spill] sm:$0xff] %v7068_v17  ;;  %v7322_v17 = vsub.s32 2, %v7416_v28 }
 0x21d   :  { %v7072_v41 = vpop.f32.mrf.mxu1 }
 0x21e   :  { %7428 = vst [vmem:[#allocation40_spill] sm:$0xff] %v7072_v41 }
 0x21f   :  { %v7076_v0 = vpop.f32.mrf.mxu1 }
 0x220   :  { %7429 = vst [vmem:[#allocation21_spill] sm:$0xff] %v7076_v0 }
 0x221   :  { %v7080_v50 = vpop.f32.mrf.mxu1 }
 0x222   :  { %v3465_v8 = vpop.f32.mrf.mxu0  ;;  %7430 = vst [vmem:[#allocation39_spill] sm:$0xff] %v7080_v50 }
 0x224   :  { %v3467_v42 = vpop.f32.mrf.mxu0 }
 0x226   :  { %v7062_v18 = vpop.f32.mrf.mxu0 }
 0x228   :  { %v7066_v1 = vpop.f32.mrf.mxu0 }
 0x22a   :  { %v7070_v61 = vpop.f32.mrf.mxu0 }
 0x22c   :  { %v7074_v62 = vpop.f32.mrf.mxu0 }
 0x22e   :  { %v7078_v36 = vpop.f32.mrf.mxu0 }
 0x230   :  { %v7082_v44 = vpop.f32.mrf.mxu0 }
 0x231   :  { %7431 = vst [vmem:[#allocation22_spill] sm:$0xff] %v7082_v44 }
 0x232   :  { %v7084_v20 = vpop.f32.mrf.mxu0 }
 0x233   :  { %7432 = vst [vmem:[#allocation24_spill] sm:$0xff] %v7084_v20 }
 0x234   :  { %v7088_v5 = vpop.f32.mrf.mxu0 }
 0x235   :  { %7433 = vst [vmem:[#allocation23_spill] sm:$0xff] %v7088_v5  ;;  %v7324_v5 = vsub.s32 3, %v7416_v28 }
 0x236   :  { %v7094_v10 = vpop.f32.mrf.mxu0 }
 0x237   :  { %7434 = vst [vmem:[#allocation41_spill] sm:$0xff] %v7094_v10  ;;  %v7441_v10 = vld [vmem:[#allocation38_spill] sm:$0xff] }
 0x238   :  { %v7100_v50 = vpop.f32.mrf.mxu0  ;;  %v719_v6 = vrot.slane %v7441_v10, %v7322_v17 }
 0x239   :  { %7436 = vst [vmem:[#allocation28_spill] sm:$0xff] %v7100_v50  ;;  %v723_v50 = vrot.slane %v7441_v10, %v7324_v5 }
 0x23a   :  { %v7108_v20 = vpop.f32.mrf.mxu0  ;;  %v3251_v28 = vadd.f32 %v6962_v26, %v719_v6 }
 0x23b   :  { %7439 = vst [vmem:[#allocation43_spill] sm:$0xff] %v7108_v20  ;;  %v3249_v20 = vadd.f32 %v6960_v60, %v723_v50 }
 0x23d   :  { %v3322_v10 = vadd.f32 %v6998_v22, %v3249_v20  ;;  %v3267_v22 = vadd.f32 %v6994_v15, %v719_v6  ;;  %v3277_v15 = vadd.f32 %v7012_v23, %v719_v6 }
 0x243   :  { %v3538_v16 = vpop.f32.mrf.mxu1 }
 0x245   :  { %v3540_v39 = vpop.f32.mrf.mxu1 }
 0x247   :  { %v7086_v56 = vpop.f32.mrf.mxu1 }
 0x249   :  { %v7090_v12 = vpop.f32.mrf.mxu1 }
 0x24b   :  { %v7092_v33 = vpop.f32.mrf.mxu1 }
 0x24d   :  { %v7096_v0 = vpop.f32.mrf.mxu1 }
 0x24f   :  { %v7098_v41 = vpop.f32.mrf.mxu1 }
 0x250   :  { %7435 = vst [vmem:[#allocation26_spill] sm:$0xff] %v7098_v41 }
 0x251   :  { %v7102_v49 = vpop.f32.mrf.mxu1 }
 0x252   :  { %7437 = vst [vmem:[#allocation42_spill] sm:$0xff] %v7102_v49  ;;  %v7120_v49 = vpop.f32.mrf.mxu0 }
 0x253   :  { %v7105_v3 = vpop.f32.mrf.mxu1  ;;  %7442 = vst [vmem:[#allocation12_spill] sm:$0xff] %v7120_v49  ;;  %v3253_v49 = vadd.f32 %v6966_v24, %v723_v50  ;;  %v3271_v24 = vadd.f32 %v7004_v4, %v719_v6  ;;  %v7158_v4 = vadd.f32 %v7020_v9, %v719_v6 }
 0x254   :  { %7438 = vst [vmem:[#allocation25_spill] sm:$0xff] %v7105_v3  ;;  %v3247_v3 = vadd.f32 %v6956_v27, %v719_v6  ;;  %v7129_v11 = vpop.f32.mrf.mxu0  ;;  %v3259_v27 = vadd.f32 %v6972_v59, %v723_v50 }
 0x255   :  { %v7110_v31 = vpop.f32.mrf.mxu1 }
 0x256   :  { %7440 = vst [vmem:[#allocation6_spill] sm:$0xff] %v7110_v31  ;;  %v3320_v31 = vadd.f32 %v6992_v55, %v3247_v3  ;;  %v3324_v55 = vadd.f32 %v7002_v51, %v3251_v28  ;;  %v3263_v3 = vadd.f32 %v6989_v25, %v723_v50  ;;  %v7148_v59 = vpop.f32.mrf.mxu0 }
 0x257   :  { %v7115_v35 = vpop.f32.mrf.mxu1 }
 0x258   :  { %v3393_v5 = vadd.f32 %v3392_v21, %v3320_v31  ;;  %v3269_v21 = vadd.f32 %v7000_v46, %v723_v50  ;;  %v3326_v31 = vadd.f32 %v7006_v57, %v3253_v49  ;;  %v3397_v28 = vadd.f32 %v7032_v45, %v3324_v55 }
 0x259   :  { %v7122_v41 = vpop.f32.mrf.mxu1  ;;  %v3279_v46 = vadd.f32 %v7016_v38, %v723_v50  ;;  %v3332_v45 = vadd.f32 %v7014_v63, %v3259_v27 }
 0x25a   :  { %7443 = vst [vmem:[#allocation44_spill] sm:$0xff] %v7122_v41  ;;  %v3257_v41 = vadd.f32 %v6968_v54, %v719_v6  ;;  %v3466_v26 = vadd.f32 %v3465_v8, %v3393_v5  ;;  %v3273_v54 = vadd.f32 %v7008_v40, %v723_v50  ;;  %v3399_v8 = vadd.f32 %v7036_v29, %v3326_v31 }
 0x25b   :  { %v7125_v44 = vpop.f32.mrf.mxu1  ;;  %v3470_v20 = vadd.f32 %v7062_v18, %v3397_v28  ;;  %v3405_v63 = vadd.f32 %v7044_v52, %v3332_v45  ;;  %v7450_v45 = vld [vmem:[#allocation37_spill] sm:$0xff] }
 0x25c   :  { %7444 = vst [vmem:[#allocation7_spill] sm:$0xff] %v7125_v44  ;;  %v3261_v44 = vadd.f32 %v6975_v48, %v719_v6  ;;  %v3539_v51 = vadd.f32 %v3538_v16, %v3466_v26  ;;  %v3330_v5 = vadd.f32 %v7010_v34, %v3257_v41  ;;  %v3472_v9 = vadd.f32 %v7066_v1, %v3399_v8 }
 0x25d   :  { %v7131_v17 = vpop.f32.mrf.mxu1  ;;  %v3543_v6 = vadd.f32 %v7086_v56, %v3470_v20  ;;  %v3336_v41 = vadd.f32 %v7022_v2, %v3263_v3  ;;  %v3340_v1 = vadd.f32 %v7026_v14, %v3267_v22  ;;  %v3342_v56 = vadd.f32 %v7030_v58, %v3269_v21 }
 0x25e   :  { %7445 = vst [vmem:[#allocation27_spill] sm:$0xff] %v7131_v17  ;;  %v3395_v17 = vadd.f32 %v7028_v19, %v3322_v10  ;;  %v3403_v34 = vadd.f32 %v7040_v13, %v3330_v5  ;;  %v3334_v18 = vadd.f32 %v7018_v37, %v3261_v44  ;;  %v3545_v13 = vadd.f32 %v7090_v12, %v3472_v9  ;;  %v7453_v9 = vld [vmem:[#allocation42_spill] sm:$0xff] }
 0x25f   :  { %v7139_v60 = vpop.f32.mrf.mxu1  ;;  %v3478_v37 = vadd.f32 %v7074_v62, %v3405_v63  ;;  %v3344_v12 = vadd.f32 %v7034_v47, %v3271_v24  ;;  %v3409_v26 = vadd.f32 %v7052_v32, %v3336_v41  ;;  %v3346_v28 = vadd.f32 %v7038_v53, %v3273_v54  ;;  %v7447_v47 = vld [vmem:[#allocation22_spill] sm:$0xff]  ;;  %v7451_v53 = vld [vmem:[#allocation5_spill] sm:$0xff]  ;;  %v7454_v41 = vld [vmem:[#allocation19_spill] sm:$0xff] }
 0x260   :  { %v3468_v25 = vadd.f32 %v3467_v42, %v3395_v17  ;;  %v7164_v42 = vadd.f32 %v7024_v43, %v723_v50  ;;  %v3476_v43 = vadd.f32 %v7070_v61, %v3403_v34  ;;  %v3407_v55 = vadd.f32 %v7048_v7, %v3334_v18 }
 0x261   :  { %v7150_v48 = vpop.f32.mrf.mxu1  ;;  %v3551_v62 = vadd.f32 %v7096_v0, %v3478_v37  ;;  %v3482_v24 = vadd.f32 %v7447_v47, %v3409_v26  ;;  %v3415_v34 = vadd.f32 %v7450_v45, %v3342_v56  ;;  %v3417_v54 = vadd.f32 %v7451_v53, %v3344_v12  ;;  %v7464_v45 = vld [vmem:[#allocation43_spill] sm:$0xff] }
 0x262   :  { %v3611_v40 = vpop.f32.mrf.mxu0  ;;  %v3541_v57 = vadd.f32 %v3540_v39, %v3468_v25  ;;  %v3549_v52 = vadd.f32 %v7092_v33, %v3476_v43  ;;  %v3480_v14 = vadd.f32 %v7078_v36, %v3407_v55  ;;  %v3350_v25 = vadd.f32 %v7042_v30, %v3277_v15  ;;  %v7448_v36 = vld [vmem:[#allocation26_spill] sm:$0xff]  ;;  %v7452_v30 = vld [vmem:[#allocation24_spill] sm:$0xff]  ;;  %v7455_v43 = vld [vmem:[#allocation23_spill] sm:$0xff] }
 0x263   :  { %v3684_v19 = vpop.f32.mrf.mxu1  ;;  %v3612_v49 = vadd.f32 %v3611_v40, %v3539_v51  ;;  %v7446_v51 = vld [vmem:[#allocation16_spill] sm:$0xff]  ;;  %v3419_v63 = vadd.f32 %v7454_v41, %v3346_v28  ;;  %v7459_v12 = vmov 0.0  }
 0x264   :  { %v3613_v23 = vpop.f32.mrf.mxu0  ;;  %v3413_v5 = vadd.f32 %v7446_v51, %v3340_v1 }
 0x265   :  { %v3686_v38 = vpop.f32.mrf.mxu1  ;;  %v3685_v17 = vadd.f32 %v3684_v19, %v3612_v49  ;;  %v3614_v29 = vadd.f32 %v3613_v23, %v3541_v57  ;;  %v3553_v19 = vadd.f32 %v7448_v36, %v3480_v14  ;;  %v7449_v57 = vld [vmem:[#allocation18_spill] sm:$0xff] }
 0x266   :  { %v3615_v50 = vpop.f32.mrf.mxu0  ;;  %v3352_v49 = vadd.f32 %v7449_v57, %v3279_v46  ;;  %v3486_v15 = vadd.f32 %v7452_v30, %v3413_v5  ;;  %v7457_v46 = vld [vmem:[#allocation25_spill] sm:$0xff] }
 0x267   :  { %v3688_v16 = vpop.f32.mrf.mxu1  ;;  %v3687_v39 = vadd.f32 %v3686_v38, %v3614_v29  ;;  %v3616_v10 = vadd.f32 %v3615_v50, %v3543_v6  ;;  %v3762_v27 = vmul.f32 0.5, %v3685_v17  ;;  %v3555_v6 = vadd.f32 %v7453_v9, %v3482_v24  ;;  %v7466_v9 = vld [vmem:[#allocation10_spill] sm:$0xff] }
 0x268   :  { %v3617_v2 = vpop.f32.mrf.mxu0  ;;  %v3488_v50 = vadd.f32 %v7455_v43, %v3415_v34  ;;  %v7469_v43 = vld [vmem:[#allocation7_spill] sm:$0xff] }
 0x269   :  { %v3690_v44 = vpop.f32.mrf.mxu1  ;;  %3727 = vst.msk [vmem:[#allocation2 + $0x18] sm:$0xff] %vm3726_vm1, %v3687_v39  ;;  %v3689_v61 = vadd.f32 %v3688_v16, %v3616_v10  ;;  %v3618_v3 = vadd.f32 %v3617_v2, %v3545_v13  ;;  %vm3770_vm2 = vcmp.ge.f32.partialorder %v3762_v27, 1.0  ;;  %v7456_v16 = vld [vmem:[#allocation41_spill] sm:$0xff]  ;;  %v3559_v39 = vadd.f32 %v7457_v46, %v3486_v15  ;;  %v7465_v15 = vld [vmem:[#allocation44_spill] sm:$0xff] }
 0x26a   :  { %v3621_v58 = vpop.f32.mrf.mxu0  ;;  %v3782_v7 = vsel %vm3770_vm2, 0.0, %v3762_v27  ;;  %v3490_v13 = vadd.f32 %v7456_v16, %v3417_v54  ;;  %v3774_v26 = vsel %vm3770_vm2, 1.0, %v7459_v12 }
 0x26b   :  { %v3694_v22 = vpop.f32.mrf.mxu1  ;;  %v3691_v21 = vadd.f32 %v3690_v44, %v3618_v3  ;;  %v3622_v31 = vadd.f32 %v3621_v58, %v3549_v52  ;;  %v3791_v33 = vsub.f32 %v3689_v61, %v3782_v7  ;;  %v7458_v44 = vld [vmem:[#allocation6_spill] sm:$0xff] }
 0x26c   :  { %v3623_v32 = vpop.f32.mrf.mxu0  ;;  %v3561_v52 = vadd.f32 %v7458_v44, %v3488_v50 }
 0x26d   :  { %v3696_v40 = vpop.f32.mrf.mxu1  ;;  %3731 = vst.msk [vmem:[#allocation2 + $0x38] sm:$0xff] %vm3726_vm1, %v3691_v21  ;;  %v3695_v8 = vadd.f32 %v3694_v22, %v3622_v31  ;;  %v3624_v20 = vadd.f32 %v3623_v32, %v3551_v62  ;;  %v3795_v0 = vmul.f32 0.5, %v3791_v33  ;;  %v7460_v21 = vld [vmem:[#allocation20_spill] sm:$0xff]  ;;  %v3563_v32 = vadd.f32 %v7115_v35, %v3490_v13 }
 0x26e   :  { %v3625_v23 = vpop.f32.mrf.mxu0  ;;  %v3423_v31 = vadd.f32 %v7460_v21, %v3350_v25  ;;  %v7461_v33 = vld [vmem:[#allocation28_spill] sm:$0xff] }
 0x26f   :  { %v3698_v38 = vpop.f32.mrf.mxu1  ;;  %v3697_v17 = vadd.f32 %v3696_v40, %v3624_v20  ;;  %v3626_v29 = vadd.f32 %v3625_v23, %v3553_v19  ;;  %v3799_v18 = vadd.f32 %v3795_v0, %v3782_v7  ;;  %v3492_v28 = vadd.f32 %v7461_v33, %v3419_v63  ;;  %v7462_v25 = vld [vmem:[#allocation4_spill] sm:$0xff] }
 0x270   :  { %v3627_v10 = vpop.f32.mrf.mxu0  ;;  %v3759_v56 = vld [vmem:[#allocation2 + $0x18] sm:$0xff]  ;;  %v3354_v20 = vadd.f32 %v7462_v25, %v7158_v4  ;;  %v7463_v0 = vld [vmem:[#allocation40_spill] sm:$0xff]  ;;  %v3496_v34 = vadd.f32 %v7464_v45, %v3423_v31 }
 0x271   :  { %v3700_v1 = vpop.f32.mrf.mxu1  ;;  %3735 = vst.msk [vmem:[#allocation2 + $0x58] sm:$0xff] %vm3726_vm1, %v3697_v17  ;;  %v7201_v55 = vadd.f32 %v3698_v38, %v3626_v29  ;;  %v3628_v37 = vadd.f32 %v3627_v10, %v3555_v6  ;;  %v7203_v2 = vmul.f32 0.5, %v3759_v56  ;;  %vm3803_vm3 = vcmp.ge.f32.partialorder %v3799_v18, 1.0  ;;  %v7467_v17 = vld [vmem:[#allocation21_spill] sm:$0xff] }
 0x272   :  { %v3631_v61 = vpop.f32.mrf.mxu0  ;;  %v3807_v14 = vsel %vm3803_vm3, 1.0, %v7459_v12  ;;  %v3815_v58 = vsel %vm3803_vm3, 0.0, %v3799_v18  ;;  %v3425_v57 = vadd.f32 %v7463_v0, %v3352_v49  ;;  %v3356_v6 = vadd.f32 %v7466_v9, %v7164_v42  ;;  %v7468_v18 = vld [vmem:[#allocation12_spill] sm:$0xff] }
 0x273   :  { %v3704_v3 = vpop.f32.mrf.mxu1  ;;  %v3701_v22 = vadd.f32 %v3700_v1, %v3628_v37  ;;  %v3632_v7 = vadd.f32 %v3631_v61, %v3559_v39  ;;  %vm3771_vm4 = vcmp.ge.f32.partialorder %v7203_v2, 1.0  ;;  %v3811_v62 = vadd.f32 %v3807_v14, %v3774_v26  ;;  %v7470_v39 = vld [vmem:[#allocation39_spill] sm:$0xff] }
 0x274   :  { %v3633_v51 = vpop.f32.mrf.mxu0  ;;  %v3783_v47 = vsel %vm3771_vm4, 0.0, %v7203_v2  ;;  %v3788_v27 = vld [vmem:[#allocation2 + $0x38] sm:$0xff]  ;;  %v3824_v24 = vsub.f32 %v3695_v8, %v3815_v58  ;;  %v3565_v8 = vadd.f32 %v7465_v15, %v3492_v28  ;;  %v3427_v29 = vadd.f32 %v7467_v17, %v3354_v20  ;;  %v7472_v2 = vld [vmem:[#allocation36_spill] sm:$0xff] }
 0x275   :  { %v3706_v5 = vpop.f32.mrf.mxu1  ;;  %3739 = vst.msk [vmem:[#allocation2 + $0x78] sm:$0xff] %vm3726_vm1, %v3701_v22  ;;  %v3634_v40 = vadd.f32 %v3633_v51, %v3561_v52  ;;  %v7217_v36 = vadd.f32 %v3704_v3, %v3632_v7  ;;  %v3792_v19 = vsub.f32 %v3788_v27, %v3783_v47  ;;  %v3498_v41 = vadd.f32 %v7468_v18, %v3425_v57  ;;  %v7471_v1 = vld [vmem:[#allocation27_spill] sm:$0xff] }
 0x276   :  { %v3635_v53 = vpop.f32.mrf.mxu0  ;;  %v3828_v30 = vmul.f32 0.5, %v3824_v24  ;;  %v3569_v50 = vadd.f32 %v7469_v43, %v3496_v34  ;;  %v3429_v10 = vadd.f32 %v7470_v39, %v3356_v6  ;;  %v3500_v42 = vadd.f32 %v7129_v11, %v3427_v29 }
 0x277   :  { %v3708_v54 = vpop.f32.mrf.mxu1  ;;  %v3636_v23 = vadd.f32 %v3635_v53, %v3563_v32  ;;  %v3707_v35 = vadd.f32 %v3706_v5, %v3634_v40  ;;  %v3796_v38 = vmul.f32 0.5, %v3792_v19  ;;  %v3571_v56 = vadd.f32 %v7471_v1, %v3498_v41 }
 0x278   :  { %v3637_v4 = vpop.f32.mrf.mxu0  ;;  %v3832_v49 = vadd.f32 %v3828_v30, %v3815_v58  ;;  %v3502_v26 = vadd.f32 %v7148_v59, %v3429_v10  ;;  %v3821_v11 = vld [vmem:[#allocation2 + $0x58] sm:$0xff]  ;;  %v3573_v31 = vadd.f32 %v7139_v60, %v3500_v42  ;;  %vm4054_vm3 = vcmask 7168  }
 0x279   :  { %v3710_v63 = vpop.f32.mrf.mxu1  ;;  %3743 = vst.msk [vmem:[#allocation2 + $0x98] sm:$0xff] %vm3726_vm1, %v3707_v35  ;;  %v3638_v16 = vadd.f32 %v3637_v4, %v3565_v8  ;;  %v7230_v13 = vadd.f32 %v3708_v54, %v3636_v23  ;;  %v7232_v46 = vadd.f32 %v3796_v38, %v3783_v47 }
 0x27a   :  { %v3641_v37 = vpop.f32.mrf.mxu0  ;;  %vm3836_vm5 = vcmp.ge.f32.partialorder %v3832_v49, 1.0  ;;  %v3575_v27 = vadd.f32 %v7150_v48, %v3502_v26 }
 0x27b   :  { %v3714_v44 = vpop.f32.mrf.mxu1  ;;  %v3642_v52 = vadd.f32 %v3641_v37, %v3569_v50  ;;  %v3711_v61 = vadd.f32 %v3710_v63, %v3638_v16  ;;  %vm3804_vm6 = vcmp.ge.f32.partialorder %v7232_v46, 1.0  ;;  %v3840_v3 = vsel %vm3836_vm5, 1.0, %v7459_v12 }
 0x27c   :  { %v3643_v14 = vpop.f32.mrf.mxu0  ;;  %v3816_v22 = vsel %vm3804_vm6, 0.0, %v7232_v46  ;;  %v3844_v7 = vadd.f32 %v3840_v3, %v3811_v62  ;;  %v3848_v21 = vsel %vm3836_vm5, 0.0, %v3832_v49  ;;  %v3854_v53 = vld [vmem:[#allocation2 + $0x78] sm:$0xff] }
 0x27d   :  { %v3716_v58 = vpop.f32.mrf.mxu1  ;;  %3747 = vst.msk [vmem:[#allocation2 + $0xb8] sm:$0xff] %vm3726_vm1, %v3711_v61  ;;  %v3644_v33 = vadd.f32 %v3643_v14, %v3571_v56  ;;  %v3715_v28 = vadd.f32 %v3714_v44, %v3642_v52  ;;  %v3825_v51 = vsub.f32 %v3821_v11, %v3816_v22  ;;  %v3857_v59 = vsub.f32 %v7201_v55, %v3848_v21 }
 0x27e   :  { %v3645_v5 = vpop.f32.mrf.mxu0 }
 0x27f   :  { %v3718_v47 = vpop.f32.mrf.mxu1  ;;  %v3646_v24 = vadd.f32 %v3645_v5, %v3573_v31  ;;  %v3717_v32 = vadd.f32 %v3716_v58, %v3644_v33  ;;  %v3829_v40 = vmul.f32 0.5, %v3825_v51  ;;  %v3861_v62 = vmul.f32 0.5, %v3857_v59 }
 0x280   :  { %v3647_v19 = vpop.f32.mrf.mxu0  ;;  %v3887_v6 = vld [vmem:[#allocation2 + $0x98] sm:$0xff]  ;;  %v3775_v31 = vsel %vm3771_vm4, 1.0, %v7459_v12 }
 0x281   :  { %v3720_v25 = vpop.f32.mrf.mxu1  ;;  %3751 = vst.msk [vmem:[#allocation2 + $0xd8] sm:$0xff] %vm3726_vm1, %v3717_v32  ;;  %v3648_v60 = vadd.f32 %v3647_v19, %v3575_v27  ;;  %v3719_v20 = vadd.f32 %v3718_v47, %v3646_v24  ;;  %v3833_v0 = vadd.f32 %v3829_v40, %v3816_v22  ;;  %v3865_v57 = vadd.f32 %v3861_v62, %v3848_v21  ;;  %v7474_v19 = vld [vmem:[#allocation17_spill] sm:$0xff] }
 0x282   :  { %v3808_v22 = vsel %vm3804_vm6, 1.0, %v7459_v12  ;;  %v7473_v40 = vsub.s32 2, %v7472_v2 }
 0x283   :  { %v3721_v45 = vadd.f32 %v3720_v25, %v3648_v60  ;;  %vm3837_vm7 = vcmp.ge.f32.partialorder %v3833_v0, 1.0  ;;  %vm3869_vm8 = vcmp.ge.f32.partialorder %v3865_v57, 1.0  ;;  %v3812_v51 = vadd.f32 %v3808_v22, %v3775_v31 }
 0x284   :  { %v3849_v34 = vsel %vm3837_vm7, 0.0, %v3833_v0  ;;  %v3873_v55 = vsel %vm3869_vm8, 1.0, %v7459_v12  ;;  %v3881_v54 = vsel %vm3869_vm8, 0.0, %v3865_v57  ;;  %v3920_v16 = vld [vmem:[#allocation2 + $0xb8] sm:$0xff]  ;;  %v3841_v33 = vsel %vm3837_vm7, 1.0, %v7459_v12 }
 0x285   :  { %3755 = vst.msk [vmem:[#allocation2 + $0xf8] sm:$0xff] %vm3726_vm1, %v3721_v45  ;;  %v3858_v48 = vsub.f32 %v3854_v53, %v3849_v34  ;;  %v3877_v30 = vadd.f32 %v3873_v55, %v3844_v7  ;;  %v3890_v15 = vsub.f32 %v7217_v36, %v3881_v54  ;;  %v3845_v27 = vadd.f32 %v3841_v33, %v3812_v51 }
 0x286   :  { %v4024_v25 = vrot.slane %v7474_v19, %v7473_v40 }
 0x287   :  { %v3862_v8 = vmul.f32 0.5, %v3858_v48  ;;  %v3894_v23 = vmul.f32 0.5, %v3890_v15 }
 0x288   :  { %v3953_v3 = vld [vmem:[#allocation2 + $0xd8] sm:$0xff] }
 0x289   :  { %v3866_v35 = vadd.f32 %v3862_v8, %v3849_v34  ;;  %v3898_v38 = vadd.f32 %v3894_v23, %v3881_v54  ;;  %v7476_v23 = vsub.s32 3, %v7472_v2 }
 0x28b   :  { %vm3870_vm9 = vcmp.ge.f32.partialorder %v3866_v35, 1.0  ;;  %vm3902_vm10 = vcmp.ge.f32.partialorder %v3898_v38, 1.0 }
 0x28c   :  { %v3882_v9 = vsel %vm3870_vm9, 0.0, %v3866_v35  ;;  %v3906_v29 = vsel %vm3902_vm10, 1.0, %v7459_v12  ;;  %v3914_v18 = vsel %vm3902_vm10, 0.0, %v3898_v38  ;;  %v3874_v47 = vsel %vm3870_vm9, 1.0, %v7459_v12  ;;  %v3986_v32 = vld [vmem:[#allocation2 + $0xf8] sm:$0xff] }
 0x28d   :  { %v3891_v17 = vsub.f32 %v3887_v6, %v3882_v9  ;;  %v3910_v41 = vadd.f32 %v3906_v29, %v3877_v30  ;;  %v3923_v4 = vsub.f32 %v7230_v13, %v3914_v18  ;;  %v3878_v62 = vadd.f32 %v3874_v47, %v3845_v27  ;;  %v7475_v30 = vld [vmem:[#allocation15_spill] sm:$0xff] }
 0x28e   :  { %v4028_v35 = vrot.slane %v7474_v19, %v7476_v23 }
 0x28f   :  { %v3895_v63 = vmul.f32 0.5, %v3891_v17  ;;  %v3927_v49 = vmul.f32 0.5, %v3923_v4 }
 0x291   :  { %v3899_v43 = vadd.f32 %v3895_v63, %v3882_v9  ;;  %v3931_v36 = vadd.f32 %v3927_v49, %v3914_v18  ;;  %v4045_v18 = vstv %s4044_s23 }
 0x293   :  { %vm3903_vm11 = vcmp.ge.f32.partialorder %v3899_v43, 1.0  ;;  %vm3935_vm12 = vcmp.ge.f32.partialorder %v3931_v36, 1.0 }
 0x294   :  { %v3915_v50 = vsel %vm3903_vm11, 0.0, %v3899_v43  ;;  %v3939_v10 = vsel %vm3935_vm12, 1.0, %v7459_v12  ;;  %v3947_v42 = vsel %vm3935_vm12, 0.0, %v3931_v36  ;;  %v3907_v46 = vsel %vm3903_vm11, 1.0, %v7459_v12 }
 0x295   :  { %v3924_v39 = vsub.f32 %v3920_v16, %v3915_v50  ;;  %v3943_v1 = vadd.f32 %v3939_v10, %v3910_v41  ;;  %v3956_v56 = vsub.f32 %v3715_v28, %v3947_v42  ;;  %v3911_v45 = vadd.f32 %v3907_v46, %v3878_v62 }
 0x297   :  { %v3928_v37 = vmul.f32 0.5, %v3924_v39  ;;  %v3960_v44 = vmul.f32 0.5, %v3956_v56 }
 0x299   :  { %v3932_v52 = vadd.f32 %v3928_v37, %v3915_v50  ;;  %v3964_v61 = vadd.f32 %v3960_v44, %v3947_v42 }
 0x29b   :  { %vm3936_vm13 = vcmp.ge.f32.partialorder %v3932_v52, 1.0  ;;  %vm3968_vm14 = vcmp.ge.f32.partialorder %v3964_v61, 1.0 }
 0x29c   :  { %v3948_v13 = vsel %vm3936_vm13, 0.0, %v3932_v52  ;;  %v3972_v14 = vsel %vm3968_vm14, 1.0, %v7459_v12  ;;  %v3980_v58 = vsel %vm3968_vm14, 0.0, %v3964_v61  ;;  %v3940_v0 = vsel %vm3936_vm13, 1.0, %v7459_v12 }
 0x29d   :  { %v3957_v26 = vsub.f32 %v3953_v3, %v3948_v13  ;;  %v3976_v11 = vadd.f32 %v3972_v14, %v3943_v1  ;;  %v3989_v7 = vsub.f32 %v3719_v20, %v3980_v58  ;;  %v3944_v55 = vadd.f32 %v3940_v0, %v3911_v45 }
 0x29f   :  { %v3961_v21 = vmul.f32 0.5, %v3957_v26  ;;  %v3993_v28 = vmul.f32 0.5, %v3989_v7 }
 0x2a1   :  { %v3965_v5 = vadd.f32 %v3961_v21, %v3948_v13  ;;  %v3997_v59 = vadd.f32 %v3993_v28, %v3980_v58 }
 0x2a3   :  { %vm3969_vm15 = vcmp.ge.f32.partialorder %v3965_v5, 1.0  ;;  %vm4001_vm0 = vcmp.ge.f32.partialorder %v3997_v59, 1.0 }
 0x2a4   :  { %v3981_v24 = vsel %vm3969_vm15, 0.0, %v3965_v5  ;;  %v4005_v20 = vsel %vm4001_vm0, 1.0, %v7459_v12  ;;  %v3973_v53 = vsel %vm3969_vm15, 1.0, %v7459_v12 }
 0x2a5   :  { %v3990_v60 = vsub.f32 %v3986_v32, %v3981_v24  ;;  %v4009_v57 = vadd.f32 %v4005_v20, %v3976_v11  ;;  %v3977_v8 = vadd.f32 %v3973_v53, %v3944_v55 }
 0x2a7   :  { %v3994_v34 = vmul.f32 0.5, %v3990_v60  ;;  %v4035_v48 = vmul.f32 %v4024_v25, %v4009_v57 }
 0x2a9   :  { %v3998_v54 = vadd.f32 %v3994_v34, %v3981_v24  ;;  %v4038_v15 = vadd.f32 %v7475_v30, %v4035_v48 }
 0x2ab   :  { %vm4002_vm2 = vcmp.ge.f32.partialorder %v3998_v54, 1.0 }
 0x2ac   :  { %v4006_v38 = vsel %vm4002_vm2, 1.0, %v7459_v12 }
 0x2ad   :  { %v4010_v9 = vadd.f32 %v4006_v38, %v3977_v8 }
 0x2af   :  { %v4036_v6 = vmul.f32 %v4028_v35, %v4010_v9 }
 0x2b1   :  { %v4039_v17 = vsel %vm3726_vm1, %v4036_v6, 0.0 }
 0x2b2   :  { %v4040_v29 = vadd.f32 %v4039_v17, %v4038_v15 }
 0x2b4   :  { %4041 = vadd.xlane.f32.xlu0 %v4040_v29 }
 0x33d   :  { %v4042_v41 = vpop.xlane.xlu0 %4041 }
 0x33e   :  { %v4046_v4 = vadd.f32 %v4045_v18, %v4042_v41 }
 0x340   :  { %v4460_v63 = vmul.f32 -0.125, %v4046_v4 }
 0x342   :  { %v4049_v49 = vmul.f32 1.442695, %v4460_v63 }
 0x344   :  { %5051 = vpow2.f32 %v4049_v49 }
 0x351   :  { %v5052_v43 = vpop.eup %5051 }
 0x352   :  { %v4051_v36 = vadd.f32 1.0, %v5052_v43 }
 0x354   :  { %5053 = vrcp.f32 %v4051_v36 }
 0x361   :  { %v5054_v12 = vpop.eup %5053 }
 0x362   :  { %4055 = vst.msk [vmem:[%s7295_s5] sm:$0xff] %vm4054_vm3, %v5054_v12 }

</bundles_post_ra>
